<compile_context>
chip_gen: v6e
topology: v6e:2x2x1
jax: 0.10.0
libtpu: 0.0.40
codegen_flags: <defaults>
</compile_context>

<pallas_src>
import math

import jax
import jax.numpy as jnp
from jax import lax
from jax.experimental import pallas as pl
from jax.experimental.pallas import tpu as pltpu


# ----------------------------------------------------------------------------
# Kernel 1: one LSTM layer. grid = (T // T_CHUNK,), sequential ("arbitrary").
# Weights use constant index maps -> DMA'd once and stay resident in VMEM.
# Per grid step we DMA only one (T_CHUNK, B, F) time chunk (bounded VMEM for
# long sequences) and loop over it with an unrolled fori_loop.
# ----------------------------------------------------------------------------
def _lstm_layer_kernel(x_ref, wih_ref, whh_ref, b_ref,   # inputs
                       seq_ref, last_ref,                # outputs
                       h_scr, c_scr):                    # scratch (persist)
    @pl.when(pl.program_id(0) == 0)
    def _():
        h_scr[...] = jnp.zeros_like(h_scr)
        c_scr[...] = jnp.zeros_like(c_scr)

    t_chunk = x_ref.shape[0]
    H = h_scr.shape[1]

    def step(t, carry):
        x_t = x_ref[t]                                   # (B, Din), lane-dense
        gates = (jnp.dot(x_t, wih_ref[...], preferred_element_type=jnp.float32)
                 + jnp.dot(h_scr[...], whh_ref[...],
                           preferred_element_type=jnp.float32)
                 + b_ref[...])                           # (B, 4H)
        i = jax.nn.sigmoid(gates[:, 0 * H:1 * H])
        f = jax.nn.sigmoid(gates[:, 1 * H:2 * H])
        g = jnp.tanh(gates[:, 2 * H:3 * H])
        o = jax.nn.sigmoid(gates[:, 3 * H:4 * H])
        c = f * c_scr[...] + i * g
        h = o * jnp.tanh(c)
        c_scr[...] = c
        h_scr[...] = h
        seq_ref[t] = h.astype(seq_ref.dtype)
        return carry

    lax.fori_loop(0, t_chunk, step, 0, unroll=True)
    # Fused LastPoolRNN: resident output; final writeback holds h_{T-1}.
    last_ref[...] = h_scr[...].astype(last_ref.dtype)


def lstm_layer(x_tbf, wih, whh, b):
    """One LSTM layer. x_tbf: (T, B, Din). Returns (seq (T,B,H), last (B,H))."""
    T, B, Din = x_tbf.shape
    H = whh.shape[0]
    # Chunk the time axis so per-step VMEM stays bounded for long sequences
    # while amortizing the ~0.35us/step pipeline overhead.
    t_chunk = math.gcd(T, 64)
    grid = (T // t_chunk,)

    return pl.pallas_call(
        _lstm_layer_kernel,
        out_shape=(
            jax.ShapeDtypeStruct((T, B, H), x_tbf.dtype),   # full hidden seq
            jax.ShapeDtypeStruct((B, H), x_tbf.dtype),      # fused last-pool
        ),
        grid_spec=pltpu.PrefetchScalarGridSpec(
            num_scalar_prefetch=0,
            grid=grid,
            in_specs=[
                pl.BlockSpec((t_chunk, B, Din), lambda t: (t, 0, 0)),
                pl.BlockSpec((Din, 4 * H), lambda t: (0, 0)),   # resident
                pl.BlockSpec((H, 4 * H), lambda t: (0, 0)),     # resident
                pl.BlockSpec((1, 4 * H), lambda t: (0, 0)),     # resident
            ],
            out_specs=[
                pl.BlockSpec((t_chunk, B, H), lambda t: (t, 0, 0)),
                pl.BlockSpec((B, H), lambda t: (0, 0)),         # resident
            ],
            scratch_shapes=[
                pltpu.VMEM((B, H), jnp.float32),   # h state
                pltpu.VMEM((B, H), jnp.float32),   # c state
            ],
        ),
        compiler_params=pltpu.CompilerParams(
            dimension_semantics=("arbitrary",)),   # recurrence is sequential
    )(x_tbf, wih, whh, b)


# ----------------------------------------------------------------------------
# Kernel 2: fused classifier head (concat_fc + fc), eval mode.
#   BN1 (scale/shift) -> Linear(H, n_hidden) -> ReLU -> BN2 -> Linear(n_hidden,
#   n_output). Everything stays in VMEM; single kernel call.
# ----------------------------------------------------------------------------
def _head_kernel(h_ref, s1_ref, t1_ref, w1_ref, b1_ref,
                 s2_ref, t2_ref, w2_ref, b2_ref, o_ref):
    x = h_ref[...].astype(jnp.float32)
    x = x * s1_ref[...] + t1_ref[...]                     # BatchNorm1d (eval)
    x = jnp.dot(x, w1_ref[...], preferred_element_type=jnp.float32) + b1_ref[...]
    x = jnp.maximum(x, 0.0)                               # ReLU
    x = x * s2_ref[...] + t2_ref[...]                     # BatchNorm1d (eval)
    x = jnp.dot(x, w2_ref[...], preferred_element_type=jnp.float32) + b2_ref[...]
    o_ref[...] = x.astype(o_ref.dtype)


def head_forward(h, s1, t1, w1, b1, s2, t2, w2, b2):
    B, H = h.shape
    Dh = w1.shape[1]
    Do = w2.shape[1]
    full = lambda shp: pl.BlockSpec(shp, lambda: tuple(0 for _ in shp))
    return pl.pallas_call(
        _head_kernel,
        out_shape=jax.ShapeDtypeStruct((B, Do), h.dtype),
        in_specs=[full((B, H)),
                  full((1, H)), full((1, H)), full((H, Dh)), full((1, Dh)),
                  full((1, Dh)), full((1, Dh)), full((Dh, Do)), full((1, Do))],
        out_specs=full((B, Do)),
    )(h, s1, t1, w1, b1, s2, t2, w2, b2)


# ----------------------------------------------------------------------------
# Full forward
# ----------------------------------------------------------------------------
def lstm_ptb_forward(x, params, config):
    """x: (B, n_embed, T) or (B, T, n_embed). Returns logits (B, n_output)."""
    n_embed = config['n_embed']
    if x.shape[1] == n_embed:                 # matches extract_features()
        x = jnp.transpose(x, (0, 2, 1))       # (B, T, C)
    h = jnp.transpose(x, (1, 0, 2))           # time-major (T, B, C)

    last = None
    for (wih, whh, b) in params['lstm_layers']:
        h, last = lstm_layer(h, wih, whh, b)  # last of final layer == LastPool

    # LastPoolRNN(b_dir=False): features[:, :, -1] == h_{T-1} (fused above).
    s1, t1, w1, b1, s2, t2, w2, b2 = params['head']
    return head_forward(last, s1, t1, w1, b1, s2, t2, w2, b2)


# ----------------------------------------------------------------------------
# Parameter construction / pure-JAX reference
# ----------------------------------------------------------------------------
def _fold_bn(gamma, beta, mean, var, eps=1e-5):
    s = gamma / jnp.sqrt(var + eps)
    t = beta - mean * s
    return s[None, :].astype(jnp.float32), t[None, :].astype(jnp.float32)


def init_params(key, config):
    n_embed = config['n_embed']
    H = 2 * config['n_hidden']                 # nn.LSTM hidden size
    n_hidden = config['n_hidden']
    n_out = config['n_output']

    keys = iter(jax.random.split(key, 32))
    layers = []
    din = n_embed
    for _ in range(config['n_layers']):
        wih = 0.1 * jax.random.normal(next(keys), (din, 4 * H), jnp.float32)
        whh = 0.1 * jax.random.normal(next(keys), (H, 4 * H), jnp.float32)
        b = 0.1 * jax.random.normal(next(keys), (1, 4 * H), jnp.float32)
        layers.append((wih, whh, b))
        din = H

    def bn(k, d):
        k1, k2, k3, k4 = jax.random.split(k, 4)
        gamma = 1.0 + 0.1 * jax.random.normal(k1, (d,), jnp.float32)
        beta = 0.1 * jax.random.normal(k2, (d,), jnp.float32)
        mean = 0.1 * jax.random.normal(k3, (d,), jnp.float32)
        var = 1.0 + 0.1 * jax.random.uniform(k4, (d,), jnp.float32)
        return _fold_bn(gamma, beta, mean, var)

    s1, t1 = bn(next(keys), H)
    w1 = 0.1 * jax.random.normal(next(keys), (H, n_hidden), jnp.float32)
    b1 = 0.1 * jax.random.normal(next(keys), (1, n_hidden), jnp.float32)
    s2, t2 = bn(next(keys), n_hidden)
    w2 = 0.1 * jax.random.normal(next(keys), (n_hidden, n_out), jnp.float32)
    b2 = 0.1 * jax.random.normal(next(keys), (1, n_out), jnp.float32)

    return {'lstm_layers': layers, 'head': (s1, t1, w1, b1, s2, t2, w2, b2)}


def ref_forward(x, params, config):
    """Pure-JAX reference (same math, lax.scan recurrence)."""
    n_embed = config['n_embed']
    if x.shape[1] == n_embed:
        x = jnp.transpose(x, (0, 2, 1))
    h = jnp.transpose(x, (1, 0, 2)).astype(jnp.float32)
    for (wih, whh, b) in params['lstm_layers']:
        T, B, _ = h.shape
        H = whh.shape[0]

        def step(carry, x_t):
            hp, cp = carry
            gates = x_t @ wih + hp @ whh + b
            i = jax.nn.sigmoid(gates[:, :H])
            f = jax.nn.sigmoid(gates[:, H:2 * H])
            g = jnp.tanh(gates[:, 2 * H:3 * H])
            o = jax.nn.sigmoid(gates[:, 3 * H:])
            c = f * cp + i * g
            hn = o * jnp.tanh(c)
            return (hn, c), hn

        init = (jnp.zeros((B, H), jnp.float32), jnp.zeros((B, H), jnp.float32))
        _, h = lax.scan(step, init, h)
    pooled = h[-1]                                  # LastPoolRNN
    s1, t1, w1, b1, s2, t2, w2, b2 = params['head']
    y = pooled * s1 + t1
    y = jnp.maximum(y @ w1 + b1, 0.0)
    y = y * s2 + t2
    return y @ w2 + b2


if __name__ == "__main__":
    config = {
        'n_embed': 4,       # input channels
        'n_hidden': 32,     # LSTM hidden = 2 * 32 = 64
        'n_output': 5,
        'n_layers': 2,
        'b_dir': False,
        'rnn_drop': 0.0,    # dropout identity (eval)
        'fc_drop': 0.0,
        'concat_pool': False,
    }
    B, T = 2, 16

    key = jax.random.PRNGKey(0)
    k_x, k_p = jax.random.split(key)
    x = jax.random.normal(k_x, (B, config['n_embed'], T), dtype=jnp.float32)
    params = init_params(k_p, config)

    out = jax.block_until_ready(lstm_ptb_forward(x, params, config))
    ref = jax.block_until_ready(ref_forward(x, params, config))

    assert out.shape == (B, config['n_output'])
    assert jnp.allclose(out, ref, atol=1e-4, rtol=1e-4), (
        f"max abs err = {float(jnp.max(jnp.abs(out - ref)))}")

    print("KERNEL_OK")
</pallas_src>

<mosaic_0001>
module attributes {stable_mosaic.version = 11 : i64} {
  func.func @_lstm_layer_kernel(%arg0: i32, %arg1: memref<16x2x4xf32, #tpu.memory_space<vmem>>, %arg2: memref<4x256xf32, #tpu.memory_space<vmem>>, %arg3: memref<64x256xf32, #tpu.memory_space<vmem>>, %arg4: memref<1x256xf32, #tpu.memory_space<vmem>>, %arg5: memref<16x2x64xf32, #tpu.memory_space<vmem>>, %arg6: memref<2x64xf32, #tpu.memory_space<vmem>>, %arg7: memref<2x64xf32, #tpu.memory_space<vmem>>, %arg8: memref<2x64xf32, #tpu.memory_space<vmem>>) attributes {dimension_semantics = [#tpu.dimension_semantics<arbitrary>], iteration_bounds = array<i64: 1>, scalar_prefetch = 0 : i64, scratch_operands = 2 : i64, tpu.core_type = #tpu.core_type<tc>, window_params = [{transform_indices = @transform_0, window_bounds = array<i64: 16, 2, 4>}, {pipeline_mode = #tpu.pipeline_mode<synchronous>, transform_indices = @transform_1, window_bounds = array<i64: 4, 256>}, {pipeline_mode = #tpu.pipeline_mode<synchronous>, transform_indices = @transform_2, window_bounds = array<i64: 64, 256>}, {pipeline_mode = #tpu.pipeline_mode<synchronous>, transform_indices = @transform_3, window_bounds = array<i64: 1, 256>}, {transform_indices = @transform_4, window_bounds = array<i64: 16, 2, 64>}, {pipeline_mode = #tpu.pipeline_mode<synchronous>, transform_indices = @transform_5, window_bounds = array<i64: 2, 64>}]} {
    %c0_i32 = arith.constant 0 : i32
    %0 = arith.cmpi eq, %arg0, %c0_i32 : i32
    %1 = arith.extui %0 : i1 to i32
    %c0_i32_0 = arith.constant 0 : i32
    %2 = arith.cmpi ne, %1, %c0_i32_0 : i32
    scf.if %2 {
      %cst_372 = arith.constant 0.000000e+00 : f32
      %709 = vector.broadcast %cst_372 : f32 to vector<2x64xf32>
      %c0_373 = arith.constant 0 : index
      %c0_374 = arith.constant 0 : index
      %710 = vector.load %arg7[%c0_373, %c0_374] : memref<2x64xf32, #tpu.memory_space<vmem>>, vector<2x64xf32>
      tpu.vector_store %arg7[%c0_373, %c0_374], %709 {strides = array<i32>} : memref<2x64xf32, #tpu.memory_space<vmem>>, vector<2x64xf32>,
      %cst_375 = arith.constant 0.000000e+00 : f32
      %711 = vector.broadcast %cst_375 : f32 to vector<2x64xf32>
      %c0_376 = arith.constant 0 : index
      %c0_377 = arith.constant 0 : index
      %712 = vector.load %arg8[%c0_376, %c0_377] : memref<2x64xf32, #tpu.memory_space<vmem>>, vector<2x64xf32>
      tpu.vector_store %arg8[%c0_376, %c0_377], %711 {strides = array<i32>} : memref<2x64xf32, #tpu.memory_space<vmem>>, vector<2x64xf32>,
    } else {
    }
    %c0_i32_1 = arith.constant 0 : i32
    %3 = arith.index_cast %c0_i32_1 : i32 to index
    %c0 = arith.constant 0 : index
    %c0_2 = arith.constant 0 : index
    %4 = vector.load %arg1[%3, %c0, %c0_2] : memref<16x2x4xf32, #tpu.memory_space<vmem>>, vector<1x2x4xf32>
    %5 = vector.shape_cast %4 : vector<1x2x4xf32> to vector<2x4xf32>
    %c0_3 = arith.constant 0 : index
    %c0_4 = arith.constant 0 : index
    %6 = vector.load %arg2[%c0_3, %c0_4] : memref<4x256xf32, #tpu.memory_space<vmem>>, vector<4x256xf32>
    %cst = arith.constant dense<0.000000e+00> : vector<2x256xf32>
    %7 = tpu.matmul %5, %6, %cst {dimension_numbers = #tpu.dot_dimension_numbers<[1], [0], [0], [1], [0, 0, 1, 1], [], []>} : vector<2x4xf32>, vector<4x256xf32>, vector<2x256xf32> -> vector<2x256xf32>
    %c0_5 = arith.constant 0 : index
    %c0_6 = arith.constant 0 : index
    %8 = vector.load %arg7[%c0_5, %c0_6] : memref<2x64xf32, #tpu.memory_space<vmem>>, vector<2x64xf32>
    %c0_7 = arith.constant 0 : index
    %c0_8 = arith.constant 0 : index
    %9 = vector.load %arg3[%c0_7, %c0_8] : memref<64x256xf32, #tpu.memory_space<vmem>>, vector<64x256xf32>
    %cst_9 = arith.constant dense<0.000000e+00> : vector<2x256xf32>
    %10 = tpu.matmul %8, %9, %cst_9 {dimension_numbers = #tpu.dot_dimension_numbers<[1], [0], [0], [1], [0, 0, 1, 1], [], []>} : vector<2x64xf32>, vector<64x256xf32>, vector<2x256xf32> -> vector<2x256xf32>
    %11 = arith.addf %7, %10 : vector<2x256xf32>
    %c0_10 = arith.constant 0 : index
    %c0_11 = arith.constant 0 : index
    %12 = vector.load %arg4[%c0_10, %c0_11] : memref<1x256xf32, #tpu.memory_space<vmem>>, vector<1x256xf32>
    %13 = vector.broadcast %12 : vector<1x256xf32> to vector<2x256xf32>
    %14 = arith.addf %11, %13 : vector<2x256xf32>
    %15 = vector.extract_strided_slice %14 {offsets = [0, 0], sizes = [2, 64], strides = [1, 1]} : vector<2x256xf32> to vector<2x64xf32>
    %16 = arith.negf %15 : vector<2x64xf32>
    %17 = math.exp %16 : vector<2x64xf32>
    %cst_12 = arith.constant 1.000000e+00 : f32
    %18 = vector.broadcast %cst_12 : f32 to vector<2x64xf32>
    %19 = arith.addf %18, %17 : vector<2x64xf32>
    %20 = arith.divf %18, %19 : vector<2x64xf32>
    %21 = vector.extract_strided_slice %14 {offsets = [0, 64], sizes = [2, 64], strides = [1, 1]} : vector<2x256xf32> to vector<2x64xf32>
    %22 = arith.negf %21 : vector<2x64xf32>
    %23 = math.exp %22 : vector<2x64xf32>
    %cst_13 = arith.constant 1.000000e+00 : f32
    %24 = vector.broadcast %cst_13 : f32 to vector<2x64xf32>
    %25 = arith.addf %24, %23 : vector<2x64xf32>
    %26 = arith.divf %24, %25 : vector<2x64xf32>
    %27 = vector.extract_strided_slice %14 {offsets = [0, 128], sizes = [2, 64], strides = [1, 1]} : vector<2x256xf32> to vector<2x64xf32>
    %28 = math.tanh %27 : vector<2x64xf32>
    %29 = vector.extract_strided_slice %14 {offsets = [0, 192], sizes = [2, 64], strides = [1, 1]} : vector<2x256xf32> to vector<2x64xf32>
    %30 = arith.negf %29 : vector<2x64xf32>
    %31 = math.exp %30 : vector<2x64xf32>
    %cst_14 = arith.constant 1.000000e+00 : f32
    %32 = vector.broadcast %cst_14 : f32 to vector<2x64xf32>
    %33 = arith.addf %32, %31 : vector<2x64xf32>
    %34 = arith.divf %32, %33 : vector<2x64xf32>
    %c0_15 = arith.constant 0 : index
    %c0_16 = arith.constant 0 : index
    %35 = vector.load %arg8[%c0_15, %c0_16] : memref<2x64xf32, #tpu.memory_space<vmem>>, vector<2x64xf32>
    %36 = arith.mulf %26, %35 : vector<2x64xf32>
    %37 = arith.mulf %20, %28 : vector<2x64xf32>
    %38 = arith.addf %36, %37 : vector<2x64xf32>
    %39 = math.tanh %38 : vector<2x64xf32>
    %40 = arith.mulf %34, %39 : vector<2x64xf32>
    %c0_17 = arith.constant 0 : index
    %c0_18 = arith.constant 0 : index
    %41 = vector.load %arg8[%c0_17, %c0_18] : memref<2x64xf32, #tpu.memory_space<vmem>>, vector<2x64xf32>
    tpu.vector_store %arg8[%c0_17, %c0_18], %38 {strides = array<i32>} : memref<2x64xf32, #tpu.memory_space<vmem>>, vector<2x64xf32>,
    %c0_19 = arith.constant 0 : index
    %c0_20 = arith.constant 0 : index
    %42 = vector.load %arg7[%c0_19, %c0_20] : memref<2x64xf32, #tpu.memory_space<vmem>>, vector<2x64xf32>
    tpu.vector_store %arg7[%c0_19, %c0_20], %40 {strides = array<i32>} : memref<2x64xf32, #tpu.memory_space<vmem>>, vector<2x64xf32>,
    %43 = arith.index_cast %c0_i32_1 : i32 to index
    %c0_21 = arith.constant 0 : index
    %c0_22 = arith.constant 0 : index
    %44 = vector.load %arg5[%43, %c0_21, %c0_22] : memref<16x2x64xf32, #tpu.memory_space<vmem>>, vector<1x2x64xf32>
    %45 = vector.shape_cast %44 : vector<1x2x64xf32> to vector<2x64xf32>
    %46 = vector.shape_cast %40 : vector<2x64xf32> to vector<1x2x64xf32>
    tpu.vector_store %arg5[%43, %c0_21, %c0_22], %46 {strides = array<i32>} : memref<16x2x64xf32, #tpu.memory_space<vmem>>, vector<1x2x64xf32>,
    %c1_i32 = arith.constant 1 : i32
    %47 = arith.index_cast %c1_i32 : i32 to index
    %c0_23 = arith.constant 0 : index
    %c0_24 = arith.constant 0 : index
    %48 = vector.load %arg1[%47, %c0_23, %c0_24] : memref<16x2x4xf32, #tpu.memory_space<vmem>>, vector<1x2x4xf32>
    %49 = vector.shape_cast %48 : vector<1x2x4xf32> to vector<2x4xf32>
    %c0_25 = arith.constant 0 : index
    %c0_26 = arith.constant 0 : index
    %50 = vector.load %arg2[%c0_25, %c0_26] : memref<4x256xf32, #tpu.memory_space<vmem>>, vector<4x256xf32>
    %cst_27 = arith.constant dense<0.000000e+00> : vector<2x256xf32>
    %51 = tpu.matmul %49, %50, %cst_27 {dimension_numbers = #tpu.dot_dimension_numbers<[1], [0], [0], [1], [0, 0, 1, 1], [], []>} : vector<2x4xf32>, vector<4x256xf32>, vector<2x256xf32> -> vector<2x256xf32>
    %c0_28 = arith.constant 0 : index
    %c0_29 = arith.constant 0 : index
    %52 = vector.load %arg7[%c0_28, %c0_29] : memref<2x64xf32, #tpu.memory_space<vmem>>, vector<2x64xf32>
    %c0_30 = arith.constant 0 : index
    %c0_31 = arith.constant 0 : index
    %53 = vector.load %arg3[%c0_30, %c0_31] : memref<64x256xf32, #tpu.memory_space<vmem>>, vector<64x256xf32>
    %cst_32 = arith.constant dense<0.000000e+00> : vector<2x256xf32>
    %54 = tpu.matmul %52, %53, %cst_32 {dimension_numbers = #tpu.dot_dimension_numbers<[1], [0], [0], [1], [0, 0, 1, 1], [], []>} : vector<2x64xf32>, vector<64x256xf32>, vector<2x256xf32> -> vector<2x256xf32>
    %55 = arith.addf %51, %54 : vector<2x256xf32>
    %c0_33 = arith.constant 0 : index
    %c0_34 = arith.constant 0 : index
    %56 = vector.load %arg4[%c0_33, %c0_34] : memref<1x256xf32, #tpu.memory_space<vmem>>, vector<1x256xf32>
    %57 = vector.broadcast %56 : vector<1x256xf32> to vector<2x256xf32>
    %58 = arith.addf %55, %57 : vector<2x256xf32>
    %59 = vector.extract_strided_slice %58 {offsets = [0, 0], sizes = [2, 64], strides = [1, 1]} : vector<2x256xf32> to vector<2x64xf32>
    %60 = arith.negf %59 : vector<2x64xf32>
    %61 = math.exp %60 : vector<2x64xf32>
    %cst_35 = arith.constant 1.000000e+00 : f32
    %62 = vector.broadcast %cst_35 : f32 to vector<2x64xf32>
    %63 = arith.addf %62, %61 : vector<2x64xf32>
    %64 = arith.divf %62, %63 : vector<2x64xf32>
    %65 = vector.extract_strided_slice %58 {offsets = [0, 64], sizes = [2, 64], strides = [1, 1]} : vector<2x256xf32> to vector<2x64xf32>
    %66 = arith.negf %65 : vector<2x64xf32>
    %67 = math.exp %66 : vector<2x64xf32>
    %cst_36 = arith.constant 1.000000e+00 : f32
    %68 = vector.broadcast %cst_36 : f32 to vector<2x64xf32>
    %69 = arith.addf %68, %67 : vector<2x64xf32>
    %70 = arith.divf %68, %69 : vector<2x64xf32>
    %71 = vector.extract_strided_slice %58 {offsets = [0, 128], sizes = [2, 64], strides = [1, 1]} : vector<2x256xf32> to vector<2x64xf32>
    %72 = math.tanh %71 : vector<2x64xf32>
    %73 = vector.extract_strided_slice %58 {offsets = [0, 192], sizes = [2, 64], strides = [1, 1]} : vector<2x256xf32> to vector<2x64xf32>
    %74 = arith.negf %73 : vector<2x64xf32>
    %75 = math.exp %74 : vector<2x64xf32>
    %cst_37 = arith.constant 1.000000e+00 : f32
    %76 = vector.broadcast %cst_37 : f32 to vector<2x64xf32>
    %77 = arith.addf %76, %75 : vector<2x64xf32>
    %78 = arith.divf %76, %77 : vector<2x64xf32>
    %c0_38 = arith.constant 0 : index
    %c0_39 = arith.constant 0 : index
    %79 = vector.load %arg8[%c0_38, %c0_39] : memref<2x64xf32, #tpu.memory_space<vmem>>, vector<2x64xf32>
    %80 = arith.mulf %70, %79 : vector<2x64xf32>
    %81 = arith.mulf %64, %72 : vector<2x64xf32>
    %82 = arith.addf %80, %81 : vector<2x64xf32>
    %83 = math.tanh %82 : vector<2x64xf32>
    %84 = arith.mulf %78, %83 : vector<2x64xf32>
    %c0_40 = arith.constant 0 : index
    %c0_41 = arith.constant 0 : index
    %85 = vector.load %arg8[%c0_40, %c0_41] : memref<2x64xf32, #tpu.memory_space<vmem>>, vector<2x64xf32>
    tpu.vector_store %arg8[%c0_40, %c0_41], %82 {strides = array<i32>} : memref<2x64xf32, #tpu.memory_space<vmem>>, vector<2x64xf32>,
    %c0_42 = arith.constant 0 : index
    %c0_43 = arith.constant 0 : index
    %86 = vector.load %arg7[%c0_42, %c0_43] : memref<2x64xf32, #tpu.memory_space<vmem>>, vector<2x64xf32>
    tpu.vector_store %arg7[%c0_42, %c0_43], %84 {strides = array<i32>} : memref<2x64xf32, #tpu.memory_space<vmem>>, vector<2x64xf32>,
    %87 = arith.index_cast %c1_i32 : i32 to index
    %c0_44 = arith.constant 0 : index
    %c0_45 = arith.constant 0 : index
    %88 = vector.load %arg5[%87, %c0_44, %c0_45] : memref<16x2x64xf32, #tpu.memory_space<vmem>>, vector<1x2x64xf32>
    %89 = vector.shape_cast %88 : vector<1x2x64xf32> to vector<2x64xf32>
    %90 = vector.shape_cast %84 : vector<2x64xf32> to vector<1x2x64xf32>
    tpu.vector_store %arg5[%87, %c0_44, %c0_45], %90 {strides = array<i32>} : memref<16x2x64xf32, #tpu.memory_space<vmem>>, vector<1x2x64xf32>,
    %c2_i32 = arith.constant 2 : i32
    %91 = arith.index_cast %c2_i32 : i32 to index
    %c0_46 = arith.constant 0 : index
    %c0_47 = arith.constant 0 : index
    %92 = vector.load %arg1[%91, %c0_46, %c0_47] : memref<16x2x4xf32, #tpu.memory_space<vmem>>, vector<1x2x4xf32>
    %93 = vector.shape_cast %92 : vector<1x2x4xf32> to vector<2x4xf32>
    %c0_48 = arith.constant 0 : index
    %c0_49 = arith.constant 0 : index
    %94 = vector.load %arg2[%c0_48, %c0_49] : memref<4x256xf32, #tpu.memory_space<vmem>>, vector<4x256xf32>
    %cst_50 = arith.constant dense<0.000000e+00> : vector<2x256xf32>
    %95 = tpu.matmul %93, %94, %cst_50 {dimension_numbers = #tpu.dot_dimension_numbers<[1], [0], [0], [1], [0, 0, 1, 1], [], []>} : vector<2x4xf32>, vector<4x256xf32>, vector<2x256xf32> -> vector<2x256xf32>
    %c0_51 = arith.constant 0 : index
    %c0_52 = arith.constant 0 : index
    %96 = vector.load %arg7[%c0_51, %c0_52] : memref<2x64xf32, #tpu.memory_space<vmem>>, vector<2x64xf32>
    %c0_53 = arith.constant 0 : index
    %c0_54 = arith.constant 0 : index
    %97 = vector.load %arg3[%c0_53, %c0_54] : memref<64x256xf32, #tpu.memory_space<vmem>>, vector<64x256xf32>
    %cst_55 = arith.constant dense<0.000000e+00> : vector<2x256xf32>
    %98 = tpu.matmul %96, %97, %cst_55 {dimension_numbers = #tpu.dot_dimension_numbers<[1], [0], [0], [1], [0, 0, 1, 1], [], []>} : vector<2x64xf32>, vector<64x256xf32>, vector<2x256xf32> -> vector<2x256xf32>
    %99 = arith.addf %95, %98 : vector<2x256xf32>
    %c0_56 = arith.constant 0 : index
    %c0_57 = arith.constant 0 : index
    %100 = vector.load %arg4[%c0_56, %c0_57] : memref<1x256xf32, #tpu.memory_space<vmem>>, vector<1x256xf32>
    %101 = vector.broadcast %100 : vector<1x256xf32> to vector<2x256xf32>
    %102 = arith.addf %99, %101 : vector<2x256xf32>
    %103 = vector.extract_strided_slice %102 {offsets = [0, 0], sizes = [2, 64], strides = [1, 1]} : vector<2x256xf32> to vector<2x64xf32>
    %104 = arith.negf %103 : vector<2x64xf32>
    %105 = math.exp %104 : vector<2x64xf32>
    %cst_58 = arith.constant 1.000000e+00 : f32
    %106 = vector.broadcast %cst_58 : f32 to vector<2x64xf32>
    %107 = arith.addf %106, %105 : vector<2x64xf32>
    %108 = arith.divf %106, %107 : vector<2x64xf32>
    %109 = vector.extract_strided_slice %102 {offsets = [0, 64], sizes = [2, 64], strides = [1, 1]} : vector<2x256xf32> to vector<2x64xf32>
    %110 = arith.negf %109 : vector<2x64xf32>
    %111 = math.exp %110 : vector<2x64xf32>
    %cst_59 = arith.constant 1.000000e+00 : f32
    %112 = vector.broadcast %cst_59 : f32 to vector<2x64xf32>
    %113 = arith.addf %112, %111 : vector<2x64xf32>
    %114 = arith.divf %112, %113 : vector<2x64xf32>
    %115 = vector.extract_strided_slice %102 {offsets = [0, 128], sizes = [2, 64], strides = [1, 1]} : vector<2x256xf32> to vector<2x64xf32>
    %116 = math.tanh %115 : vector<2x64xf32>
    %117 = vector.extract_strided_slice %102 {offsets = [0, 192], sizes = [2, 64], strides = [1, 1]} : vector<2x256xf32> to vector<2x64xf32>
    %118 = arith.negf %117 : vector<2x64xf32>
    %119 = math.exp %118 : vector<2x64xf32>
    %cst_60 = arith.constant 1.000000e+00 : f32
    %120 = vector.broadcast %cst_60 : f32 to vector<2x64xf32>
    %121 = arith.addf %120, %119 : vector<2x64xf32>
    %122 = arith.divf %120, %121 : vector<2x64xf32>
    %c0_61 = arith.constant 0 : index
    %c0_62 = arith.constant 0 : index
    %123 = vector.load %arg8[%c0_61, %c0_62] : memref<2x64xf32, #tpu.memory_space<vmem>>, vector<2x64xf32>
    %124 = arith.mulf %114, %123 : vector<2x64xf32>
    %125 = arith.mulf %108, %116 : vector<2x64xf32>
    %126 = arith.addf %124, %125 : vector<2x64xf32>
    %127 = math.tanh %126 : vector<2x64xf32>
    %128 = arith.mulf %122, %127 : vector<2x64xf32>
    %c0_63 = arith.constant 0 : index
    %c0_64 = arith.constant 0 : index
    %129 = vector.load %arg8[%c0_63, %c0_64] : memref<2x64xf32, #tpu.memory_space<vmem>>, vector<2x64xf32>
    tpu.vector_store %arg8[%c0_63, %c0_64], %126 {strides = array<i32>} : memref<2x64xf32, #tpu.memory_space<vmem>>, vector<2x64xf32>,
    %c0_65 = arith.constant 0 : index
    %c0_66 = arith.constant 0 : index
    %130 = vector.load %arg7[%c0_65, %c0_66] : memref<2x64xf32, #tpu.memory_space<vmem>>, vector<2x64xf32>
    tpu.vector_store %arg7[%c0_65, %c0_66], %128 {strides = array<i32>} : memref<2x64xf32, #tpu.memory_space<vmem>>, vector<2x64xf32>,
    %131 = arith.index_cast %c2_i32 : i32 to index
    %c0_67 = arith.constant 0 : index
    %c0_68 = arith.constant 0 : index
    %132 = vector.load %arg5[%131, %c0_67, %c0_68] : memref<16x2x64xf32, #tpu.memory_space<vmem>>, vector<1x2x64xf32>
    %133 = vector.shape_cast %132 : vector<1x2x64xf32> to vector<2x64xf32>
    %134 = vector.shape_cast %128 : vector<2x64xf32> to vector<1x2x64xf32>
    tpu.vector_store %arg5[%131, %c0_67, %c0_68], %134 {strides = array<i32>} : memref<16x2x64xf32, #tpu.memory_space<vmem>>, vector<1x2x64xf32>,
    %c3_i32 = arith.constant 3 : i32
    %135 = arith.index_cast %c3_i32 : i32 to index
    %c0_69 = arith.constant 0 : index
    %c0_70 = arith.constant 0 : index
    %136 = vector.load %arg1[%135, %c0_69, %c0_70] : memref<16x2x4xf32, #tpu.memory_space<vmem>>, vector<1x2x4xf32>
    %137 = vector.shape_cast %136 : vector<1x2x4xf32> to vector<2x4xf32>
    %c0_71 = arith.constant 0 : index
    %c0_72 = arith.constant 0 : index
    %138 = vector.load %arg2[%c0_71, %c0_72] : memref<4x256xf32, #tpu.memory_space<vmem>>, vector<4x256xf32>
    %cst_73 = arith.constant dense<0.000000e+00> : vector<2x256xf32>
    %139 = tpu.matmul %137, %138, %cst_73 {dimension_numbers = #tpu.dot_dimension_numbers<[1], [0], [0], [1], [0, 0, 1, 1], [], []>} : vector<2x4xf32>, vector<4x256xf32>, vector<2x256xf32> -> vector<2x256xf32>
    %c0_74 = arith.constant 0 : index
    %c0_75 = arith.constant 0 : index
    %140 = vector.load %arg7[%c0_74, %c0_75] : memref<2x64xf32, #tpu.memory_space<vmem>>, vector<2x64xf32>
    %c0_76 = arith.constant 0 : index
    %c0_77 = arith.constant 0 : index
    %141 = vector.load %arg3[%c0_76, %c0_77] : memref<64x256xf32, #tpu.memory_space<vmem>>, vector<64x256xf32>
    %cst_78 = arith.constant dense<0.000000e+00> : vector<2x256xf32>
    %142 = tpu.matmul %140, %141, %cst_78 {dimension_numbers = #tpu.dot_dimension_numbers<[1], [0], [0], [1], [0, 0, 1, 1], [], []>} : vector<2x64xf32>, vector<64x256xf32>, vector<2x256xf32> -> vector<2x256xf32>
    %143 = arith.addf %139, %142 : vector<2x256xf32>
    %c0_79 = arith.constant 0 : index
    %c0_80 = arith.constant 0 : index
    %144 = vector.load %arg4[%c0_79, %c0_80] : memref<1x256xf32, #tpu.memory_space<vmem>>, vector<1x256xf32>
    %145 = vector.broadcast %144 : vector<1x256xf32> to vector<2x256xf32>
    %146 = arith.addf %143, %145 : vector<2x256xf32>
    %147 = vector.extract_strided_slice %146 {offsets = [0, 0], sizes = [2, 64], strides = [1, 1]} : vector<2x256xf32> to vector<2x64xf32>
    %148 = arith.negf %147 : vector<2x64xf32>
    %149 = math.exp %148 : vector<2x64xf32>
    %cst_81 = arith.constant 1.000000e+00 : f32
    %150 = vector.broadcast %cst_81 : f32 to vector<2x64xf32>
    %151 = arith.addf %150, %149 : vector<2x64xf32>
    %152 = arith.divf %150, %151 : vector<2x64xf32>
    %153 = vector.extract_strided_slice %146 {offsets = [0, 64], sizes = [2, 64], strides = [1, 1]} : vector<2x256xf32> to vector<2x64xf32>
    %154 = arith.negf %153 : vector<2x64xf32>
    %155 = math.exp %154 : vector<2x64xf32>
    %cst_82 = arith.constant 1.000000e+00 : f32
    %156 = vector.broadcast %cst_82 : f32 to vector<2x64xf32>
    %157 = arith.addf %156, %155 : vector<2x64xf32>
    %158 = arith.divf %156, %157 : vector<2x64xf32>
    %159 = vector.extract_strided_slice %146 {offsets = [0, 128], sizes = [2, 64], strides = [1, 1]} : vector<2x256xf32> to vector<2x64xf32>
    %160 = math.tanh %159 : vector<2x64xf32>
    %161 = vector.extract_strided_slice %146 {offsets = [0, 192], sizes = [2, 64], strides = [1, 1]} : vector<2x256xf32> to vector<2x64xf32>
    %162 = arith.negf %161 : vector<2x64xf32>
    %163 = math.exp %162 : vector<2x64xf32>
    %cst_83 = arith.constant 1.000000e+00 : f32
    %164 = vector.broadcast %cst_83 : f32 to vector<2x64xf32>
    %165 = arith.addf %164, %163 : vector<2x64xf32>
    %166 = arith.divf %164, %165 : vector<2x64xf32>
    %c0_84 = arith.constant 0 : index
    %c0_85 = arith.constant 0 : index
    %167 = vector.load %arg8[%c0_84, %c0_85] : memref<2x64xf32, #tpu.memory_space<vmem>>, vector<2x64xf32>
    %168 = arith.mulf %158, %167 : vector<2x64xf32>
    %169 = arith.mulf %152, %160 : vector<2x64xf32>
    %170 = arith.addf %168, %169 : vector<2x64xf32>
    %171 = math.tanh %170 : vector<2x64xf32>
    %172 = arith.mulf %166, %171 : vector<2x64xf32>
    %c0_86 = arith.constant 0 : index
    %c0_87 = arith.constant 0 : index
    %173 = vector.load %arg8[%c0_86, %c0_87] : memref<2x64xf32, #tpu.memory_space<vmem>>, vector<2x64xf32>
    tpu.vector_store %arg8[%c0_86, %c0_87], %170 {strides = array<i32>} : memref<2x64xf32, #tpu.memory_space<vmem>>, vector<2x64xf32>,
    %c0_88 = arith.constant 0 : index
    %c0_89 = arith.constant 0 : index
    %174 = vector.load %arg7[%c0_88, %c0_89] : memref<2x64xf32, #tpu.memory_space<vmem>>, vector<2x64xf32>
    tpu.vector_store %arg7[%c0_88, %c0_89], %172 {strides = array<i32>} : memref<2x64xf32, #tpu.memory_space<vmem>>, vector<2x64xf32>,
    %175 = arith.index_cast %c3_i32 : i32 to index
    %c0_90 = arith.constant 0 : index
    %c0_91 = arith.constant 0 : index
    %176 = vector.load %arg5[%175, %c0_90, %c0_91] : memref<16x2x64xf32, #tpu.memory_space<vmem>>, vector<1x2x64xf32>
    %177 = vector.shape_cast %176 : vector<1x2x64xf32> to vector<2x64xf32>
    %178 = vector.shape_cast %172 : vector<2x64xf32> to vector<1x2x64xf32>
    tpu.vector_store %arg5[%175, %c0_90, %c0_91], %178 {strides = array<i32>} : memref<16x2x64xf32, #tpu.memory_space<vmem>>, vector<1x2x64xf32>,
    %c4_i32 = arith.constant 4 : i32
    %179 = arith.index_cast %c4_i32 : i32 to index
    %c0_92 = arith.constant 0 : index
    %c0_93 = arith.constant 0 : index
    %180 = vector.load %arg1[%179, %c0_92, %c0_93] : memref<16x2x4xf32, #tpu.memory_space<vmem>>, vector<1x2x4xf32>
    %181 = vector.shape_cast %180 : vector<1x2x4xf32> to vector<2x4xf32>
    %c0_94 = arith.constant 0 : index
    %c0_95 = arith.constant 0 : index
    %182 = vector.load %arg2[%c0_94, %c0_95] : memref<4x256xf32, #tpu.memory_space<vmem>>, vector<4x256xf32>
    %cst_96 = arith.constant dense<0.000000e+00> : vector<2x256xf32>
    %183 = tpu.matmul %181, %182, %cst_96 {dimension_numbers = #tpu.dot_dimension_numbers<[1], [0], [0], [1], [0, 0, 1, 1], [], []>} : vector<2x4xf32>, vector<4x256xf32>, vector<2x256xf32> -> vector<2x256xf32>
    %c0_97 = arith.constant 0 : index
    %c0_98 = arith.constant 0 : index
    %184 = vector.load %arg7[%c0_97, %c0_98] : memref<2x64xf32, #tpu.memory_space<vmem>>, vector<2x64xf32>
    %c0_99 = arith.constant 0 : index
    %c0_100 = arith.constant 0 : index
    %185 = vector.load %arg3[%c0_99, %c0_100] : memref<64x256xf32, #tpu.memory_space<vmem>>, vector<64x256xf32>
    %cst_101 = arith.constant dense<0.000000e+00> : vector<2x256xf32>
    %186 = tpu.matmul %184, %185, %cst_101 {dimension_numbers = #tpu.dot_dimension_numbers<[1], [0], [0], [1], [0, 0, 1, 1], [], []>} : vector<2x64xf32>, vector<64x256xf32>, vector<2x256xf32> -> vector<2x256xf32>
    %187 = arith.addf %183, %186 : vector<2x256xf32>
    %c0_102 = arith.constant 0 : index
    %c0_103 = arith.constant 0 : index
    %188 = vector.load %arg4[%c0_102, %c0_103] : memref<1x256xf32, #tpu.memory_space<vmem>>, vector<1x256xf32>
    %189 = vector.broadcast %188 : vector<1x256xf32> to vector<2x256xf32>
    %190 = arith.addf %187, %189 : vector<2x256xf32>
    %191 = vector.extract_strided_slice %190 {offsets = [0, 0], sizes = [2, 64], strides = [1, 1]} : vector<2x256xf32> to vector<2x64xf32>
    %192 = arith.negf %191 : vector<2x64xf32>
    %193 = math.exp %192 : vector<2x64xf32>
    %cst_104 = arith.constant 1.000000e+00 : f32
    %194 = vector.broadcast %cst_104 : f32 to vector<2x64xf32>
    %195 = arith.addf %194, %193 : vector<2x64xf32>
    %196 = arith.divf %194, %195 : vector<2x64xf32>
    %197 = vector.extract_strided_slice %190 {offsets = [0, 64], sizes = [2, 64], strides = [1, 1]} : vector<2x256xf32> to vector<2x64xf32>
    %198 = arith.negf %197 : vector<2x64xf32>
    %199 = math.exp %198 : vector<2x64xf32>
    %cst_105 = arith.constant 1.000000e+00 : f32
    %200 = vector.broadcast %cst_105 : f32 to vector<2x64xf32>
    %201 = arith.addf %200, %199 : vector<2x64xf32>
    %202 = arith.divf %200, %201 : vector<2x64xf32>
    %203 = vector.extract_strided_slice %190 {offsets = [0, 128], sizes = [2, 64], strides = [1, 1]} : vector<2x256xf32> to vector<2x64xf32>
    %204 = math.tanh %203 : vector<2x64xf32>
    %205 = vector.extract_strided_slice %190 {offsets = [0, 192], sizes = [2, 64], strides = [1, 1]} : vector<2x256xf32> to vector<2x64xf32>
    %206 = arith.negf %205 : vector<2x64xf32>
    %207 = math.exp %206 : vector<2x64xf32>
    %cst_106 = arith.constant 1.000000e+00 : f32
    %208 = vector.broadcast %cst_106 : f32 to vector<2x64xf32>
    %209 = arith.addf %208, %207 : vector<2x64xf32>
    %210 = arith.divf %208, %209 : vector<2x64xf32>
    %c0_107 = arith.constant 0 : index
    %c0_108 = arith.constant 0 : index
    %211 = vector.load %arg8[%c0_107, %c0_108] : memref<2x64xf32, #tpu.memory_space<vmem>>, vector<2x64xf32>
    %212 = arith.mulf %202, %211 : vector<2x64xf32>
    %213 = arith.mulf %196, %204 : vector<2x64xf32>
    %214 = arith.addf %212, %213 : vector<2x64xf32>
    %215 = math.tanh %214 : vector<2x64xf32>
    %216 = arith.mulf %210, %215 : vector<2x64xf32>
    %c0_109 = arith.constant 0 : index
    %c0_110 = arith.constant 0 : index
    %217 = vector.load %arg8[%c0_109, %c0_110] : memref<2x64xf32, #tpu.memory_space<vmem>>, vector<2x64xf32>
    tpu.vector_store %arg8[%c0_109, %c0_110], %214 {strides = array<i32>} : memref<2x64xf32, #tpu.memory_space<vmem>>, vector<2x64xf32>,
    %c0_111 = arith.constant 0 : index
    %c0_112 = arith.constant 0 : index
    %218 = vector.load %arg7[%c0_111, %c0_112] : memref<2x64xf32, #tpu.memory_space<vmem>>, vector<2x64xf32>
    tpu.vector_store %arg7[%c0_111, %c0_112], %216 {strides = array<i32>} : memref<2x64xf32, #tpu.memory_space<vmem>>, vector<2x64xf32>,
    %219 = arith.index_cast %c4_i32 : i32 to index
    %c0_113 = arith.constant 0 : index
    %c0_114 = arith.constant 0 : index
    %220 = vector.load %arg5[%219, %c0_113, %c0_114] : memref<16x2x64xf32, #tpu.memory_space<vmem>>, vector<1x2x64xf32>
    %221 = vector.shape_cast %220 : vector<1x2x64xf32> to vector<2x64xf32>
    %222 = vector.shape_cast %216 : vector<2x64xf32> to vector<1x2x64xf32>
    tpu.vector_store %arg5[%219, %c0_113, %c0_114], %222 {strides = array<i32>} : memref<16x2x64xf32, #tpu.memory_space<vmem>>, vector<1x2x64xf32>,
    %c5_i32 = arith.constant 5 : i32
    %223 = arith.index_cast %c5_i32 : i32 to index
    %c0_115 = arith.constant 0 : index
    %c0_116 = arith.constant 0 : index
    %224 = vector.load %arg1[%223, %c0_115, %c0_116] : memref<16x2x4xf32, #tpu.memory_space<vmem>>, vector<1x2x4xf32>
    %225 = vector.shape_cast %224 : vector<1x2x4xf32> to vector<2x4xf32>
    %c0_117 = arith.constant 0 : index
    %c0_118 = arith.constant 0 : index
    %226 = vector.load %arg2[%c0_117, %c0_118] : memref<4x256xf32, #tpu.memory_space<vmem>>, vector<4x256xf32>
    %cst_119 = arith.constant dense<0.000000e+00> : vector<2x256xf32>
    %227 = tpu.matmul %225, %226, %cst_119 {dimension_numbers = #tpu.dot_dimension_numbers<[1], [0], [0], [1], [0, 0, 1, 1], [], []>} : vector<2x4xf32>, vector<4x256xf32>, vector<2x256xf32> -> vector<2x256xf32>
    %c0_120 = arith.constant 0 : index
    %c0_121 = arith.constant 0 : index
    %228 = vector.load %arg7[%c0_120, %c0_121] : memref<2x64xf32, #tpu.memory_space<vmem>>, vector<2x64xf32>
    %c0_122 = arith.constant 0 : index
    %c0_123 = arith.constant 0 : index
    %229 = vector.load %arg3[%c0_122, %c0_123] : memref<64x256xf32, #tpu.memory_space<vmem>>, vector<64x256xf32>
    %cst_124 = arith.constant dense<0.000000e+00> : vector<2x256xf32>
    %230 = tpu.matmul %228, %229, %cst_124 {dimension_numbers = #tpu.dot_dimension_numbers<[1], [0], [0], [1], [0, 0, 1, 1], [], []>} : vector<2x64xf32>, vector<64x256xf32>, vector<2x256xf32> -> vector<2x256xf32>
    %231 = arith.addf %227, %230 : vector<2x256xf32>
    %c0_125 = arith.constant 0 : index
    %c0_126 = arith.constant 0 : index
    %232 = vector.load %arg4[%c0_125, %c0_126] : memref<1x256xf32, #tpu.memory_space<vmem>>, vector<1x256xf32>
    %233 = vector.broadcast %232 : vector<1x256xf32> to vector<2x256xf32>
    %234 = arith.addf %231, %233 : vector<2x256xf32>
    %235 = vector.extract_strided_slice %234 {offsets = [0, 0], sizes = [2, 64], strides = [1, 1]} : vector<2x256xf32> to vector<2x64xf32>
    %236 = arith.negf %235 : vector<2x64xf32>
    %237 = math.exp %236 : vector<2x64xf32>
    %cst_127 = arith.constant 1.000000e+00 : f32
    %238 = vector.broadcast %cst_127 : f32 to vector<2x64xf32>
    %239 = arith.addf %238, %237 : vector<2x64xf32>
    %240 = arith.divf %238, %239 : vector<2x64xf32>
    %241 = vector.extract_strided_slice %234 {offsets = [0, 64], sizes = [2, 64], strides = [1, 1]} : vector<2x256xf32> to vector<2x64xf32>
    %242 = arith.negf %241 : vector<2x64xf32>
    %243 = math.exp %242 : vector<2x64xf32>
    %cst_128 = arith.constant 1.000000e+00 : f32
    %244 = vector.broadcast %cst_128 : f32 to vector<2x64xf32>
    %245 = arith.addf %244, %243 : vector<2x64xf32>
    %246 = arith.divf %244, %245 : vector<2x64xf32>
    %247 = vector.extract_strided_slice %234 {offsets = [0, 128], sizes = [2, 64], strides = [1, 1]} : vector<2x256xf32> to vector<2x64xf32>
    %248 = math.tanh %247 : vector<2x64xf32>
    %249 = vector.extract_strided_slice %234 {offsets = [0, 192], sizes = [2, 64], strides = [1, 1]} : vector<2x256xf32> to vector<2x64xf32>
    %250 = arith.negf %249 : vector<2x64xf32>
    %251 = math.exp %250 : vector<2x64xf32>
    %cst_129 = arith.constant 1.000000e+00 : f32
    %252 = vector.broadcast %cst_129 : f32 to vector<2x64xf32>
    %253 = arith.addf %252, %251 : vector<2x64xf32>
    %254 = arith.divf %252, %253 : vector<2x64xf32>
    %c0_130 = arith.constant 0 : index
    %c0_131 = arith.constant 0 : index
    %255 = vector.load %arg8[%c0_130, %c0_131] : memref<2x64xf32, #tpu.memory_space<vmem>>, vector<2x64xf32>
    %256 = arith.mulf %246, %255 : vector<2x64xf32>
    %257 = arith.mulf %240, %248 : vector<2x64xf32>
    %258 = arith.addf %256, %257 : vector<2x64xf32>
    %259 = math.tanh %258 : vector<2x64xf32>
    %260 = arith.mulf %254, %259 : vector<2x64xf32>
    %c0_132 = arith.constant 0 : index
    %c0_133 = arith.constant 0 : index
    %261 = vector.load %arg8[%c0_132, %c0_133] : memref<2x64xf32, #tpu.memory_space<vmem>>, vector<2x64xf32>
    tpu.vector_store %arg8[%c0_132, %c0_133], %258 {strides = array<i32>} : memref<2x64xf32, #tpu.memory_space<vmem>>, vector<2x64xf32>,
    %c0_134 = arith.constant 0 : index
    %c0_135 = arith.constant 0 : index
    %262 = vector.load %arg7[%c0_134, %c0_135] : memref<2x64xf32, #tpu.memory_space<vmem>>, vector<2x64xf32>
    tpu.vector_store %arg7[%c0_134, %c0_135], %260 {strides = array<i32>} : memref<2x64xf32, #tpu.memory_space<vmem>>, vector<2x64xf32>,
    %263 = arith.index_cast %c5_i32 : i32 to index
    %c0_136 = arith.constant 0 : index
    %c0_137 = arith.constant 0 : index
    %264 = vector.load %arg5[%263, %c0_136, %c0_137] : memref<16x2x64xf32, #tpu.memory_space<vmem>>, vector<1x2x64xf32>
    %265 = vector.shape_cast %264 : vector<1x2x64xf32> to vector<2x64xf32>
    %266 = vector.shape_cast %260 : vector<2x64xf32> to vector<1x2x64xf32>
    tpu.vector_store %arg5[%263, %c0_136, %c0_137], %266 {strides = array<i32>} : memref<16x2x64xf32, #tpu.memory_space<vmem>>, vector<1x2x64xf32>,
    %c6_i32 = arith.constant 6 : i32
    %267 = arith.index_cast %c6_i32 : i32 to index
    %c0_138 = arith.constant 0 : index
    %c0_139 = arith.constant 0 : index
    %268 = vector.load %arg1[%267, %c0_138, %c0_139] : memref<16x2x4xf32, #tpu.memory_space<vmem>>, vector<1x2x4xf32>
    %269 = vector.shape_cast %268 : vector<1x2x4xf32> to vector<2x4xf32>
    %c0_140 = arith.constant 0 : index
    %c0_141 = arith.constant 0 : index
    %270 = vector.load %arg2[%c0_140, %c0_141] : memref<4x256xf32, #tpu.memory_space<vmem>>, vector<4x256xf32>
    %cst_142 = arith.constant dense<0.000000e+00> : vector<2x256xf32>
    %271 = tpu.matmul %269, %270, %cst_142 {dimension_numbers = #tpu.dot_dimension_numbers<[1], [0], [0], [1], [0, 0, 1, 1], [], []>} : vector<2x4xf32>, vector<4x256xf32>, vector<2x256xf32> -> vector<2x256xf32>
    %c0_143 = arith.constant 0 : index
    %c0_144 = arith.constant 0 : index
    %272 = vector.load %arg7[%c0_143, %c0_144] : memref<2x64xf32, #tpu.memory_space<vmem>>, vector<2x64xf32>
    %c0_145 = arith.constant 0 : index
    %c0_146 = arith.constant 0 : index
    %273 = vector.load %arg3[%c0_145, %c0_146] : memref<64x256xf32, #tpu.memory_space<vmem>>, vector<64x256xf32>
    %cst_147 = arith.constant dense<0.000000e+00> : vector<2x256xf32>
    %274 = tpu.matmul %272, %273, %cst_147 {dimension_numbers = #tpu.dot_dimension_numbers<[1], [0], [0], [1], [0, 0, 1, 1], [], []>} : vector<2x64xf32>, vector<64x256xf32>, vector<2x256xf32> -> vector<2x256xf32>
    %275 = arith.addf %271, %274 : vector<2x256xf32>
    %c0_148 = arith.constant 0 : index
    %c0_149 = arith.constant 0 : index
    %276 = vector.load %arg4[%c0_148, %c0_149] : memref<1x256xf32, #tpu.memory_space<vmem>>, vector<1x256xf32>
    %277 = vector.broadcast %276 : vector<1x256xf32> to vector<2x256xf32>
    %278 = arith.addf %275, %277 : vector<2x256xf32>
    %279 = vector.extract_strided_slice %278 {offsets = [0, 0], sizes = [2, 64], strides = [1, 1]} : vector<2x256xf32> to vector<2x64xf32>
    %280 = arith.negf %279 : vector<2x64xf32>
    %281 = math.exp %280 : vector<2x64xf32>
    %cst_150 = arith.constant 1.000000e+00 : f32
    %282 = vector.broadcast %cst_150 : f32 to vector<2x64xf32>
    %283 = arith.addf %282, %281 : vector<2x64xf32>
    %284 = arith.divf %282, %283 : vector<2x64xf32>
    %285 = vector.extract_strided_slice %278 {offsets = [0, 64], sizes = [2, 64], strides = [1, 1]} : vector<2x256xf32> to vector<2x64xf32>
    %286 = arith.negf %285 : vector<2x64xf32>
    %287 = math.exp %286 : vector<2x64xf32>
    %cst_151 = arith.constant 1.000000e+00 : f32
    %288 = vector.broadcast %cst_151 : f32 to vector<2x64xf32>
    %289 = arith.addf %288, %287 : vector<2x64xf32>
    %290 = arith.divf %288, %289 : vector<2x64xf32>
    %291 = vector.extract_strided_slice %278 {offsets = [0, 128], sizes = [2, 64], strides = [1, 1]} : vector<2x256xf32> to vector<2x64xf32>
    %292 = math.tanh %291 : vector<2x64xf32>
    %293 = vector.extract_strided_slice %278 {offsets = [0, 192], sizes = [2, 64], strides = [1, 1]} : vector<2x256xf32> to vector<2x64xf32>
    %294 = arith.negf %293 : vector<2x64xf32>
    %295 = math.exp %294 : vector<2x64xf32>
    %cst_152 = arith.constant 1.000000e+00 : f32
    %296 = vector.broadcast %cst_152 : f32 to vector<2x64xf32>
    %297 = arith.addf %296, %295 : vector<2x64xf32>
    %298 = arith.divf %296, %297 : vector<2x64xf32>
    %c0_153 = arith.constant 0 : index
    %c0_154 = arith.constant 0 : index
    %299 = vector.load %arg8[%c0_153, %c0_154] : memref<2x64xf32, #tpu.memory_space<vmem>>, vector<2x64xf32>
    %300 = arith.mulf %290, %299 : vector<2x64xf32>
    %301 = arith.mulf %284, %292 : vector<2x64xf32>
    %302 = arith.addf %300, %301 : vector<2x64xf32>
    %303 = math.tanh %302 : vector<2x64xf32>
    %304 = arith.mulf %298, %303 : vector<2x64xf32>
    %c0_155 = arith.constant 0 : index
    %c0_156 = arith.constant 0 : index
    %305 = vector.load %arg8[%c0_155, %c0_156] : memref<2x64xf32, #tpu.memory_space<vmem>>, vector<2x64xf32>
    tpu.vector_store %arg8[%c0_155, %c0_156], %302 {strides = array<i32>} : memref<2x64xf32, #tpu.memory_space<vmem>>, vector<2x64xf32>,
    %c0_157 = arith.constant 0 : index
    %c0_158 = arith.constant 0 : index
    %306 = vector.load %arg7[%c0_157, %c0_158] : memref<2x64xf32, #tpu.memory_space<vmem>>, vector<2x64xf32>
    tpu.vector_store %arg7[%c0_157, %c0_158], %304 {strides = array<i32>} : memref<2x64xf32, #tpu.memory_space<vmem>>, vector<2x64xf32>,
    %307 = arith.index_cast %c6_i32 : i32 to index
    %c0_159 = arith.constant 0 : index
    %c0_160 = arith.constant 0 : index
    %308 = vector.load %arg5[%307, %c0_159, %c0_160] : memref<16x2x64xf32, #tpu.memory_space<vmem>>, vector<1x2x64xf32>
    %309 = vector.shape_cast %308 : vector<1x2x64xf32> to vector<2x64xf32>
    %310 = vector.shape_cast %304 : vector<2x64xf32> to vector<1x2x64xf32>
    tpu.vector_store %arg5[%307, %c0_159, %c0_160], %310 {strides = array<i32>} : memref<16x2x64xf32, #tpu.memory_space<vmem>>, vector<1x2x64xf32>,
    %c7_i32 = arith.constant 7 : i32
    %311 = arith.index_cast %c7_i32 : i32 to index
    %c0_161 = arith.constant 0 : index
    %c0_162 = arith.constant 0 : index
    %312 = vector.load %arg1[%311, %c0_161, %c0_162] : memref<16x2x4xf32, #tpu.memory_space<vmem>>, vector<1x2x4xf32>
    %313 = vector.shape_cast %312 : vector<1x2x4xf32> to vector<2x4xf32>
    %c0_163 = arith.constant 0 : index
    %c0_164 = arith.constant 0 : index
    %314 = vector.load %arg2[%c0_163, %c0_164] : memref<4x256xf32, #tpu.memory_space<vmem>>, vector<4x256xf32>
    %cst_165 = arith.constant dense<0.000000e+00> : vector<2x256xf32>
    %315 = tpu.matmul %313, %314, %cst_165 {dimension_numbers = #tpu.dot_dimension_numbers<[1], [0], [0], [1], [0, 0, 1, 1], [], []>} : vector<2x4xf32>, vector<4x256xf32>, vector<2x256xf32> -> vector<2x256xf32>
    %c0_166 = arith.constant 0 : index
    %c0_167 = arith.constant 0 : index
    %316 = vector.load %arg7[%c0_166, %c0_167] : memref<2x64xf32, #tpu.memory_space<vmem>>, vector<2x64xf32>
    %c0_168 = arith.constant 0 : index
    %c0_169 = arith.constant 0 : index
    %317 = vector.load %arg3[%c0_168, %c0_169] : memref<64x256xf32, #tpu.memory_space<vmem>>, vector<64x256xf32>
    %cst_170 = arith.constant dense<0.000000e+00> : vector<2x256xf32>
    %318 = tpu.matmul %316, %317, %cst_170 {dimension_numbers = #tpu.dot_dimension_numbers<[1], [0], [0], [1], [0, 0, 1, 1], [], []>} : vector<2x64xf32>, vector<64x256xf32>, vector<2x256xf32> -> vector<2x256xf32>
    %319 = arith.addf %315, %318 : vector<2x256xf32>
    %c0_171 = arith.constant 0 : index
    %c0_172 = arith.constant 0 : index
    %320 = vector.load %arg4[%c0_171, %c0_172] : memref<1x256xf32, #tpu.memory_space<vmem>>, vector<1x256xf32>
    %321 = vector.broadcast %320 : vector<1x256xf32> to vector<2x256xf32>
    %322 = arith.addf %319, %321 : vector<2x256xf32>
    %323 = vector.extract_strided_slice %322 {offsets = [0, 0], sizes = [2, 64], strides = [1, 1]} : vector<2x256xf32> to vector<2x64xf32>
    %324 = arith.negf %323 : vector<2x64xf32>
    %325 = math.exp %324 : vector<2x64xf32>
    %cst_173 = arith.constant 1.000000e+00 : f32
    %326 = vector.broadcast %cst_173 : f32 to vector<2x64xf32>
    %327 = arith.addf %326, %325 : vector<2x64xf32>
    %328 = arith.divf %326, %327 : vector<2x64xf32>
    %329 = vector.extract_strided_slice %322 {offsets = [0, 64], sizes = [2, 64], strides = [1, 1]} : vector<2x256xf32> to vector<2x64xf32>
    %330 = arith.negf %329 : vector<2x64xf32>
    %331 = math.exp %330 : vector<2x64xf32>
    %cst_174 = arith.constant 1.000000e+00 : f32
    %332 = vector.broadcast %cst_174 : f32 to vector<2x64xf32>
    %333 = arith.addf %332, %331 : vector<2x64xf32>
    %334 = arith.divf %332, %333 : vector<2x64xf32>
    %335 = vector.extract_strided_slice %322 {offsets = [0, 128], sizes = [2, 64], strides = [1, 1]} : vector<2x256xf32> to vector<2x64xf32>
    %336 = math.tanh %335 : vector<2x64xf32>
    %337 = vector.extract_strided_slice %322 {offsets = [0, 192], sizes = [2, 64], strides = [1, 1]} : vector<2x256xf32> to vector<2x64xf32>
    %338 = arith.negf %337 : vector<2x64xf32>
    %339 = math.exp %338 : vector<2x64xf32>
    %cst_175 = arith.constant 1.000000e+00 : f32
    %340 = vector.broadcast %cst_175 : f32 to vector<2x64xf32>
    %341 = arith.addf %340, %339 : vector<2x64xf32>
    %342 = arith.divf %340, %341 : vector<2x64xf32>
    %c0_176 = arith.constant 0 : index
    %c0_177 = arith.constant 0 : index
    %343 = vector.load %arg8[%c0_176, %c0_177] : memref<2x64xf32, #tpu.memory_space<vmem>>, vector<2x64xf32>
    %344 = arith.mulf %334, %343 : vector<2x64xf32>
    %345 = arith.mulf %328, %336 : vector<2x64xf32>
    %346 = arith.addf %344, %345 : vector<2x64xf32>
    %347 = math.tanh %346 : vector<2x64xf32>
    %348 = arith.mulf %342, %347 : vector<2x64xf32>
    %c0_178 = arith.constant 0 : index
    %c0_179 = arith.constant 0 : index
    %349 = vector.load %arg8[%c0_178, %c0_179] : memref<2x64xf32, #tpu.memory_space<vmem>>, vector<2x64xf32>
    tpu.vector_store %arg8[%c0_178, %c0_179], %346 {strides = array<i32>} : memref<2x64xf32, #tpu.memory_space<vmem>>, vector<2x64xf32>,
    %c0_180 = arith.constant 0 : index
    %c0_181 = arith.constant 0 : index
    %350 = vector.load %arg7[%c0_180, %c0_181] : memref<2x64xf32, #tpu.memory_space<vmem>>, vector<2x64xf32>
    tpu.vector_store %arg7[%c0_180, %c0_181], %348 {strides = array<i32>} : memref<2x64xf32, #tpu.memory_space<vmem>>, vector<2x64xf32>,
    %351 = arith.index_cast %c7_i32 : i32 to index
    %c0_182 = arith.constant 0 : index
    %c0_183 = arith.constant 0 : index
    %352 = vector.load %arg5[%351, %c0_182, %c0_183] : memref<16x2x64xf32, #tpu.memory_space<vmem>>, vector<1x2x64xf32>
    %353 = vector.shape_cast %352 : vector<1x2x64xf32> to vector<2x64xf32>
    %354 = vector.shape_cast %348 : vector<2x64xf32> to vector<1x2x64xf32>
    tpu.vector_store %arg5[%351, %c0_182, %c0_183], %354 {strides = array<i32>} : memref<16x2x64xf32, #tpu.memory_space<vmem>>, vector<1x2x64xf32>,
    %c8_i32 = arith.constant 8 : i32
    %355 = arith.index_cast %c8_i32 : i32 to index
    %c0_184 = arith.constant 0 : index
    %c0_185 = arith.constant 0 : index
    %356 = vector.load %arg1[%355, %c0_184, %c0_185] : memref<16x2x4xf32, #tpu.memory_space<vmem>>, vector<1x2x4xf32>
    %357 = vector.shape_cast %356 : vector<1x2x4xf32> to vector<2x4xf32>
    %c0_186 = arith.constant 0 : index
    %c0_187 = arith.constant 0 : index
    %358 = vector.load %arg2[%c0_186, %c0_187] : memref<4x256xf32, #tpu.memory_space<vmem>>, vector<4x256xf32>
    %cst_188 = arith.constant dense<0.000000e+00> : vector<2x256xf32>
    %359 = tpu.matmul %357, %358, %cst_188 {dimension_numbers = #tpu.dot_dimension_numbers<[1], [0], [0], [1], [0, 0, 1, 1], [], []>} : vector<2x4xf32>, vector<4x256xf32>, vector<2x256xf32> -> vector<2x256xf32>
    %c0_189 = arith.constant 0 : index
    %c0_190 = arith.constant 0 : index
    %360 = vector.load %arg7[%c0_189, %c0_190] : memref<2x64xf32, #tpu.memory_space<vmem>>, vector<2x64xf32>
    %c0_191 = arith.constant 0 : index
    %c0_192 = arith.constant 0 : index
    %361 = vector.load %arg3[%c0_191, %c0_192] : memref<64x256xf32, #tpu.memory_space<vmem>>, vector<64x256xf32>
    %cst_193 = arith.constant dense<0.000000e+00> : vector<2x256xf32>
    %362 = tpu.matmul %360, %361, %cst_193 {dimension_numbers = #tpu.dot_dimension_numbers<[1], [0], [0], [1], [0, 0, 1, 1], [], []>} : vector<2x64xf32>, vector<64x256xf32>, vector<2x256xf32> -> vector<2x256xf32>
    %363 = arith.addf %359, %362 : vector<2x256xf32>
    %c0_194 = arith.constant 0 : index
    %c0_195 = arith.constant 0 : index
    %364 = vector.load %arg4[%c0_194, %c0_195] : memref<1x256xf32, #tpu.memory_space<vmem>>, vector<1x256xf32>
    %365 = vector.broadcast %364 : vector<1x256xf32> to vector<2x256xf32>
    %366 = arith.addf %363, %365 : vector<2x256xf32>
    %367 = vector.extract_strided_slice %366 {offsets = [0, 0], sizes = [2, 64], strides = [1, 1]} : vector<2x256xf32> to vector<2x64xf32>
    %368 = arith.negf %367 : vector<2x64xf32>
    %369 = math.exp %368 : vector<2x64xf32>
    %cst_196 = arith.constant 1.000000e+00 : f32
    %370 = vector.broadcast %cst_196 : f32 to vector<2x64xf32>
    %371 = arith.addf %370, %369 : vector<2x64xf32>
    %372 = arith.divf %370, %371 : vector<2x64xf32>
    %373 = vector.extract_strided_slice %366 {offsets = [0, 64], sizes = [2, 64], strides = [1, 1]} : vector<2x256xf32> to vector<2x64xf32>
    %374 = arith.negf %373 : vector<2x64xf32>
    %375 = math.exp %374 : vector<2x64xf32>
    %cst_197 = arith.constant 1.000000e+00 : f32
    %376 = vector.broadcast %cst_197 : f32 to vector<2x64xf32>
    %377 = arith.addf %376, %375 : vector<2x64xf32>
    %378 = arith.divf %376, %377 : vector<2x64xf32>
    %379 = vector.extract_strided_slice %366 {offsets = [0, 128], sizes = [2, 64], strides = [1, 1]} : vector<2x256xf32> to vector<2x64xf32>
    %380 = math.tanh %379 : vector<2x64xf32>
    %381 = vector.extract_strided_slice %366 {offsets = [0, 192], sizes = [2, 64], strides = [1, 1]} : vector<2x256xf32> to vector<2x64xf32>
    %382 = arith.negf %381 : vector<2x64xf32>
    %383 = math.exp %382 : vector<2x64xf32>
    %cst_198 = arith.constant 1.000000e+00 : f32
    %384 = vector.broadcast %cst_198 : f32 to vector<2x64xf32>
    %385 = arith.addf %384, %383 : vector<2x64xf32>
    %386 = arith.divf %384, %385 : vector<2x64xf32>
    %c0_199 = arith.constant 0 : index
    %c0_200 = arith.constant 0 : index
    %387 = vector.load %arg8[%c0_199, %c0_200] : memref<2x64xf32, #tpu.memory_space<vmem>>, vector<2x64xf32>
    %388 = arith.mulf %378, %387 : vector<2x64xf32>
    %389 = arith.mulf %372, %380 : vector<2x64xf32>
    %390 = arith.addf %388, %389 : vector<2x64xf32>
    %391 = math.tanh %390 : vector<2x64xf32>
    %392 = arith.mulf %386, %391 : vector<2x64xf32>
    %c0_201 = arith.constant 0 : index
    %c0_202 = arith.constant 0 : index
    %393 = vector.load %arg8[%c0_201, %c0_202] : memref<2x64xf32, #tpu.memory_space<vmem>>, vector<2x64xf32>
    tpu.vector_store %arg8[%c0_201, %c0_202], %390 {strides = array<i32>} : memref<2x64xf32, #tpu.memory_space<vmem>>, vector<2x64xf32>,
    %c0_203 = arith.constant 0 : index
    %c0_204 = arith.constant 0 : index
    %394 = vector.load %arg7[%c0_203, %c0_204] : memref<2x64xf32, #tpu.memory_space<vmem>>, vector<2x64xf32>
    tpu.vector_store %arg7[%c0_203, %c0_204], %392 {strides = array<i32>} : memref<2x64xf32, #tpu.memory_space<vmem>>, vector<2x64xf32>,
    %395 = arith.index_cast %c8_i32 : i32 to index
    %c0_205 = arith.constant 0 : index
    %c0_206 = arith.constant 0 : index
    %396 = vector.load %arg5[%395, %c0_205, %c0_206] : memref<16x2x64xf32, #tpu.memory_space<vmem>>, vector<1x2x64xf32>
    %397 = vector.shape_cast %396 : vector<1x2x64xf32> to vector<2x64xf32>
    %398 = vector.shape_cast %392 : vector<2x64xf32> to vector<1x2x64xf32>
    tpu.vector_store %arg5[%395, %c0_205, %c0_206], %398 {strides = array<i32>} : memref<16x2x64xf32, #tpu.memory_space<vmem>>, vector<1x2x64xf32>,
    %c9_i32 = arith.constant 9 : i32
    %399 = arith.index_cast %c9_i32 : i32 to index
    %c0_207 = arith.constant 0 : index
    %c0_208 = arith.constant 0 : index
    %400 = vector.load %arg1[%399, %c0_207, %c0_208] : memref<16x2x4xf32, #tpu.memory_space<vmem>>, vector<1x2x4xf32>
    %401 = vector.shape_cast %400 : vector<1x2x4xf32> to vector<2x4xf32>
    %c0_209 = arith.constant 0 : index
    %c0_210 = arith.constant 0 : index
    %402 = vector.load %arg2[%c0_209, %c0_210] : memref<4x256xf32, #tpu.memory_space<vmem>>, vector<4x256xf32>
    %cst_211 = arith.constant dense<0.000000e+00> : vector<2x256xf32>
    %403 = tpu.matmul %401, %402, %cst_211 {dimension_numbers = #tpu.dot_dimension_numbers<[1], [0], [0], [1], [0, 0, 1, 1], [], []>} : vector<2x4xf32>, vector<4x256xf32>, vector<2x256xf32> -> vector<2x256xf32>
    %c0_212 = arith.constant 0 : index
    %c0_213 = arith.constant 0 : index
    %404 = vector.load %arg7[%c0_212, %c0_213] : memref<2x64xf32, #tpu.memory_space<vmem>>, vector<2x64xf32>
    %c0_214 = arith.constant 0 : index
    %c0_215 = arith.constant 0 : index
    %405 = vector.load %arg3[%c0_214, %c0_215] : memref<64x256xf32, #tpu.memory_space<vmem>>, vector<64x256xf32>
    %cst_216 = arith.constant dense<0.000000e+00> : vector<2x256xf32>
    %406 = tpu.matmul %404, %405, %cst_216 {dimension_numbers = #tpu.dot_dimension_numbers<[1], [0], [0], [1], [0, 0, 1, 1], [], []>} : vector<2x64xf32>, vector<64x256xf32>, vector<2x256xf32> -> vector<2x256xf32>
    %407 = arith.addf %403, %406 : vector<2x256xf32>
    %c0_217 = arith.constant 0 : index
    %c0_218 = arith.constant 0 : index
    %408 = vector.load %arg4[%c0_217, %c0_218] : memref<1x256xf32, #tpu.memory_space<vmem>>, vector<1x256xf32>
    %409 = vector.broadcast %408 : vector<1x256xf32> to vector<2x256xf32>
    %410 = arith.addf %407, %409 : vector<2x256xf32>
    %411 = vector.extract_strided_slice %410 {offsets = [0, 0], sizes = [2, 64], strides = [1, 1]} : vector<2x256xf32> to vector<2x64xf32>
    %412 = arith.negf %411 : vector<2x64xf32>
    %413 = math.exp %412 : vector<2x64xf32>
    %cst_219 = arith.constant 1.000000e+00 : f32
    %414 = vector.broadcast %cst_219 : f32 to vector<2x64xf32>
    %415 = arith.addf %414, %413 : vector<2x64xf32>
    %416 = arith.divf %414, %415 : vector<2x64xf32>
    %417 = vector.extract_strided_slice %410 {offsets = [0, 64], sizes = [2, 64], strides = [1, 1]} : vector<2x256xf32> to vector<2x64xf32>
    %418 = arith.negf %417 : vector<2x64xf32>
    %419 = math.exp %418 : vector<2x64xf32>
    %cst_220 = arith.constant 1.000000e+00 : f32
    %420 = vector.broadcast %cst_220 : f32 to vector<2x64xf32>
    %421 = arith.addf %420, %419 : vector<2x64xf32>
    %422 = arith.divf %420, %421 : vector<2x64xf32>
    %423 = vector.extract_strided_slice %410 {offsets = [0, 128], sizes = [2, 64], strides = [1, 1]} : vector<2x256xf32> to vector<2x64xf32>
    %424 = math.tanh %423 : vector<2x64xf32>
    %425 = vector.extract_strided_slice %410 {offsets = [0, 192], sizes = [2, 64], strides = [1, 1]} : vector<2x256xf32> to vector<2x64xf32>
    %426 = arith.negf %425 : vector<2x64xf32>
    %427 = math.exp %426 : vector<2x64xf32>
    %cst_221 = arith.constant 1.000000e+00 : f32
    %428 = vector.broadcast %cst_221 : f32 to vector<2x64xf32>
    %429 = arith.addf %428, %427 : vector<2x64xf32>
    %430 = arith.divf %428, %429 : vector<2x64xf32>
    %c0_222 = arith.constant 0 : index
    %c0_223 = arith.constant 0 : index
    %431 = vector.load %arg8[%c0_222, %c0_223] : memref<2x64xf32, #tpu.memory_space<vmem>>, vector<2x64xf32>
    %432 = arith.mulf %422, %431 : vector<2x64xf32>
    %433 = arith.mulf %416, %424 : vector<2x64xf32>
    %434 = arith.addf %432, %433 : vector<2x64xf32>
    %435 = math.tanh %434 : vector<2x64xf32>
    %436 = arith.mulf %430, %435 : vector<2x64xf32>
    %c0_224 = arith.constant 0 : index
    %c0_225 = arith.constant 0 : index
    %437 = vector.load %arg8[%c0_224, %c0_225] : memref<2x64xf32, #tpu.memory_space<vmem>>, vector<2x64xf32>
    tpu.vector_store %arg8[%c0_224, %c0_225], %434 {strides = array<i32>} : memref<2x64xf32, #tpu.memory_space<vmem>>, vector<2x64xf32>,
    %c0_226 = arith.constant 0 : index
    %c0_227 = arith.constant 0 : index
    %438 = vector.load %arg7[%c0_226, %c0_227] : memref<2x64xf32, #tpu.memory_space<vmem>>, vector<2x64xf32>
    tpu.vector_store %arg7[%c0_226, %c0_227], %436 {strides = array<i32>} : memref<2x64xf32, #tpu.memory_space<vmem>>, vector<2x64xf32>,
    %439 = arith.index_cast %c9_i32 : i32 to index
    %c0_228 = arith.constant 0 : index
    %c0_229 = arith.constant 0 : index
    %440 = vector.load %arg5[%439, %c0_228, %c0_229] : memref<16x2x64xf32, #tpu.memory_space<vmem>>, vector<1x2x64xf32>
    %441 = vector.shape_cast %440 : vector<1x2x64xf32> to vector<2x64xf32>
    %442 = vector.shape_cast %436 : vector<2x64xf32> to vector<1x2x64xf32>
    tpu.vector_store %arg5[%439, %c0_228, %c0_229], %442 {strides = array<i32>} : memref<16x2x64xf32, #tpu.memory_space<vmem>>, vector<1x2x64xf32>,
    %c10_i32 = arith.constant 10 : i32
    %443 = arith.index_cast %c10_i32 : i32 to index
    %c0_230 = arith.constant 0 : index
    %c0_231 = arith.constant 0 : index
    %444 = vector.load %arg1[%443, %c0_230, %c0_231] : memref<16x2x4xf32, #tpu.memory_space<vmem>>, vector<1x2x4xf32>
    %445 = vector.shape_cast %444 : vector<1x2x4xf32> to vector<2x4xf32>
    %c0_232 = arith.constant 0 : index
    %c0_233 = arith.constant 0 : index
    %446 = vector.load %arg2[%c0_232, %c0_233] : memref<4x256xf32, #tpu.memory_space<vmem>>, vector<4x256xf32>
    %cst_234 = arith.constant dense<0.000000e+00> : vector<2x256xf32>
    %447 = tpu.matmul %445, %446, %cst_234 {dimension_numbers = #tpu.dot_dimension_numbers<[1], [0], [0], [1], [0, 0, 1, 1], [], []>} : vector<2x4xf32>, vector<4x256xf32>, vector<2x256xf32> -> vector<2x256xf32>
    %c0_235 = arith.constant 0 : index
    %c0_236 = arith.constant 0 : index
    %448 = vector.load %arg7[%c0_235, %c0_236] : memref<2x64xf32, #tpu.memory_space<vmem>>, vector<2x64xf32>
    %c0_237 = arith.constant 0 : index
    %c0_238 = arith.constant 0 : index
    %449 = vector.load %arg3[%c0_237, %c0_238] : memref<64x256xf32, #tpu.memory_space<vmem>>, vector<64x256xf32>
    %cst_239 = arith.constant dense<0.000000e+00> : vector<2x256xf32>
    %450 = tpu.matmul %448, %449, %cst_239 {dimension_numbers = #tpu.dot_dimension_numbers<[1], [0], [0], [1], [0, 0, 1, 1], [], []>} : vector<2x64xf32>, vector<64x256xf32>, vector<2x256xf32> -> vector<2x256xf32>
    %451 = arith.addf %447, %450 : vector<2x256xf32>
    %c0_240 = arith.constant 0 : index
    %c0_241 = arith.constant 0 : index
    %452 = vector.load %arg4[%c0_240, %c0_241] : memref<1x256xf32, #tpu.memory_space<vmem>>, vector<1x256xf32>
    %453 = vector.broadcast %452 : vector<1x256xf32> to vector<2x256xf32>
    %454 = arith.addf %451, %453 : vector<2x256xf32>
    %455 = vector.extract_strided_slice %454 {offsets = [0, 0], sizes = [2, 64], strides = [1, 1]} : vector<2x256xf32> to vector<2x64xf32>
    %456 = arith.negf %455 : vector<2x64xf32>
    %457 = math.exp %456 : vector<2x64xf32>
    %cst_242 = arith.constant 1.000000e+00 : f32
    %458 = vector.broadcast %cst_242 : f32 to vector<2x64xf32>
    %459 = arith.addf %458, %457 : vector<2x64xf32>
    %460 = arith.divf %458, %459 : vector<2x64xf32>
    %461 = vector.extract_strided_slice %454 {offsets = [0, 64], sizes = [2, 64], strides = [1, 1]} : vector<2x256xf32> to vector<2x64xf32>
    %462 = arith.negf %461 : vector<2x64xf32>
    %463 = math.exp %462 : vector<2x64xf32>
    %cst_243 = arith.constant 1.000000e+00 : f32
    %464 = vector.broadcast %cst_243 : f32 to vector<2x64xf32>
    %465 = arith.addf %464, %463 : vector<2x64xf32>
    %466 = arith.divf %464, %465 : vector<2x64xf32>
    %467 = vector.extract_strided_slice %454 {offsets = [0, 128], sizes = [2, 64], strides = [1, 1]} : vector<2x256xf32> to vector<2x64xf32>
    %468 = math.tanh %467 : vector<2x64xf32>
    %469 = vector.extract_strided_slice %454 {offsets = [0, 192], sizes = [2, 64], strides = [1, 1]} : vector<2x256xf32> to vector<2x64xf32>
    %470 = arith.negf %469 : vector<2x64xf32>
    %471 = math.exp %470 : vector<2x64xf32>
    %cst_244 = arith.constant 1.000000e+00 : f32
    %472 = vector.broadcast %cst_244 : f32 to vector<2x64xf32>
    %473 = arith.addf %472, %471 : vector<2x64xf32>
    %474 = arith.divf %472, %473 : vector<2x64xf32>
    %c0_245 = arith.constant 0 : index
    %c0_246 = arith.constant 0 : index
    %475 = vector.load %arg8[%c0_245, %c0_246] : memref<2x64xf32, #tpu.memory_space<vmem>>, vector<2x64xf32>
    %476 = arith.mulf %466, %475 : vector<2x64xf32>
    %477 = arith.mulf %460, %468 : vector<2x64xf32>
    %478 = arith.addf %476, %477 : vector<2x64xf32>
    %479 = math.tanh %478 : vector<2x64xf32>
    %480 = arith.mulf %474, %479 : vector<2x64xf32>
    %c0_247 = arith.constant 0 : index
    %c0_248 = arith.constant 0 : index
    %481 = vector.load %arg8[%c0_247, %c0_248] : memref<2x64xf32, #tpu.memory_space<vmem>>, vector<2x64xf32>
    tpu.vector_store %arg8[%c0_247, %c0_248], %478 {strides = array<i32>} : memref<2x64xf32, #tpu.memory_space<vmem>>, vector<2x64xf32>,
    %c0_249 = arith.constant 0 : index
    %c0_250 = arith.constant 0 : index
    %482 = vector.load %arg7[%c0_249, %c0_250] : memref<2x64xf32, #tpu.memory_space<vmem>>, vector<2x64xf32>
    tpu.vector_store %arg7[%c0_249, %c0_250], %480 {strides = array<i32>} : memref<2x64xf32, #tpu.memory_space<vmem>>, vector<2x64xf32>,
    %483 = arith.index_cast %c10_i32 : i32 to index
    %c0_251 = arith.constant 0 : index
    %c0_252 = arith.constant 0 : index
    %484 = vector.load %arg5[%483, %c0_251, %c0_252] : memref<16x2x64xf32, #tpu.memory_space<vmem>>, vector<1x2x64xf32>
    %485 = vector.shape_cast %484 : vector<1x2x64xf32> to vector<2x64xf32>
    %486 = vector.shape_cast %480 : vector<2x64xf32> to vector<1x2x64xf32>
    tpu.vector_store %arg5[%483, %c0_251, %c0_252], %486 {strides = array<i32>} : memref<16x2x64xf32, #tpu.memory_space<vmem>>, vector<1x2x64xf32>,
    %c11_i32 = arith.constant 11 : i32
    %487 = arith.index_cast %c11_i32 : i32 to index
    %c0_253 = arith.constant 0 : index
    %c0_254 = arith.constant 0 : index
    %488 = vector.load %arg1[%487, %c0_253, %c0_254] : memref<16x2x4xf32, #tpu.memory_space<vmem>>, vector<1x2x4xf32>
    %489 = vector.shape_cast %488 : vector<1x2x4xf32> to vector<2x4xf32>
    %c0_255 = arith.constant 0 : index
    %c0_256 = arith.constant 0 : index
    %490 = vector.load %arg2[%c0_255, %c0_256] : memref<4x256xf32, #tpu.memory_space<vmem>>, vector<4x256xf32>
    %cst_257 = arith.constant dense<0.000000e+00> : vector<2x256xf32>
    %491 = tpu.matmul %489, %490, %cst_257 {dimension_numbers = #tpu.dot_dimension_numbers<[1], [0], [0], [1], [0, 0, 1, 1], [], []>} : vector<2x4xf32>, vector<4x256xf32>, vector<2x256xf32> -> vector<2x256xf32>
    %c0_258 = arith.constant 0 : index
    %c0_259 = arith.constant 0 : index
    %492 = vector.load %arg7[%c0_258, %c0_259] : memref<2x64xf32, #tpu.memory_space<vmem>>, vector<2x64xf32>
    %c0_260 = arith.constant 0 : index
    %c0_261 = arith.constant 0 : index
    %493 = vector.load %arg3[%c0_260, %c0_261] : memref<64x256xf32, #tpu.memory_space<vmem>>, vector<64x256xf32>
    %cst_262 = arith.constant dense<0.000000e+00> : vector<2x256xf32>
    %494 = tpu.matmul %492, %493, %cst_262 {dimension_numbers = #tpu.dot_dimension_numbers<[1], [0], [0], [1], [0, 0, 1, 1], [], []>} : vector<2x64xf32>, vector<64x256xf32>, vector<2x256xf32> -> vector<2x256xf32>
    %495 = arith.addf %491, %494 : vector<2x256xf32>
    %c0_263 = arith.constant 0 : index
    %c0_264 = arith.constant 0 : index
    %496 = vector.load %arg4[%c0_263, %c0_264] : memref<1x256xf32, #tpu.memory_space<vmem>>, vector<1x256xf32>
    %497 = vector.broadcast %496 : vector<1x256xf32> to vector<2x256xf32>
    %498 = arith.addf %495, %497 : vector<2x256xf32>
    %499 = vector.extract_strided_slice %498 {offsets = [0, 0], sizes = [2, 64], strides = [1, 1]} : vector<2x256xf32> to vector<2x64xf32>
    %500 = arith.negf %499 : vector<2x64xf32>
    %501 = math.exp %500 : vector<2x64xf32>
    %cst_265 = arith.constant 1.000000e+00 : f32
    %502 = vector.broadcast %cst_265 : f32 to vector<2x64xf32>
    %503 = arith.addf %502, %501 : vector<2x64xf32>
    %504 = arith.divf %502, %503 : vector<2x64xf32>
    %505 = vector.extract_strided_slice %498 {offsets = [0, 64], sizes = [2, 64], strides = [1, 1]} : vector<2x256xf32> to vector<2x64xf32>
    %506 = arith.negf %505 : vector<2x64xf32>
    %507 = math.exp %506 : vector<2x64xf32>
    %cst_266 = arith.constant 1.000000e+00 : f32
    %508 = vector.broadcast %cst_266 : f32 to vector<2x64xf32>
    %509 = arith.addf %508, %507 : vector<2x64xf32>
    %510 = arith.divf %508, %509 : vector<2x64xf32>
    %511 = vector.extract_strided_slice %498 {offsets = [0, 128], sizes = [2, 64], strides = [1, 1]} : vector<2x256xf32> to vector<2x64xf32>
    %512 = math.tanh %511 : vector<2x64xf32>
    %513 = vector.extract_strided_slice %498 {offsets = [0, 192], sizes = [2, 64], strides = [1, 1]} : vector<2x256xf32> to vector<2x64xf32>
    %514 = arith.negf %513 : vector<2x64xf32>
    %515 = math.exp %514 : vector<2x64xf32>
    %cst_267 = arith.constant 1.000000e+00 : f32
    %516 = vector.broadcast %cst_267 : f32 to vector<2x64xf32>
    %517 = arith.addf %516, %515 : vector<2x64xf32>
    %518 = arith.divf %516, %517 : vector<2x64xf32>
    %c0_268 = arith.constant 0 : index
    %c0_269 = arith.constant 0 : index
    %519 = vector.load %arg8[%c0_268, %c0_269] : memref<2x64xf32, #tpu.memory_space<vmem>>, vector<2x64xf32>
    %520 = arith.mulf %510, %519 : vector<2x64xf32>
    %521 = arith.mulf %504, %512 : vector<2x64xf32>
    %522 = arith.addf %520, %521 : vector<2x64xf32>
    %523 = math.tanh %522 : vector<2x64xf32>
    %524 = arith.mulf %518, %523 : vector<2x64xf32>
    %c0_270 = arith.constant 0 : index
    %c0_271 = arith.constant 0 : index
    %525 = vector.load %arg8[%c0_270, %c0_271] : memref<2x64xf32, #tpu.memory_space<vmem>>, vector<2x64xf32>
    tpu.vector_store %arg8[%c0_270, %c0_271], %522 {strides = array<i32>} : memref<2x64xf32, #tpu.memory_space<vmem>>, vector<2x64xf32>,
    %c0_272 = arith.constant 0 : index
    %c0_273 = arith.constant 0 : index
    %526 = vector.load %arg7[%c0_272, %c0_273] : memref<2x64xf32, #tpu.memory_space<vmem>>, vector<2x64xf32>
    tpu.vector_store %arg7[%c0_272, %c0_273], %524 {strides = array<i32>} : memref<2x64xf32, #tpu.memory_space<vmem>>, vector<2x64xf32>,
    %527 = arith.index_cast %c11_i32 : i32 to index
    %c0_274 = arith.constant 0 : index
    %c0_275 = arith.constant 0 : index
    %528 = vector.load %arg5[%527, %c0_274, %c0_275] : memref<16x2x64xf32, #tpu.memory_space<vmem>>, vector<1x2x64xf32>
    %529 = vector.shape_cast %528 : vector<1x2x64xf32> to vector<2x64xf32>
    %530 = vector.shape_cast %524 : vector<2x64xf32> to vector<1x2x64xf32>
    tpu.vector_store %arg5[%527, %c0_274, %c0_275], %530 {strides = array<i32>} : memref<16x2x64xf32, #tpu.memory_space<vmem>>, vector<1x2x64xf32>,
    %c12_i32 = arith.constant 12 : i32
    %531 = arith.index_cast %c12_i32 : i32 to index
    %c0_276 = arith.constant 0 : index
    %c0_277 = arith.constant 0 : index
    %532 = vector.load %arg1[%531, %c0_276, %c0_277] : memref<16x2x4xf32, #tpu.memory_space<vmem>>, vector<1x2x4xf32>
    %533 = vector.shape_cast %532 : vector<1x2x4xf32> to vector<2x4xf32>
    %c0_278 = arith.constant 0 : index
    %c0_279 = arith.constant 0 : index
    %534 = vector.load %arg2[%c0_278, %c0_279] : memref<4x256xf32, #tpu.memory_space<vmem>>, vector<4x256xf32>
    %cst_280 = arith.constant dense<0.000000e+00> : vector<2x256xf32>
    %535 = tpu.matmul %533, %534, %cst_280 {dimension_numbers = #tpu.dot_dimension_numbers<[1], [0], [0], [1], [0, 0, 1, 1], [], []>} : vector<2x4xf32>, vector<4x256xf32>, vector<2x256xf32> -> vector<2x256xf32>
    %c0_281 = arith.constant 0 : index
    %c0_282 = arith.constant 0 : index
    %536 = vector.load %arg7[%c0_281, %c0_282] : memref<2x64xf32, #tpu.memory_space<vmem>>, vector<2x64xf32>
    %c0_283 = arith.constant 0 : index
    %c0_284 = arith.constant 0 : index
    %537 = vector.load %arg3[%c0_283, %c0_284] : memref<64x256xf32, #tpu.memory_space<vmem>>, vector<64x256xf32>
    %cst_285 = arith.constant dense<0.000000e+00> : vector<2x256xf32>
    %538 = tpu.matmul %536, %537, %cst_285 {dimension_numbers = #tpu.dot_dimension_numbers<[1], [0], [0], [1], [0, 0, 1, 1], [], []>} : vector<2x64xf32>, vector<64x256xf32>, vector<2x256xf32> -> vector<2x256xf32>
    %539 = arith.addf %535, %538 : vector<2x256xf32>
    %c0_286 = arith.constant 0 : index
    %c0_287 = arith.constant 0 : index
    %540 = vector.load %arg4[%c0_286, %c0_287] : memref<1x256xf32, #tpu.memory_space<vmem>>, vector<1x256xf32>
    %541 = vector.broadcast %540 : vector<1x256xf32> to vector<2x256xf32>
    %542 = arith.addf %539, %541 : vector<2x256xf32>
    %543 = vector.extract_strided_slice %542 {offsets = [0, 0], sizes = [2, 64], strides = [1, 1]} : vector<2x256xf32> to vector<2x64xf32>
    %544 = arith.negf %543 : vector<2x64xf32>
    %545 = math.exp %544 : vector<2x64xf32>
    %cst_288 = arith.constant 1.000000e+00 : f32
    %546 = vector.broadcast %cst_288 : f32 to vector<2x64xf32>
    %547 = arith.addf %546, %545 : vector<2x64xf32>
    %548 = arith.divf %546, %547 : vector<2x64xf32>
    %549 = vector.extract_strided_slice %542 {offsets = [0, 64], sizes = [2, 64], strides = [1, 1]} : vector<2x256xf32> to vector<2x64xf32>
    %550 = arith.negf %549 : vector<2x64xf32>
    %551 = math.exp %550 : vector<2x64xf32>
    %cst_289 = arith.constant 1.000000e+00 : f32
    %552 = vector.broadcast %cst_289 : f32 to vector<2x64xf32>
    %553 = arith.addf %552, %551 : vector<2x64xf32>
    %554 = arith.divf %552, %553 : vector<2x64xf32>
    %555 = vector.extract_strided_slice %542 {offsets = [0, 128], sizes = [2, 64], strides = [1, 1]} : vector<2x256xf32> to vector<2x64xf32>
    %556 = math.tanh %555 : vector<2x64xf32>
    %557 = vector.extract_strided_slice %542 {offsets = [0, 192], sizes = [2, 64], strides = [1, 1]} : vector<2x256xf32> to vector<2x64xf32>
    %558 = arith.negf %557 : vector<2x64xf32>
    %559 = math.exp %558 : vector<2x64xf32>
    %cst_290 = arith.constant 1.000000e+00 : f32
    %560 = vector.broadcast %cst_290 : f32 to vector<2x64xf32>
    %561 = arith.addf %560, %559 : vector<2x64xf32>
    %562 = arith.divf %560, %561 : vector<2x64xf32>
    %c0_291 = arith.constant 0 : index
    %c0_292 = arith.constant 0 : index
    %563 = vector.load %arg8[%c0_291, %c0_292] : memref<2x64xf32, #tpu.memory_space<vmem>>, vector<2x64xf32>
    %564 = arith.mulf %554, %563 : vector<2x64xf32>
    %565 = arith.mulf %548, %556 : vector<2x64xf32>
    %566 = arith.addf %564, %565 : vector<2x64xf32>
    %567 = math.tanh %566 : vector<2x64xf32>
    %568 = arith.mulf %562, %567 : vector<2x64xf32>
    %c0_293 = arith.constant 0 : index
    %c0_294 = arith.constant 0 : index
    %569 = vector.load %arg8[%c0_293, %c0_294] : memref<2x64xf32, #tpu.memory_space<vmem>>, vector<2x64xf32>
    tpu.vector_store %arg8[%c0_293, %c0_294], %566 {strides = array<i32>} : memref<2x64xf32, #tpu.memory_space<vmem>>, vector<2x64xf32>,
    %c0_295 = arith.constant 0 : index
    %c0_296 = arith.constant 0 : index
    %570 = vector.load %arg7[%c0_295, %c0_296] : memref<2x64xf32, #tpu.memory_space<vmem>>, vector<2x64xf32>
    tpu.vector_store %arg7[%c0_295, %c0_296], %568 {strides = array<i32>} : memref<2x64xf32, #tpu.memory_space<vmem>>, vector<2x64xf32>,
    %571 = arith.index_cast %c12_i32 : i32 to index
    %c0_297 = arith.constant 0 : index
    %c0_298 = arith.constant 0 : index
    %572 = vector.load %arg5[%571, %c0_297, %c0_298] : memref<16x2x64xf32, #tpu.memory_space<vmem>>, vector<1x2x64xf32>
    %573 = vector.shape_cast %572 : vector<1x2x64xf32> to vector<2x64xf32>
    %574 = vector.shape_cast %568 : vector<2x64xf32> to vector<1x2x64xf32>
    tpu.vector_store %arg5[%571, %c0_297, %c0_298], %574 {strides = array<i32>} : memref<16x2x64xf32, #tpu.memory_space<vmem>>, vector<1x2x64xf32>,
    %c13_i32 = arith.constant 13 : i32
    %575 = arith.index_cast %c13_i32 : i32 to index
    %c0_299 = arith.constant 0 : index
    %c0_300 = arith.constant 0 : index
    %576 = vector.load %arg1[%575, %c0_299, %c0_300] : memref<16x2x4xf32, #tpu.memory_space<vmem>>, vector<1x2x4xf32>
    %577 = vector.shape_cast %576 : vector<1x2x4xf32> to vector<2x4xf32>
    %c0_301 = arith.constant 0 : index
    %c0_302 = arith.constant 0 : index
    %578 = vector.load %arg2[%c0_301, %c0_302] : memref<4x256xf32, #tpu.memory_space<vmem>>, vector<4x256xf32>
    %cst_303 = arith.constant dense<0.000000e+00> : vector<2x256xf32>
    %579 = tpu.matmul %577, %578, %cst_303 {dimension_numbers = #tpu.dot_dimension_numbers<[1], [0], [0], [1], [0, 0, 1, 1], [], []>} : vector<2x4xf32>, vector<4x256xf32>, vector<2x256xf32> -> vector<2x256xf32>
    %c0_304 = arith.constant 0 : index
    %c0_305 = arith.constant 0 : index
    %580 = vector.load %arg7[%c0_304, %c0_305] : memref<2x64xf32, #tpu.memory_space<vmem>>, vector<2x64xf32>
    %c0_306 = arith.constant 0 : index
    %c0_307 = arith.constant 0 : index
    %581 = vector.load %arg3[%c0_306, %c0_307] : memref<64x256xf32, #tpu.memory_space<vmem>>, vector<64x256xf32>
    %cst_308 = arith.constant dense<0.000000e+00> : vector<2x256xf32>
    %582 = tpu.matmul %580, %581, %cst_308 {dimension_numbers = #tpu.dot_dimension_numbers<[1], [0], [0], [1], [0, 0, 1, 1], [], []>} : vector<2x64xf32>, vector<64x256xf32>, vector<2x256xf32> -> vector<2x256xf32>
    %583 = arith.addf %579, %582 : vector<2x256xf32>
    %c0_309 = arith.constant 0 : index
    %c0_310 = arith.constant 0 : index
    %584 = vector.load %arg4[%c0_309, %c0_310] : memref<1x256xf32, #tpu.memory_space<vmem>>, vector<1x256xf32>
    %585 = vector.broadcast %584 : vector<1x256xf32> to vector<2x256xf32>
    %586 = arith.addf %583, %585 : vector<2x256xf32>
    %587 = vector.extract_strided_slice %586 {offsets = [0, 0], sizes = [2, 64], strides = [1, 1]} : vector<2x256xf32> to vector<2x64xf32>
    %588 = arith.negf %587 : vector<2x64xf32>
    %589 = math.exp %588 : vector<2x64xf32>
    %cst_311 = arith.constant 1.000000e+00 : f32
    %590 = vector.broadcast %cst_311 : f32 to vector<2x64xf32>
    %591 = arith.addf %590, %589 : vector<2x64xf32>
    %592 = arith.divf %590, %591 : vector<2x64xf32>
    %593 = vector.extract_strided_slice %586 {offsets = [0, 64], sizes = [2, 64], strides = [1, 1]} : vector<2x256xf32> to vector<2x64xf32>
    %594 = arith.negf %593 : vector<2x64xf32>
    %595 = math.exp %594 : vector<2x64xf32>
    %cst_312 = arith.constant 1.000000e+00 : f32
    %596 = vector.broadcast %cst_312 : f32 to vector<2x64xf32>
    %597 = arith.addf %596, %595 : vector<2x64xf32>
    %598 = arith.divf %596, %597 : vector<2x64xf32>
    %599 = vector.extract_strided_slice %586 {offsets = [0, 128], sizes = [2, 64], strides = [1, 1]} : vector<2x256xf32> to vector<2x64xf32>
    %600 = math.tanh %599 : vector<2x64xf32>
    %601 = vector.extract_strided_slice %586 {offsets = [0, 192], sizes = [2, 64], strides = [1, 1]} : vector<2x256xf32> to vector<2x64xf32>
    %602 = arith.negf %601 : vector<2x64xf32>
    %603 = math.exp %602 : vector<2x64xf32>
    %cst_313 = arith.constant 1.000000e+00 : f32
    %604 = vector.broadcast %cst_313 : f32 to vector<2x64xf32>
    %605 = arith.addf %604, %603 : vector<2x64xf32>
    %606 = arith.divf %604, %605 : vector<2x64xf32>
    %c0_314 = arith.constant 0 : index
    %c0_315 = arith.constant 0 : index
    %607 = vector.load %arg8[%c0_314, %c0_315] : memref<2x64xf32, #tpu.memory_space<vmem>>, vector<2x64xf32>
    %608 = arith.mulf %598, %607 : vector<2x64xf32>
    %609 = arith.mulf %592, %600 : vector<2x64xf32>
    %610 = arith.addf %608, %609 : vector<2x64xf32>
    %611 = math.tanh %610 : vector<2x64xf32>
    %612 = arith.mulf %606, %611 : vector<2x64xf32>
    %c0_316 = arith.constant 0 : index
    %c0_317 = arith.constant 0 : index
    %613 = vector.load %arg8[%c0_316, %c0_317] : memref<2x64xf32, #tpu.memory_space<vmem>>, vector<2x64xf32>
    tpu.vector_store %arg8[%c0_316, %c0_317], %610 {strides = array<i32>} : memref<2x64xf32, #tpu.memory_space<vmem>>, vector<2x64xf32>,
    %c0_318 = arith.constant 0 : index
    %c0_319 = arith.constant 0 : index
    %614 = vector.load %arg7[%c0_318, %c0_319] : memref<2x64xf32, #tpu.memory_space<vmem>>, vector<2x64xf32>
    tpu.vector_store %arg7[%c0_318, %c0_319], %612 {strides = array<i32>} : memref<2x64xf32, #tpu.memory_space<vmem>>, vector<2x64xf32>,
    %615 = arith.index_cast %c13_i32 : i32 to index
    %c0_320 = arith.constant 0 : index
    %c0_321 = arith.constant 0 : index
    %616 = vector.load %arg5[%615, %c0_320, %c0_321] : memref<16x2x64xf32, #tpu.memory_space<vmem>>, vector<1x2x64xf32>
    %617 = vector.shape_cast %616 : vector<1x2x64xf32> to vector<2x64xf32>
    %618 = vector.shape_cast %612 : vector<2x64xf32> to vector<1x2x64xf32>
    tpu.vector_store %arg5[%615, %c0_320, %c0_321], %618 {strides = array<i32>} : memref<16x2x64xf32, #tpu.memory_space<vmem>>, vector<1x2x64xf32>,
    %c14_i32 = arith.constant 14 : i32
    %619 = arith.index_cast %c14_i32 : i32 to index
    %c0_322 = arith.constant 0 : index
    %c0_323 = arith.constant 0 : index
    %620 = vector.load %arg1[%619, %c0_322, %c0_323] : memref<16x2x4xf32, #tpu.memory_space<vmem>>, vector<1x2x4xf32>
    %621 = vector.shape_cast %620 : vector<1x2x4xf32> to vector<2x4xf32>
    %c0_324 = arith.constant 0 : index
    %c0_325 = arith.constant 0 : index
    %622 = vector.load %arg2[%c0_324, %c0_325] : memref<4x256xf32, #tpu.memory_space<vmem>>, vector<4x256xf32>
    %cst_326 = arith.constant dense<0.000000e+00> : vector<2x256xf32>
    %623 = tpu.matmul %621, %622, %cst_326 {dimension_numbers = #tpu.dot_dimension_numbers<[1], [0], [0], [1], [0, 0, 1, 1], [], []>} : vector<2x4xf32>, vector<4x256xf32>, vector<2x256xf32> -> vector<2x256xf32>
    %c0_327 = arith.constant 0 : index
    %c0_328 = arith.constant 0 : index
    %624 = vector.load %arg7[%c0_327, %c0_328] : memref<2x64xf32, #tpu.memory_space<vmem>>, vector<2x64xf32>
    %c0_329 = arith.constant 0 : index
    %c0_330 = arith.constant 0 : index
    %625 = vector.load %arg3[%c0_329, %c0_330] : memref<64x256xf32, #tpu.memory_space<vmem>>, vector<64x256xf32>
    %cst_331 = arith.constant dense<0.000000e+00> : vector<2x256xf32>
    %626 = tpu.matmul %624, %625, %cst_331 {dimension_numbers = #tpu.dot_dimension_numbers<[1], [0], [0], [1], [0, 0, 1, 1], [], []>} : vector<2x64xf32>, vector<64x256xf32>, vector<2x256xf32> -> vector<2x256xf32>
    %627 = arith.addf %623, %626 : vector<2x256xf32>
    %c0_332 = arith.constant 0 : index
    %c0_333 = arith.constant 0 : index
    %628 = vector.load %arg4[%c0_332, %c0_333] : memref<1x256xf32, #tpu.memory_space<vmem>>, vector<1x256xf32>
    %629 = vector.broadcast %628 : vector<1x256xf32> to vector<2x256xf32>
    %630 = arith.addf %627, %629 : vector<2x256xf32>
    %631 = vector.extract_strided_slice %630 {offsets = [0, 0], sizes = [2, 64], strides = [1, 1]} : vector<2x256xf32> to vector<2x64xf32>
    %632 = arith.negf %631 : vector<2x64xf32>
    %633 = math.exp %632 : vector<2x64xf32>
    %cst_334 = arith.constant 1.000000e+00 : f32
    %634 = vector.broadcast %cst_334 : f32 to vector<2x64xf32>
    %635 = arith.addf %634, %633 : vector<2x64xf32>
    %636 = arith.divf %634, %635 : vector<2x64xf32>
    %637 = vector.extract_strided_slice %630 {offsets = [0, 64], sizes = [2, 64], strides = [1, 1]} : vector<2x256xf32> to vector<2x64xf32>
    %638 = arith.negf %637 : vector<2x64xf32>
    %639 = math.exp %638 : vector<2x64xf32>
    %cst_335 = arith.constant 1.000000e+00 : f32
    %640 = vector.broadcast %cst_335 : f32 to vector<2x64xf32>
    %641 = arith.addf %640, %639 : vector<2x64xf32>
    %642 = arith.divf %640, %641 : vector<2x64xf32>
    %643 = vector.extract_strided_slice %630 {offsets = [0, 128], sizes = [2, 64], strides = [1, 1]} : vector<2x256xf32> to vector<2x64xf32>
    %644 = math.tanh %643 : vector<2x64xf32>
    %645 = vector.extract_strided_slice %630 {offsets = [0, 192], sizes = [2, 64], strides = [1, 1]} : vector<2x256xf32> to vector<2x64xf32>
    %646 = arith.negf %645 : vector<2x64xf32>
    %647 = math.exp %646 : vector<2x64xf32>
    %cst_336 = arith.constant 1.000000e+00 : f32
    %648 = vector.broadcast %cst_336 : f32 to vector<2x64xf32>
    %649 = arith.addf %648, %647 : vector<2x64xf32>
    %650 = arith.divf %648, %649 : vector<2x64xf32>
    %c0_337 = arith.constant 0 : index
    %c0_338 = arith.constant 0 : index
    %651 = vector.load %arg8[%c0_337, %c0_338] : memref<2x64xf32, #tpu.memory_space<vmem>>, vector<2x64xf32>
    %652 = arith.mulf %642, %651 : vector<2x64xf32>
    %653 = arith.mulf %636, %644 : vector<2x64xf32>
    %654 = arith.addf %652, %653 : vector<2x64xf32>
    %655 = math.tanh %654 : vector<2x64xf32>
    %656 = arith.mulf %650, %655 : vector<2x64xf32>
    %c0_339 = arith.constant 0 : index
    %c0_340 = arith.constant 0 : index
    %657 = vector.load %arg8[%c0_339, %c0_340] : memref<2x64xf32, #tpu.memory_space<vmem>>, vector<2x64xf32>
    tpu.vector_store %arg8[%c0_339, %c0_340], %654 {strides = array<i32>} : memref<2x64xf32, #tpu.memory_space<vmem>>, vector<2x64xf32>,
    %c0_341 = arith.constant 0 : index
    %c0_342 = arith.constant 0 : index
    %658 = vector.load %arg7[%c0_341, %c0_342] : memref<2x64xf32, #tpu.memory_space<vmem>>, vector<2x64xf32>
    tpu.vector_store %arg7[%c0_341, %c0_342], %656 {strides = array<i32>} : memref<2x64xf32, #tpu.memory_space<vmem>>, vector<2x64xf32>,
    %659 = arith.index_cast %c14_i32 : i32 to index
    %c0_343 = arith.constant 0 : index
    %c0_344 = arith.constant 0 : index
    %660 = vector.load %arg5[%659, %c0_343, %c0_344] : memref<16x2x64xf32, #tpu.memory_space<vmem>>, vector<1x2x64xf32>
    %661 = vector.shape_cast %660 : vector<1x2x64xf32> to vector<2x64xf32>
    %662 = vector.shape_cast %656 : vector<2x64xf32> to vector<1x2x64xf32>
    tpu.vector_store %arg5[%659, %c0_343, %c0_344], %662 {strides = array<i32>} : memref<16x2x64xf32, #tpu.memory_space<vmem>>, vector<1x2x64xf32>,
    %c15_i32 = arith.constant 15 : i32
    %663 = arith.index_cast %c15_i32 : i32 to index
    %c0_345 = arith.constant 0 : index
    %c0_346 = arith.constant 0 : index
    %664 = vector.load %arg1[%663, %c0_345, %c0_346] : memref<16x2x4xf32, #tpu.memory_space<vmem>>, vector<1x2x4xf32>
    %665 = vector.shape_cast %664 : vector<1x2x4xf32> to vector<2x4xf32>
    %c0_347 = arith.constant 0 : index
    %c0_348 = arith.constant 0 : index
    %666 = vector.load %arg2[%c0_347, %c0_348] : memref<4x256xf32, #tpu.memory_space<vmem>>, vector<4x256xf32>
    %cst_349 = arith.constant dense<0.000000e+00> : vector<2x256xf32>
    %667 = tpu.matmul %665, %666, %cst_349 {dimension_numbers = #tpu.dot_dimension_numbers<[1], [0], [0], [1], [0, 0, 1, 1], [], []>} : vector<2x4xf32>, vector<4x256xf32>, vector<2x256xf32> -> vector<2x256xf32>
    %c0_350 = arith.constant 0 : index
    %c0_351 = arith.constant 0 : index
    %668 = vector.load %arg7[%c0_350, %c0_351] : memref<2x64xf32, #tpu.memory_space<vmem>>, vector<2x64xf32>
    %c0_352 = arith.constant 0 : index
    %c0_353 = arith.constant 0 : index
    %669 = vector.load %arg3[%c0_352, %c0_353] : memref<64x256xf32, #tpu.memory_space<vmem>>, vector<64x256xf32>
    %cst_354 = arith.constant dense<0.000000e+00> : vector<2x256xf32>
    %670 = tpu.matmul %668, %669, %cst_354 {dimension_numbers = #tpu.dot_dimension_numbers<[1], [0], [0], [1], [0, 0, 1, 1], [], []>} : vector<2x64xf32>, vector<64x256xf32>, vector<2x256xf32> -> vector<2x256xf32>
    %671 = arith.addf %667, %670 : vector<2x256xf32>
    %c0_355 = arith.constant 0 : index
    %c0_356 = arith.constant 0 : index
    %672 = vector.load %arg4[%c0_355, %c0_356] : memref<1x256xf32, #tpu.memory_space<vmem>>, vector<1x256xf32>
    %673 = vector.broadcast %672 : vector<1x256xf32> to vector<2x256xf32>
    %674 = arith.addf %671, %673 : vector<2x256xf32>
    %675 = vector.extract_strided_slice %674 {offsets = [0, 0], sizes = [2, 64], strides = [1, 1]} : vector<2x256xf32> to vector<2x64xf32>
    %676 = arith.negf %675 : vector<2x64xf32>
    %677 = math.exp %676 : vector<2x64xf32>
    %cst_357 = arith.constant 1.000000e+00 : f32
    %678 = vector.broadcast %cst_357 : f32 to vector<2x64xf32>
    %679 = arith.addf %678, %677 : vector<2x64xf32>
    %680 = arith.divf %678, %679 : vector<2x64xf32>
    %681 = vector.extract_strided_slice %674 {offsets = [0, 64], sizes = [2, 64], strides = [1, 1]} : vector<2x256xf32> to vector<2x64xf32>
    %682 = arith.negf %681 : vector<2x64xf32>
    %683 = math.exp %682 : vector<2x64xf32>
    %cst_358 = arith.constant 1.000000e+00 : f32
    %684 = vector.broadcast %cst_358 : f32 to vector<2x64xf32>
    %685 = arith.addf %684, %683 : vector<2x64xf32>
    %686 = arith.divf %684, %685 : vector<2x64xf32>
    %687 = vector.extract_strided_slice %674 {offsets = [0, 128], sizes = [2, 64], strides = [1, 1]} : vector<2x256xf32> to vector<2x64xf32>
    %688 = math.tanh %687 : vector<2x64xf32>
    %689 = vector.extract_strided_slice %674 {offsets = [0, 192], sizes = [2, 64], strides = [1, 1]} : vector<2x256xf32> to vector<2x64xf32>
    %690 = arith.negf %689 : vector<2x64xf32>
    %691 = math.exp %690 : vector<2x64xf32>
    %cst_359 = arith.constant 1.000000e+00 : f32
    %692 = vector.broadcast %cst_359 : f32 to vector<2x64xf32>
    %693 = arith.addf %692, %691 : vector<2x64xf32>
    %694 = arith.divf %692, %693 : vector<2x64xf32>
    %c0_360 = arith.constant 0 : index
    %c0_361 = arith.constant 0 : index
    %695 = vector.load %arg8[%c0_360, %c0_361] : memref<2x64xf32, #tpu.memory_space<vmem>>, vector<2x64xf32>
    %696 = arith.mulf %686, %695 : vector<2x64xf32>
    %697 = arith.mulf %680, %688 : vector<2x64xf32>
    %698 = arith.addf %696, %697 : vector<2x64xf32>
    %699 = math.tanh %698 : vector<2x64xf32>
    %700 = arith.mulf %694, %699 : vector<2x64xf32>
    %c0_362 = arith.constant 0 : index
    %c0_363 = arith.constant 0 : index
    %701 = vector.load %arg8[%c0_362, %c0_363] : memref<2x64xf32, #tpu.memory_space<vmem>>, vector<2x64xf32>
    tpu.vector_store %arg8[%c0_362, %c0_363], %698 {strides = array<i32>} : memref<2x64xf32, #tpu.memory_space<vmem>>, vector<2x64xf32>,
    %c0_364 = arith.constant 0 : index
    %c0_365 = arith.constant 0 : index
    %702 = vector.load %arg7[%c0_364, %c0_365] : memref<2x64xf32, #tpu.memory_space<vmem>>, vector<2x64xf32>
    tpu.vector_store %arg7[%c0_364, %c0_365], %700 {strides = array<i32>} : memref<2x64xf32, #tpu.memory_space<vmem>>, vector<2x64xf32>,
    %703 = arith.index_cast %c15_i32 : i32 to index
    %c0_366 = arith.constant 0 : index
    %c0_367 = arith.constant 0 : index
    %704 = vector.load %arg5[%703, %c0_366, %c0_367] : memref<16x2x64xf32, #tpu.memory_space<vmem>>, vector<1x2x64xf32>
    %705 = vector.shape_cast %704 : vector<1x2x64xf32> to vector<2x64xf32>
    %706 = vector.shape_cast %700 : vector<2x64xf32> to vector<1x2x64xf32>
    tpu.vector_store %arg5[%703, %c0_366, %c0_367], %706 {strides = array<i32>} : memref<16x2x64xf32, #tpu.memory_space<vmem>>, vector<1x2x64xf32>,
    %c16_i32 = arith.constant 16 : i32
    %c0_368 = arith.constant 0 : index
    %c0_369 = arith.constant 0 : index
    %707 = vector.load %arg7[%c0_368, %c0_369] : memref<2x64xf32, #tpu.memory_space<vmem>>, vector<2x64xf32>
    %c0_370 = arith.constant 0 : index
    %c0_371 = arith.constant 0 : index
    %708 = vector.load %arg6[%c0_370, %c0_371] : memref<2x64xf32, #tpu.memory_space<vmem>>, vector<2x64xf32>
    tpu.vector_store %arg6[%c0_370, %c0_371], %707 {strides = array<i32>} : memref<2x64xf32, #tpu.memory_space<vmem>>, vector<2x64xf32>,
    return
  }
  func.func @transform_0(%arg0: i32) -> (i32, i32, i32) {
    %c0_i32 = arith.constant 0 : i32
    %c0_i32_0 = arith.constant 0 : i32
    %c0_i32_1 = arith.constant 0 : i32
    return %arg0, %c0_i32, %c0_i32_0 : i32, i32, i32
  }
  func.func @transform_1(%arg0: i32) -> (i32, i32) {
    %c0_i32 = arith.constant 0 : i32
    %c0_i32_0 = arith.constant 0 : i32
    %c0_i32_1 = arith.constant 0 : i32
    return %c0_i32, %c0_i32_0 : i32, i32
  }
  func.func @transform_2(%arg0: i32) -> (i32, i32) {
    %c0_i32 = arith.constant 0 : i32
    %c0_i32_0 = arith.constant 0 : i32
    %c0_i32_1 = arith.constant 0 : i32
    return %c0_i32, %c0_i32_0 : i32, i32
  }
  func.func @transform_3(%arg0: i32) -> (i32, i32) {
    %c0_i32 = arith.constant 0 : i32
    %c0_i32_0 = arith.constant 0 : i32
    %c0_i32_1 = arith.constant 0 : i32
    return %c0_i32, %c0_i32_0 : i32, i32
  }
  func.func @transform_4(%arg0: i32) -> (i32, i32, i32) {
    %c0_i32 = arith.constant 0 : i32
    %c0_i32_0 = arith.constant 0 : i32
    %c0_i32_1 = arith.constant 0 : i32
    return %arg0, %c0_i32, %c0_i32_0 : i32, i32, i32
  }
  func.func @transform_5(%arg0: i32) -> (i32, i32) {
    %c0_i32 = arith.constant 0 : i32
    %c0_i32_0 = arith.constant 0 : i32
    %c0_i32_1 = arith.constant 0 : i32
    return %c0_i32, %c0_i32_0 : i32, i32
  }
}

</mosaic_0001>

<bundles_post_ra>
// kernel: tpu_custom_call.1
= control target key start
LH: loop header
LB: loop body
LE: loop exit
PB: predicated region body
PF: predicated region fallthrough
CT: control target
= control target key end

     0   :  { %11 = vsyncpa [#allocation5], 0  ;;  %s4820_s0 = inlined_call_operand.vmem [shape: f32[16,2,4], index: 0, kind: input, shape index: {}]   ;;  %s4821_s1 = inlined_call_operand.vmem [shape: f32[4,256], index: 1, kind: input, shape index: {}]   ;;  %s4822_s2 = inlined_call_operand.hbm [shape: f32[64,256], index: 2, kind: input, shape index: {}]   ;;  %s4823_s3 = inlined_call_operand.vmem [shape: f32[1,256], index: 3, kind: input, shape index: {}]   ;;  %s4824_s4 = inlined_call_operand.hbm [shape: f32[16,2,64], index: 4, kind: output, shape index: {0}]   ;;  %s4825_s5 = inlined_call_operand.hbm [shape: f32[2,64], index: 5, kind: output, shape index: {1}]  }
   0x1   :  { %12 = vsyncpa [#allocation6], 0 }
   0x2   :  { %13 = vsyncpa [#allocation9], 0  ;;  %s4090_s18 = smov [#allocation4]  }
   0x3   :  { %s23_s19 = sshll.u32 %s4090_s18, 4  ;;  %s24_s19 = int_to_ptr.vmem [resolvable:$true] %s23_s19 }
   0x4   :  { %s4032_s20 = scalar_lea.vmem %s24_s19, 2048  ;;  %p4037_p1 = scmp.lt.s32.totalorder %s24_s19, %s24_s19 }
   0x5   :  { %p4033_p0 = scmp.ne.s32.totalorder %s24_s19, %s4032_s20  ;;  %p4038_p2 = scmp.lt.s32.totalorder %s4032_s20, %s4032_s20 }
   0x7   :  { %p4039_p3 = por %p4038_p2, %p4037_p1 }
   0x9   :  { %p4040_p4 = pnand %p4039_p3, %p4033_p0 }
   0xb   :  { %4043 = shalt.err (!%p4040_p4)
}
   0xc   :  { %s4091_s21 = smov 256   ;;  %s4092_s22 = smov 16  }
   0xd   :  { %29 = dma.hbm_to_vmem [thread:$0]  %s4822_s2, 2048, %s24_s19, [#allocation5], %s4091_s21, %s4091_s21, %s4092_s22  }
   0xe   :  { %4084 = dma.done.wait [#allocation5], 2048  }
   0xf   :  { %4085 = vsyncadd [#allocation5], 4294965248  ;;  %vm39_vm0 = vcmask 517120   ;;  %v4093_v0 = vmov 0.0   ;;  %v4138_v1 = vld [vmem:[#allocation4 + $0x78] sm:$0xff]  ;;  %v4140_v2 = vld [vmem:[#allocation4 + $0x70] sm:$0xff]  ;;  %v220_v22 = vlaneseq }
  0x10   :  { %211 = vmatprep.mubr.f32.mxu1 %v4093_v0  ;;  %129 = vmatprep.mubr.f32.mxu0 %v4093_v0  ;;  %40 = vst.msk [vmem:[#allocation2] sm:$0x3] %vm39_vm0, %v4093_v0  ;;  %41 = vst.msk [vmem:[#allocation3] sm:$0x3] %vm39_vm0, %v4093_v0  ;;  %v4142_v3 = vld [vmem:[#allocation4 + $0x68] sm:$0xff]  ;;  %v4145_v4 = vld [vmem:[#allocation4 + $0x60] sm:$0xff] }
  0x11   :  { %81 = vmatprep.subr.mxu0 %v4138_v1  ;;  %v4148_v5 = vld [vmem:[#allocation4 + $0x58] sm:$0xff]  ;;  %v4151_v6 = vld [vmem:[#allocation4 + $0x50] sm:$0xff]  ;;  %v4154_v7 = vld [vmem:[#allocation4 + $0x48] sm:$0xff]  ;;  %vm142_vm1 = vcmask 1043456   ;;  %vm138_vm2 = vcmask 31744   ;;  %s4094_s28 = smov 64  }
  0x12   :  { %82 = vmatpush1.msra.mxu0 %v4140_v2  ;;  %v4159_v8 = vld [vmem:[%s4821_s1] sm:$0xff]  ;;  %v4175_v13 = vld [vmem:[#allocation4 + $0x30] sm:$0xff]  ;;  %v4180_v15 = vld [vmem:[#allocation4 + $0x28] sm:$0xff]  ;;  %vm61_vm3 = vcmask 523264   ;;  %v221_v23 = vshrl.u32 %v220_v22, 7 }
  0x13   :  { %83 = vmatprep.subr.mxu0 %v4142_v3  ;;  %v4162_v9 = vld [vmem:[#allocation4 + $0x40] sm:$0xff]  ;;  %v4166_v10 = vcombine.high %v4159_v8, %v4159_v8  ;;  %v4169_v11 = vld [vmem:[#allocation4 + $0x38] sm:$0xff]  ;;  %v4193_v18 = vld [vmem:[#allocation4 + $0x10] sm:$0xff] }
  0x14   :  { %84 = vmatpush1.msra.mxu0 %v4145_v4  ;;  %v42_v12 = vld [vmem:[%s4820_s0] sm:$0x3]  ;;  %v4185_v16 = vld [vmem:[#allocation4 + $0x20] sm:$0xff]  ;;  %v4197_v19 = vld [vmem:[#allocation4 + $0x8] sm:$0xff]  ;;  %v4230_v24 = vsub.s32 0, %v221_v23  ;;  %v4236_v32 = vsub.s32 1, %v221_v23 }
  0x15   :  { %85 = vmatprep.subr.mxu0 %v4148_v5  ;;  %3710 = vmatprep.subr.msk.mxu1 %vm142_vm1, %v4166_v10  ;;  %v4189_v17 = vld [vmem:[#allocation4 + $0x18] sm:$0xff]  ;;  %v4201_v20 = vld [vmem:[#allocation4] sm:$0xff] }
  0x16   :  { %86 = vmatpush1.msra.mxu0 %v4151_v6  ;;  %3711 = vmatpush1.msk.msra.mxu1 %vm142_vm1, %v4159_v8  ;;  %v218_v25 = vld [vmem:[%s4823_s3] sm:$0x3]  ;;  %v3715_v50 = vld [vmem:[%s4820_s0 + $0x2] sm:$0x3] }
  0x17   :  { %87 = vmatprep.subr.mxu0 %v4154_v7  ;;  %v245_v14 = vld [vmem:[#allocation3] sm:$0x3]  ;;  %3712 = vmatmul.mubr.msk.f32.vlgmr.msra.gmra.mxu1 %vm138_vm2, %v42_v12  ;;  %v44_v21 = vld [vmem:[#allocation2] sm:$0x3]  ;;  %v223_v26 = vrot.slane %v218_v25, %v4230_v24  ;;  %v227_v36 = vrot.slane %v218_v25, %v4236_v32 }
  0x18   :  { %88 = vmatpush1.msra.mxu0 %v4162_v9  ;;  %247 = vrot.lane.b32.xlu0 %v245_v14, %s4094_s28  ;;  %v445_v58 = vld [vmem:[%s4823_s3] sm:$0x3] }
  0x19   :  { %89 = vmatprep.subr.mxu0 %v4169_v11  ;;  %310 = vmatprep.subr.mxu1 %v4138_v1  ;;  %v450_v59 = vrot.slane %v445_v58, %v4230_v24  ;;  %v454_v23 = vrot.slane %v445_v58, %v4236_v32 }
  0x1a   :  { %90 = vmatpush1.msra.mxu0 %v4175_v13  ;;  %311 = vmatpush1.msra.mxu1 %v4140_v2 }
  0x1b   :  { %91 = vmatprep.subr.mxu0 %v4180_v15  ;;  %312 = vmatprep.subr.mxu1 %v4142_v3 }
  0x1c   :  { %92 = vmatpush1.msra.mxu0 %v4185_v16  ;;  %313 = vmatpush1.msra.mxu1 %v4145_v4 }
  0x1d   :  { %93 = vmatprep.subr.mxu0 %v4189_v17  ;;  %314 = vmatprep.subr.mxu1 %v4148_v5 }
  0x1e   :  { %94 = vmatpush1.msra.mxu0 %v4193_v18  ;;  %315 = vmatpush1.msra.mxu1 %v4151_v6 }
  0x1f   :  { %95 = vmatprep.subr.mxu0 %v4197_v19  ;;  %316 = vmatprep.subr.mxu1 %v4154_v7 }
  0x20   :  { %96 = vmatpush1.msra.mxu0 %v4201_v20  ;;  %317 = vmatpush1.msra.mxu1 %v4162_v9 }
  0x21   :  { %3709 = vmatmul.mubr.msk.f32.vlgmr.msra.gmra.mxu0 %vm61_vm3, %v44_v21  ;;  %3717 = vmatprep.subr.msk.mxu0 %vm142_vm1, %v4166_v10 }
  0x22   :  { %318 = vmatprep.subr.mxu1 %v4169_v11  ;;  %3718 = vmatpush1.msk.msra.mxu0 %vm142_vm1, %v4159_v8 }
  0x23   :  { %319 = vmatpush1.msra.mxu1 %v4175_v13  ;;  %438 = vmatprep.mubr.f32.mxu0 %v4093_v0 }
  0x24   :  { %320 = vmatprep.subr.mxu1 %v4180_v15  ;;  %358 = vmatprep.mubr.f32.mxu1 %v4093_v0 }
  0x25   :  { %321 = vmatpush1.msra.mxu1 %v4185_v16  ;;  %3724 = vmatprep.subr.msk.mxu0 %vm142_vm1, %v4166_v10 }
  0x26   :  { %322 = vmatprep.subr.mxu1 %v4189_v17  ;;  %3719 = vmatmul.mubr.msk.f32.vlgmr.msra.gmra.mxu0 %vm138_vm2, %v3715_v50 }
  0x27   :  { %323 = vmatpush1.msra.mxu1 %v4193_v18  ;;  %3725 = vmatpush1.msk.msra.mxu0 %vm142_vm1, %v4159_v8 }
  0x28   :  { %324 = vmatprep.subr.mxu1 %v4197_v19  ;;  %665 = vmatprep.mubr.f32.mxu0 %v4093_v0 }
  0x29   :  { %325 = vmatpush1.msra.mxu1 %v4201_v20  ;;  %764 = vmatprep.subr.mxu0 %v4138_v1 }
  0x2a   :  { %537 = vmatprep.subr.mxu1 %v4138_v1 }
  0x8a   :  { %v248_v45 = vpop.permute.xlu0 %247 }
  0xd7   :  { %v213_v27 = vpop.f32.mrf.mxu1 }
  0xd9   :  { %v215_v34 = vpop.f32.mrf.mxu1 }
  0xe1   :  { %v131_v28 = vpop.f32.mrf.mxu0 }
  0xe2   :  { %v214_v29 = vadd.f32 %v213_v27, %v131_v28 }
  0xe3   :  { %v133_v33 = vpop.f32.mrf.mxu0 }
  0xe4   :  { %v230_v30 = vadd.f32 %v223_v26, %v214_v29  ;;  %v216_v35 = vadd.f32 %v215_v34, %v133_v33 }
  0xe6   :  { %v3713_v31 = vmul.f32 -1.442695, %v230_v30  ;;  %v231_v37 = vadd.f32 %v227_v36, %v216_v35  ;;  %v440_v60 = vpop.f32.mrf.mxu0 }
  0xe8   :  { %3832 = vpow2.f32 %v3713_v31  ;;  %v3714_v43 = vmul.f32 -1.442695, %v231_v37  ;;  %v442_v21 = vpop.f32.mrf.mxu0 }
  0xe9   :  { %3834 = vtanh.f32 %v231_v37 }
  0xf5   :  { %v3833_v38 = vpop.eup %3832 }
  0xf6   :  { %v235_v39 = vadd.f32 1.0, %v3833_v38  ;;  %v3835_v40 = vpop.eup %3834 }
  0xf8   :  { %3836 = vrcp.f32 %v235_v39  ;;  %v3722_v39 = vld [vmem:[%s4820_s0 + $0x4] sm:$0x3] }
  0xf9   :  { %3838 = vpow2.f32 %v3714_v43  ;;  %3726 = vmatmul.mubr.msk.f32.vlgmr.msra.gmra.mxu0 %vm138_vm2, %v3722_v39 }
  0xfa   :  { %765 = vmatpush1.msra.mxu0 %v4140_v2  ;;  %812 = vmatprep.mubr.f32.mxu0 %v4093_v0 }
  0xfb   :  { %766 = vmatprep.subr.mxu0 %v4142_v3 }
  0xfc   :  { %767 = vmatpush1.msra.mxu0 %v4145_v4 }
  0xfd   :  { %768 = vmatprep.subr.mxu0 %v4148_v5 }
  0xfe   :  { %769 = vmatpush1.msra.mxu0 %v4151_v6 }
  0xff   :  { %770 = vmatprep.subr.mxu0 %v4154_v7 }
 0x100   :  { %771 = vmatpush1.msra.mxu0 %v4162_v9 }
 0x101   :  { %772 = vmatprep.subr.mxu0 %v4169_v11 }
 0x102   :  { %773 = vmatpush1.msra.mxu0 %v4175_v13 }
 0x103   :  { %774 = vmatprep.subr.mxu0 %v4180_v15 }
 0x104   :  { %775 = vmatpush1.msra.mxu0 %v4185_v16 }
 0x105   :  { %v3837_v41 = vpop.eup %3836  ;;  %776 = vmatprep.subr.mxu0 %v4189_v17 }
 0x106   :  { %v251_v42 = vmul.f32 %v3837_v41, %v3835_v40  ;;  %v3839_v44 = vpop.eup %3838  ;;  %v250_v47 = vmul.f32 %v3837_v41, %v248_v45  ;;  %777 = vmatpush1.msra.mxu0 %v4193_v18 }
 0x107   :  { %v242_v46 = vadd.f32 1.0, %v3839_v44  ;;  %778 = vmatprep.subr.mxu0 %v4197_v19 }
 0x108   :  { %253 = vrot.lane.b32.xlu0 %v251_v42, %s4094_s28  ;;  %779 = vmatpush1.msra.mxu0 %v4201_v20 }
 0x109   :  { %3840 = vrcp.f32 %v242_v46  ;;  %3738 = vmatprep.subr.msk.mxu0 %vm142_vm1, %v4166_v10 }
 0x116   :  { %v3841_v51 = vpop.eup %3840 }
 0x17a   :  { %v254_v48 = vpop.permute.xlu0 %253 }
 0x17b   :  { %v256_v49 = vadd.f32 %v254_v48, %v250_v47  ;;  %v672_v47 = vld [vmem:[%s4823_s3] sm:$0x3] }
 0x17c   :  { %v677_v48 = vrot.slane %v672_v47, %v4230_v24 }
 0x17d   :  { %3842 = vtanh.f32 %v256_v49 }
 0x18a   :  { %v3843_v52 = vpop.eup %3842 }
 0x18b   :  { %v258_v53 = vmul.f32 %v3843_v52, %v3841_v51 }
 0x18d   :  { %266 = vrot.lane.b32.xlu1 %v258_v53, %s4094_s28 }
 0x191   :  { %260 = vrot.lane.b32.xlu1 %v256_v49, %s4094_s28 }
 0x1b9   :  { %v667_v49 = vpop.f32.mrf.mxu0 }
 0x1ff   :  { %v267_v54 = vpop.permute.xlu1 %266 }
 0x200   :  { %269 = vst.msk [vmem:[#allocation2] sm:$0x3] %vm39_vm0, %v267_v54  ;;  %270 = vst.msk [vmem:[#allocation7] sm:$0x3] %vm39_vm0, %v267_v54 }
 0x203   :  { %v261_v55 = vpop.permute.xlu1 %260 }
 0x204   :  { %264 = vst.msk [vmem:[#allocation3] sm:$0x3] %vm39_vm0, %v261_v55  ;;  %v669_v55 = vpop.f32.mrf.mxu0 }
 0x207   :  { %v274_v56 = vld [vmem:[#allocation2] sm:$0x3] }
 0x208   :  { %3716 = vmatmul.mubr.msk.f32.vlgmr.msra.gmra.mxu1 %vm61_vm3, %v274_v56 }
 0x209   :  { %538 = vmatpush1.msra.mxu1 %v4140_v2  ;;  %585 = vmatprep.mubr.f32.mxu1 %v4093_v0 }
 0x20a   :  { %539 = vmatprep.subr.mxu1 %v4142_v3 }
 0x20b   :  { %v472_v57 = vld [vmem:[#allocation3] sm:$0x3]  ;;  %540 = vmatpush1.msra.mxu1 %v4145_v4 }
 0x20c   :  { %474 = vrot.lane.b32.xlu0 %v472_v57, %s4094_s28  ;;  %541 = vmatprep.subr.mxu1 %v4148_v5  ;;  %v681_v57 = vrot.slane %v672_v47, %v4236_v32 }
 0x20d   :  { %542 = vmatpush1.msra.mxu1 %v4151_v6 }
 0x20e   :  { %543 = vmatprep.subr.mxu1 %v4154_v7 }
 0x20f   :  { %544 = vmatpush1.msra.mxu1 %v4162_v9 }
 0x210   :  { %545 = vmatprep.subr.mxu1 %v4169_v11 }
 0x211   :  { %546 = vmatpush1.msra.mxu1 %v4175_v13 }
 0x212   :  { %547 = vmatprep.subr.mxu1 %v4180_v15 }
 0x213   :  { %548 = vmatpush1.msra.mxu1 %v4185_v16 }
 0x214   :  { %549 = vmatprep.subr.mxu1 %v4189_v17 }
 0x215   :  { %550 = vmatpush1.msra.mxu1 %v4193_v18 }
 0x216   :  { %551 = vmatprep.subr.mxu1 %v4197_v19 }
 0x217   :  { %552 = vmatpush1.msra.mxu1 %v4201_v20 }
 0x218   :  { %3731 = vmatprep.subr.msk.mxu1 %vm142_vm1, %v4166_v10 }
 0x27e   :  { %v475_v34 = vpop.permute.xlu0 %474 }
 0x2c8   :  { %v360_v61 = vpop.f32.mrf.mxu1 }
 0x2c9   :  { %v441_v62 = vadd.f32 %v440_v60, %v360_v61 }
 0x2ca   :  { %v362_v14 = vpop.f32.mrf.mxu1 }
 0x2cb   :  { %v457_v63 = vadd.f32 %v450_v59, %v441_v62  ;;  %v443_v22 = vadd.f32 %v442_v21, %v362_v14 }
 0x2cd   :  { %v3720_v12 = vmul.f32 -1.442695, %v457_v63  ;;  %v458_v25 = vadd.f32 %v454_v23, %v443_v22 }
 0x2cf   :  { %3844 = vpow2.f32 %v3720_v12  ;;  %v3721_v31 = vmul.f32 -1.442695, %v458_v25 }
 0x2d0   :  { %3846 = vtanh.f32 %v458_v25 }
 0x2dc   :  { %v3845_v26 = vpop.eup %3844 }
 0x2dd   :  { %v462_v27 = vadd.f32 1.0, %v3845_v26  ;;  %v3847_v28 = vpop.eup %3846 }
 0x2df   :  { %3848 = vrcp.f32 %v462_v27  ;;  %v3729_v27 = vld [vmem:[%s4820_s0 + $0x6] sm:$0x3] }
 0x2e0   :  { %3850 = vpow2.f32 %v3721_v31 }
 0x2ec   :  { %v3849_v29 = vpop.eup %3848 }
 0x2ed   :  { %v478_v30 = vmul.f32 %v3849_v29, %v3847_v28  ;;  %v3851_v33 = vpop.eup %3850  ;;  %v477_v36 = vmul.f32 %v3849_v29, %v475_v34 }
 0x2ee   :  { %v469_v35 = vadd.f32 1.0, %v3851_v33 }
 0x2ef   :  { %480 = vrot.lane.b32.xlu1 %v478_v30, %s4094_s28 }
 0x2f0   :  { %3852 = vrcp.f32 %v469_v35 }
 0x2fd   :  { %v3853_v40 = vpop.eup %3852 }
 0x361   :  { %v481_v37 = vpop.permute.xlu1 %480 }
 0x362   :  { %v483_v38 = vadd.f32 %v481_v37, %v477_v36  ;;  %v899_v36 = vld [vmem:[%s4823_s3] sm:$0x3] }
 0x363   :  { %v904_v37 = vrot.slane %v899_v36, %v4230_v24 }
 0x364   :  { %3854 = vtanh.f32 %v483_v38  ;;  %487 = vrot.lane.b32.xlu1 %v483_v38, %s4094_s28 }
 0x371   :  { %v3855_v41 = vpop.eup %3854 }
 0x372   :  { %v485_v42 = vmul.f32 %v3855_v41, %v3853_v40 }
 0x374   :  { %492 = vrot.lane.b32.xlu0 %v485_v42, %s4094_s28 }
 0x3d6   :  { %v488_v43 = vpop.permute.xlu1 %487 }
 0x3d7   :  { %490 = vst.msk [vmem:[#allocation3] sm:$0x3] %vm39_vm0, %v488_v43 }
 0x3de   :  { %v699_v44 = vld [vmem:[#allocation3] sm:$0x3] }
 0x3df   :  { %701 = vrot.lane.b32.xlu0 %v699_v44, %s4094_s28 }
 0x3e6   :  { %v493_v45 = vpop.permute.xlu0 %492 }
 0x3e7   :  { %495 = vst.msk [vmem:[#allocation2] sm:$0x3] %vm39_vm0, %v493_v45  ;;  %497 = vst.msk [vmem:[#allocation7 + $0x2] sm:$0x3] %vm39_vm0, %v493_v45 }
 0x3ee   :  { %v501_v46 = vld [vmem:[#allocation2] sm:$0x3] }
 0x3ef   :  { %3723 = vmatmul.mubr.msk.f32.vlgmr.msra.gmra.mxu1 %vm61_vm3, %v501_v46  ;;  %v908_v46 = vrot.slane %v899_v36, %v4236_v32 }
 0x3f0   :  { %3732 = vmatpush1.msk.msra.mxu1 %vm142_vm1, %v4159_v8  ;;  %892 = vmatprep.mubr.f32.mxu1 %v4093_v0 }
 0x3f1   :  { %991 = vmatprep.subr.mxu1 %v4138_v1 }
 0x3f3   :  { %3733 = vmatmul.mubr.msk.f32.vlgmr.msra.gmra.mxu1 %vm138_vm2, %v3729_v27 }
 0x3f4   :  { %992 = vmatpush1.msra.mxu1 %v4140_v2  ;;  %1039 = vmatprep.mubr.f32.mxu1 %v4093_v0 }
 0x3f5   :  { %993 = vmatprep.subr.mxu1 %v4142_v3 }
 0x3f6   :  { %994 = vmatpush1.msra.mxu1 %v4145_v4 }
 0x3f7   :  { %995 = vmatprep.subr.mxu1 %v4148_v5 }
 0x3f8   :  { %996 = vmatpush1.msra.mxu1 %v4151_v6 }
 0x3f9   :  { %997 = vmatprep.subr.mxu1 %v4154_v7 }
 0x3fa   :  { %998 = vmatpush1.msra.mxu1 %v4162_v9 }
 0x3fb   :  { %999 = vmatprep.subr.mxu1 %v4169_v11 }
 0x3fc   :  { %1000 = vmatpush1.msra.mxu1 %v4175_v13 }
 0x3fd   :  { %1001 = vmatprep.subr.mxu1 %v4180_v15 }
 0x3fe   :  { %1002 = vmatpush1.msra.mxu1 %v4185_v16 }
 0x3ff   :  { %1003 = vmatprep.subr.mxu1 %v4189_v17 }
 0x400   :  { %1004 = vmatpush1.msra.mxu1 %v4193_v18 }
 0x401   :  { %1005 = vmatprep.subr.mxu1 %v4197_v19 }
 0x402   :  { %1006 = vmatpush1.msra.mxu1 %v4201_v20 }
 0x403   :  { %3745 = vmatprep.subr.msk.mxu1 %vm142_vm1, %v4166_v10 }
 0x451   :  { %v702_v21 = vpop.permute.xlu0 %701 }
 0x4af   :  { %v587_v50 = vpop.f32.mrf.mxu1 }
 0x4b0   :  { %v668_v51 = vadd.f32 %v667_v49, %v587_v50 }
 0x4b1   :  { %v589_v54 = vpop.f32.mrf.mxu1 }
 0x4b2   :  { %v684_v52 = vadd.f32 %v677_v48, %v668_v51  ;;  %v670_v56 = vadd.f32 %v669_v55, %v589_v54 }
 0x4b3   :  { %v894_v38 = vpop.f32.mrf.mxu1 }
 0x4b4   :  { %v3727_v53 = vmul.f32 -1.442695, %v684_v52  ;;  %v685_v58 = vadd.f32 %v681_v57, %v670_v56 }
 0x4b5   :  { %v896_v44 = vpop.f32.mrf.mxu1 }
 0x4b6   :  { %3856 = vpow2.f32 %v3727_v53  ;;  %v3728_v12 = vmul.f32 -1.442695, %v685_v58 }
 0x4b7   :  { %3858 = vtanh.f32 %v685_v58 }
 0x4c3   :  { %v3857_v59 = vpop.eup %3856 }
 0x4c4   :  { %v689_v60 = vadd.f32 1.0, %v3857_v59  ;;  %v3859_v61 = vpop.eup %3858 }
 0x4c6   :  { %3860 = vrcp.f32 %v689_v60  ;;  %v3736_v60 = vld [vmem:[%s4820_s0 + $0x8] sm:$0x3] }
 0x4c7   :  { %3862 = vpow2.f32 %v3728_v12 }
 0x4d3   :  { %v3861_v62 = vpop.eup %3860 }
 0x4d4   :  { %v705_v63 = vmul.f32 %v3861_v62, %v3859_v61  ;;  %v3863_v14 = vpop.eup %3862  ;;  %v704_v23 = vmul.f32 %v3861_v62, %v702_v21 }
 0x4d5   :  { %v696_v22 = vadd.f32 1.0, %v3863_v14 }
 0x4d6   :  { %707 = vrot.lane.b32.xlu1 %v705_v63, %s4094_s28 }
 0x4d7   :  { %3864 = vrcp.f32 %v696_v22 }
 0x4e4   :  { %v3865_v28 = vpop.eup %3864 }
 0x548   :  { %v708_v25 = vpop.permute.xlu1 %707 }
 0x549   :  { %v710_v26 = vadd.f32 %v708_v25, %v704_v23 }
 0x54b   :  { %3866 = vtanh.f32 %v710_v26  ;;  %714 = vrot.lane.b32.xlu1 %v710_v26, %s4094_s28 }
 0x558   :  { %v3867_v29 = vpop.eup %3866 }
 0x559   :  { %v712_v30 = vmul.f32 %v3867_v29, %v3865_v28 }
 0x55b   :  { %719 = vrot.lane.b32.xlu0 %v712_v30, %s4094_s28 }
 0x5bd   :  { %v715_v31 = vpop.permute.xlu1 %714 }
 0x5be   :  { %717 = vst.msk [vmem:[#allocation3] sm:$0x3] %vm39_vm0, %v715_v31 }
 0x5c5   :  { %v926_v33 = vld [vmem:[#allocation3] sm:$0x3] }
 0x5c6   :  { %928 = vrot.lane.b32.xlu0 %v926_v33, %s4094_s28 }
 0x5cd   :  { %v720_v34 = vpop.permute.xlu0 %719 }
 0x5ce   :  { %722 = vst.msk [vmem:[#allocation2] sm:$0x3] %vm39_vm0, %v720_v34  ;;  %724 = vst.msk [vmem:[#allocation7 + $0x4] sm:$0x3] %vm39_vm0, %v720_v34 }
 0x5d5   :  { %v728_v35 = vld [vmem:[#allocation2] sm:$0x3] }
 0x5d6   :  { %3730 = vmatmul.mubr.msk.f32.vlgmr.msra.gmra.mxu0 %vm61_vm3, %v728_v35 }
 0x5d7   :  { %3739 = vmatpush1.msk.msra.mxu0 %vm142_vm1, %v4159_v8  ;;  %1119 = vmatprep.mubr.f32.mxu0 %v4093_v0 }
 0x5d8   :  { %1218 = vmatprep.subr.mxu0 %v4138_v1 }
 0x5da   :  { %3740 = vmatmul.mubr.msk.f32.vlgmr.msra.gmra.mxu0 %vm138_vm2, %v3736_v60 }
 0x5db   :  { %1219 = vmatpush1.msra.mxu0 %v4140_v2  ;;  %1266 = vmatprep.mubr.f32.mxu0 %v4093_v0 }
 0x5dc   :  { %1220 = vmatprep.subr.mxu0 %v4142_v3 }
 0x5dd   :  { %1221 = vmatpush1.msra.mxu0 %v4145_v4 }
 0x5de   :  { %1222 = vmatprep.subr.mxu0 %v4148_v5 }
 0x5df   :  { %1223 = vmatpush1.msra.mxu0 %v4151_v6 }
 0x5e0   :  { %1224 = vmatprep.subr.mxu0 %v4154_v7 }
 0x5e1   :  { %1225 = vmatpush1.msra.mxu0 %v4162_v9 }
 0x5e2   :  { %1226 = vmatprep.subr.mxu0 %v4169_v11 }
 0x5e3   :  { %1227 = vmatpush1.msra.mxu0 %v4175_v13 }
 0x5e4   :  { %1228 = vmatprep.subr.mxu0 %v4180_v15 }
 0x5e5   :  { %1229 = vmatpush1.msra.mxu0 %v4185_v16 }
 0x5e6   :  { %1230 = vmatprep.subr.mxu0 %v4189_v17 }
 0x5e7   :  { %1231 = vmatpush1.msra.mxu0 %v4193_v18 }
 0x5e8   :  { %1232 = vmatprep.subr.mxu0 %v4197_v19 }
 0x5e9   :  { %1233 = vmatpush1.msra.mxu0 %v4201_v20 }
 0x5ea   :  { %3752 = vmatprep.subr.msk.mxu0 %vm142_vm1, %v4166_v10  ;;  %v1126_v10 = vld [vmem:[%s4823_s3] sm:$0x3] }
 0x5eb   :  { %v1131_v23 = vrot.slane %v1126_v10, %v4230_v24  ;;  %v1135_v34 = vrot.slane %v1126_v10, %v4236_v32 }
 0x638   :  { %v929_v55 = vpop.permute.xlu0 %928 }
 0x696   :  { %v814_v39 = vpop.f32.mrf.mxu0 }
 0x697   :  { %v895_v40 = vadd.f32 %v894_v38, %v814_v39 }
 0x698   :  { %v816_v43 = vpop.f32.mrf.mxu0 }
 0x699   :  { %v911_v41 = vadd.f32 %v904_v37, %v895_v40  ;;  %v897_v45 = vadd.f32 %v896_v44, %v816_v43 }
 0x69a   :  { %v1121_v25 = vpop.f32.mrf.mxu0 }
 0x69b   :  { %v3734_v42 = vmul.f32 -1.442695, %v911_v41  ;;  %v912_v47 = vadd.f32 %v908_v46, %v897_v45 }
 0x69c   :  { %v1123_v31 = vpop.f32.mrf.mxu0 }
 0x69d   :  { %3868 = vpow2.f32 %v3734_v42  ;;  %v3735_v53 = vmul.f32 -1.442695, %v912_v47 }
 0x69e   :  { %3870 = vtanh.f32 %v912_v47  ;;  %v3743_v47 = vld [vmem:[%s4820_s0 + $0xa] sm:$0x3] }
 0x6aa   :  { %v3869_v48 = vpop.eup %3868 }
 0x6ab   :  { %v916_v49 = vadd.f32 1.0, %v3869_v48  ;;  %v3871_v50 = vpop.eup %3870 }
 0x6ad   :  { %3872 = vrcp.f32 %v916_v49 }
 0x6ae   :  { %3874 = vpow2.f32 %v3735_v53 }
 0x6ba   :  { %v3873_v51 = vpop.eup %3872 }
 0x6bb   :  { %v932_v52 = vmul.f32 %v3873_v51, %v3871_v50  ;;  %v3875_v54 = vpop.eup %3874  ;;  %v931_v57 = vmul.f32 %v3873_v51, %v929_v55 }
 0x6bc   :  { %v923_v56 = vadd.f32 1.0, %v3875_v54 }
 0x6bd   :  { %934 = vrot.lane.b32.xlu1 %v932_v52, %s4094_s28 }
 0x6be   :  { %3876 = vrcp.f32 %v923_v56 }
 0x6cb   :  { %v3877_v61 = vpop.eup %3876 }
 0x72f   :  { %v935_v58 = vpop.permute.xlu1 %934 }
 0x730   :  { %v937_v59 = vadd.f32 %v935_v58, %v931_v57 }
 0x732   :  { %3878 = vtanh.f32 %v937_v59  ;;  %941 = vrot.lane.b32.xlu1 %v937_v59, %s4094_s28 }
 0x73f   :  { %v3879_v62 = vpop.eup %3878 }
 0x740   :  { %v939_v63 = vmul.f32 %v3879_v62, %v3877_v61 }
 0x742   :  { %946 = vrot.lane.b32.xlu0 %v939_v63, %s4094_s28  ;;  %v3750_v63 = vld [vmem:[%s4820_s0 + $0xc] sm:$0x3] }
 0x7a4   :  { %v942_v12 = vpop.permute.xlu1 %941 }
 0x7a5   :  { %944 = vst.msk [vmem:[#allocation3] sm:$0x3] %vm39_vm0, %v942_v12 }
 0x7ac   :  { %v1153_v14 = vld [vmem:[#allocation3] sm:$0x3] }
 0x7ad   :  { %1155 = vrot.lane.b32.xlu0 %v1153_v14, %s4094_s28 }
 0x7b4   :  { %v947_v21 = vpop.permute.xlu0 %946 }
 0x7b5   :  { %949 = vst.msk [vmem:[#allocation2] sm:$0x3] %vm39_vm0, %v947_v21  ;;  %951 = vst.msk [vmem:[#allocation7 + $0x6] sm:$0x3] %vm39_vm0, %v947_v21 }
 0x7bc   :  { %v955_v22 = vld [vmem:[#allocation2] sm:$0x3] }
 0x7bd   :  { %3737 = vmatmul.mubr.msk.f32.vlgmr.msra.gmra.mxu1 %vm61_vm3, %v955_v22 }
 0x7be   :  { %3746 = vmatpush1.msk.msra.mxu1 %vm142_vm1, %v4159_v8  ;;  %1346 = vmatprep.mubr.f32.mxu1 %v4093_v0 }
 0x7bf   :  { %1445 = vmatprep.subr.mxu1 %v4138_v1 }
 0x7c1   :  { %3747 = vmatmul.mubr.msk.f32.vlgmr.msra.gmra.mxu1 %vm138_vm2, %v3743_v47 }
 0x7c2   :  { %1446 = vmatpush1.msra.mxu1 %v4140_v2  ;;  %1493 = vmatprep.mubr.f32.mxu1 %v4093_v0 }
 0x7c3   :  { %1447 = vmatprep.subr.mxu1 %v4142_v3 }
 0x7c4   :  { %1448 = vmatpush1.msra.mxu1 %v4145_v4 }
 0x7c5   :  { %1449 = vmatprep.subr.mxu1 %v4148_v5 }
 0x7c6   :  { %1450 = vmatpush1.msra.mxu1 %v4151_v6 }
 0x7c7   :  { %1451 = vmatprep.subr.mxu1 %v4154_v7  ;;  %v1353_v7 = vld [vmem:[%s4823_s3] sm:$0x3] }
 0x7c8   :  { %1452 = vmatpush1.msra.mxu1 %v4162_v9  ;;  %v1358_v9 = vrot.slane %v1353_v7, %v4230_v24  ;;  %v1362_v50 = vrot.slane %v1353_v7, %v4236_v32 }
 0x7c9   :  { %1453 = vmatprep.subr.mxu1 %v4169_v11 }
 0x7ca   :  { %1454 = vmatpush1.msra.mxu1 %v4175_v13 }
 0x7cb   :  { %1455 = vmatprep.subr.mxu1 %v4180_v15 }
 0x7cc   :  { %1456 = vmatpush1.msra.mxu1 %v4185_v16 }
 0x7cd   :  { %1457 = vmatprep.subr.mxu1 %v4189_v17 }
 0x7ce   :  { %1458 = vmatpush1.msra.mxu1 %v4193_v18 }
 0x7cf   :  { %1459 = vmatprep.subr.mxu1 %v4197_v19 }
 0x7d0   :  { %1460 = vmatpush1.msra.mxu1 %v4201_v20 }
 0x81f   :  { %v1156_v42 = vpop.permute.xlu0 %1155 }
 0x87d   :  { %v1041_v26 = vpop.f32.mrf.mxu1 }
 0x87e   :  { %v1122_v27 = vadd.f32 %v1121_v25, %v1041_v26  ;;  %v1580_v26 = vld [vmem:[%s4823_s3] sm:$0x3] }
 0x87f   :  { %v1043_v30 = vpop.f32.mrf.mxu1 }
 0x880   :  { %v1138_v28 = vadd.f32 %v1131_v23, %v1122_v27  ;;  %v1124_v33 = vadd.f32 %v1123_v31, %v1043_v30  ;;  %v1585_v27 = vrot.slane %v1580_v26, %v4230_v24 }
 0x881   :  { %v1348_v11 = vpop.f32.mrf.mxu1 }
 0x882   :  { %v3741_v29 = vmul.f32 -1.442695, %v1138_v28  ;;  %v1139_v35 = vadd.f32 %v1135_v34, %v1124_v33 }
 0x883   :  { %v1350_v19 = vpop.f32.mrf.mxu1 }
 0x884   :  { %3880 = vpow2.f32 %v3741_v29  ;;  %v3742_v40 = vmul.f32 -1.442695, %v1139_v35 }
 0x885   :  { %3882 = vtanh.f32 %v1139_v35 }
 0x891   :  { %v3881_v36 = vpop.eup %3880 }
 0x892   :  { %v1143_v1 = vadd.f32 1.0, %v3881_v36  ;;  %v3883_v37 = vpop.eup %3882 }
 0x894   :  { %3884 = vrcp.f32 %v1143_v1  ;;  %v1589_v1 = vrot.slane %v1580_v26, %v4236_v32 }
 0x895   :  { %3886 = vpow2.f32 %v3742_v40 }
 0x8a1   :  { %v3885_v38 = vpop.eup %3884 }
 0x8a2   :  { %v1159_v39 = vmul.f32 %v3885_v38, %v3883_v37  ;;  %v3887_v41 = vpop.eup %3886  ;;  %v1158_v44 = vmul.f32 %v3885_v38, %v1156_v42 }
 0x8a3   :  { %v1150_v43 = vadd.f32 1.0, %v3887_v41 }
 0x8a4   :  { %1161 = vrot.lane.b32.xlu1 %v1159_v39, %s4094_s28 }
 0x8a5   :  { %3888 = vrcp.f32 %v1150_v43 }
 0x8b2   :  { %v3889_v48 = vpop.eup %3888 }
 0x916   :  { %v1162_v45 = vpop.permute.xlu1 %1161 }
 0x917   :  { %v1164_v46 = vadd.f32 %v1162_v45, %v1158_v44  ;;  %v4451_v44 = vld [vmem:[#allocation4 + $0x78] sm:$0xff] }
 0x919   :  { %3890 = vtanh.f32 %v1164_v46  ;;  %1168 = vrot.lane.b32.xlu1 %v1164_v46, %s4094_s28 }
 0x926   :  { %v3891_v49 = vpop.eup %3890 }
 0x927   :  { %v1166_v2 = vmul.f32 %v3891_v49, %v3889_v48  ;;  %v4454_v48 = vld [vmem:[#allocation4 + $0x70] sm:$0xff]  ;;  %v4456_v49 = vld [vmem:[#allocation4 + $0x68] sm:$0xff] }
 0x929   :  { %1173 = vrot.lane.b32.xlu0 %v1166_v2, %s4094_s28  ;;  %v4458_v2 = vld [vmem:[#allocation4 + $0x60] sm:$0xff] }
 0x98b   :  { %v1169_v3 = vpop.permute.xlu1 %1168 }
 0x98c   :  { %1171 = vst.msk [vmem:[#allocation3] sm:$0x3] %vm39_vm0, %v1169_v3 }
 0x993   :  { %v1380_v4 = vld [vmem:[#allocation3] sm:$0x3] }
 0x994   :  { %1382 = vrot.lane.b32.xlu0 %v1380_v4, %s4094_s28  ;;  %v4461_v4 = vld [vmem:[#allocation4 + $0x58] sm:$0xff] }
 0x99b   :  { %v1174_v5 = vpop.permute.xlu0 %1173 }
 0x99c   :  { %1176 = vst.msk [vmem:[#allocation2] sm:$0x3] %vm39_vm0, %v1174_v5  ;;  %1178 = vst.msk [vmem:[#allocation7 + $0x8] sm:$0x3] %vm39_vm0, %v1174_v5 }
 0x9a3   :  { %v1182_v6 = vld [vmem:[#allocation2] sm:$0x3] }
 0x9a4   :  { %3744 = vmatmul.mubr.msk.f32.vlgmr.msra.gmra.mxu0 %vm61_vm3, %v1182_v6  ;;  %v4464_v6 = vld [vmem:[#allocation4 + $0x50] sm:$0xff] }
 0x9a5   :  { %3753 = vmatpush1.msk.msra.mxu0 %vm142_vm1, %v4159_v8  ;;  %1573 = vmatprep.mubr.f32.mxu0 %v4093_v0 }
 0x9a6   :  { %1672 = vmatprep.subr.mxu0 %v4451_v44 }
 0x9a8   :  { %3754 = vmatmul.mubr.msk.f32.vlgmr.msra.gmra.mxu0 %vm138_vm2, %v3750_v63 }
 0x9a9   :  { %1720 = vmatprep.mubr.f32.mxu0 %v4093_v0  ;;  %1673 = vmatpush1.msra.mxu0 %v4454_v48 }
 0x9aa   :  { %1674 = vmatprep.subr.mxu0 %v4456_v49 }
 0x9ab   :  { %1675 = vmatpush1.msra.mxu0 %v4458_v2 }
 0x9ac   :  { %1676 = vmatprep.subr.mxu0 %v4461_v4 }
 0x9ad   :  { %1677 = vmatpush1.msra.mxu0 %v4464_v6 }
 0xa06   :  { %v1383_v58 = vpop.permute.xlu0 %1382 }
 0xa64   :  { %v1268_v13 = vpop.f32.mrf.mxu0 }
 0xa65   :  { %v1349_v15 = vadd.f32 %v1348_v11, %v1268_v13  ;;  %v4470_v11 = vld [vmem:[#allocation4 + $0x40] sm:$0xff]  ;;  %v4476_v13 = vld [vmem:[#allocation4 + $0x38] sm:$0xff] }
 0xa66   :  { %v1270_v18 = vpop.f32.mrf.mxu0 }
 0xa67   :  { %v1365_v16 = vadd.f32 %v1358_v9, %v1349_v15  ;;  %v1351_v20 = vadd.f32 %v1350_v19, %v1270_v18  ;;  %v4467_v9 = vld [vmem:[#allocation4 + $0x48] sm:$0xff]  ;;  %v4478_v15 = vld [vmem:[#allocation4 + $0x30] sm:$0xff]  ;;  %v4488_v18 = vld [vmem:[%s4821_s1] sm:$0xff] }
 0xa68   :  { %v1575_v28 = vpop.f32.mrf.mxu0  ;;  %1678 = vmatprep.subr.mxu0 %v4467_v9  ;;  %v4493_v19 = vcombine.high %v4488_v18, %v4488_v18 }
 0xa69   :  { %v3748_v17 = vmul.f32 -1.442695, %v1365_v16  ;;  %v1366_v8 = vadd.f32 %v1362_v50, %v1351_v20  ;;  %1679 = vmatpush1.msra.mxu0 %v4470_v11  ;;  %v4480_v16 = vld [vmem:[#allocation4 + $0x28] sm:$0xff]  ;;  %v4495_v20 = vld [vmem:[#allocation4 + $0x18] sm:$0xff]  ;;  %v4498_v50 = vld [vmem:[#allocation4 + $0x10] sm:$0xff] }
 0xa6a   :  { %v1577_v35 = vpop.f32.mrf.mxu0  ;;  %1680 = vmatprep.subr.mxu0 %v4476_v13  ;;  %3759 = vmatprep.subr.msk.mxu1 %vm142_vm1, %v4493_v19 }
 0xa6b   :  { %3892 = vpow2.f32 %v3748_v17  ;;  %v3749_v56 = vmul.f32 -1.442695, %v1366_v8  ;;  %v4483_v17 = vld [vmem:[#allocation4 + $0x20] sm:$0xff]  ;;  %1681 = vmatpush1.msra.mxu0 %v4478_v15 }
 0xa6c   :  { %3894 = vtanh.f32 %v1366_v8  ;;  %1682 = vmatprep.subr.mxu0 %v4480_v16  ;;  %v3757_v8 = vld [vmem:[%s4820_s0 + $0xe] sm:$0x3] }
 0xa6d   :  { %1683 = vmatpush1.msra.mxu0 %v4483_v17 }
 0xa6e   :  { %1684 = vmatprep.subr.mxu0 %v4495_v20 }
 0xa6f   :  { %1685 = vmatpush1.msra.mxu0 %v4498_v50 }
 0xa78   :  { %v3893_v51 = vpop.eup %3892 }
 0xa79   :  { %v1370_v52 = vadd.f32 1.0, %v3893_v51  ;;  %v3895_v53 = vpop.eup %3894  ;;  %v4506_v51 = vld [vmem:[#allocation4 + $0x8] sm:$0xff] }
 0xa7a   :  { %1686 = vmatprep.subr.mxu0 %v4506_v51 }
 0xa7b   :  { %3896 = vrcp.f32 %v1370_v52  ;;  %v4511_v52 = vld [vmem:[#allocation4] sm:$0xff] }
 0xa7c   :  { %3898 = vpow2.f32 %v3749_v56  ;;  %1687 = vmatpush1.msra.mxu0 %v4511_v52 }
 0xa7d   :  { %3766 = vmatprep.subr.msk.mxu0 %vm142_vm1, %v4493_v19 }
 0xa88   :  { %v3897_v54 = vpop.eup %3896 }
 0xa89   :  { %v1386_v55 = vmul.f32 %v3897_v54, %v3895_v53  ;;  %v3899_v57 = vpop.eup %3898  ;;  %v1385_v60 = vmul.f32 %v3897_v54, %v1383_v58 }
 0xa8a   :  { %v1377_v59 = vadd.f32 1.0, %v3899_v57 }
 0xa8b   :  { %1388 = vrot.lane.b32.xlu1 %v1386_v55, %s4094_s28 }
 0xa8c   :  { %3900 = vrcp.f32 %v1377_v59 }
 0xa99   :  { %v3901_v12 = vpop.eup %3900 }
 0xafd   :  { %v1389_v61 = vpop.permute.xlu1 %1388 }
 0xafe   :  { %v1391_v62 = vadd.f32 %v1389_v61, %v1385_v60  ;;  %v1807_v60 = vld [vmem:[%s4823_s3] sm:$0x3] }
 0xaff   :  { %v1812_v61 = vrot.slane %v1807_v60, %v4230_v24 }
 0xb00   :  { %3902 = vtanh.f32 %v1391_v62  ;;  %1395 = vrot.lane.b32.xlu1 %v1391_v62, %s4094_s28 }
 0xb0d   :  { %v3903_v14 = vpop.eup %3902 }
 0xb0e   :  { %v1393_v21 = vmul.f32 %v3903_v14, %v3901_v12 }
 0xb10   :  { %1400 = vrot.lane.b32.xlu0 %v1393_v21, %s4094_s28 }
 0xb72   :  { %v1396_v22 = vpop.permute.xlu1 %1395 }
 0xb73   :  { %1398 = vst.msk [vmem:[#allocation3] sm:$0x3] %vm39_vm0, %v1396_v22 }
 0xb7a   :  { %v1607_v10 = vld [vmem:[#allocation3] sm:$0x3] }
 0xb7b   :  { %1609 = vrot.lane.b32.xlu0 %v1607_v10, %s4094_s28 }
 0xb82   :  { %v1401_v23 = vpop.permute.xlu0 %1400 }
 0xb83   :  { %1403 = vst.msk [vmem:[#allocation2] sm:$0x3] %vm39_vm0, %v1401_v23  ;;  %1405 = vst.msk [vmem:[#allocation7 + $0xa] sm:$0x3] %vm39_vm0, %v1401_v23 }
 0xb8a   :  { %v1409_v25 = vld [vmem:[#allocation2] sm:$0x3] }
 0xb8b   :  { %3751 = vmatmul.mubr.msk.f32.vlgmr.msra.gmra.mxu1 %vm61_vm3, %v1409_v25  ;;  %v1816_v25 = vrot.slane %v1807_v60, %v4236_v32 }
 0xb8c   :  { %1800 = vmatprep.mubr.f32.mxu1 %v4093_v0  ;;  %3760 = vmatpush1.msk.msra.mxu1 %vm142_vm1, %v4488_v18 }
 0xb8d   :  { %1899 = vmatprep.subr.mxu1 %v4451_v44 }
 0xb8f   :  { %3761 = vmatmul.mubr.msk.f32.vlgmr.msra.gmra.mxu1 %vm138_vm2, %v3757_v8 }
 0xb90   :  { %1900 = vmatpush1.msra.mxu1 %v4454_v48  ;;  %1947 = vmatprep.mubr.f32.mxu1 %v4093_v0 }
 0xb91   :  { %1901 = vmatprep.subr.mxu1 %v4456_v49 }
 0xb92   :  { %1902 = vmatpush1.msra.mxu1 %v4458_v2 }
 0xb93   :  { %1903 = vmatprep.subr.mxu1 %v4461_v4 }
 0xb94   :  { %1904 = vmatpush1.msra.mxu1 %v4464_v6 }
 0xb95   :  { %1905 = vmatprep.subr.mxu1 %v4467_v9 }
 0xb96   :  { %1906 = vmatpush1.msra.mxu1 %v4470_v11 }
 0xb97   :  { %1907 = vmatprep.subr.mxu1 %v4476_v13 }
 0xb98   :  { %1908 = vmatpush1.msra.mxu1 %v4478_v15 }
 0xb99   :  { %1909 = vmatprep.subr.mxu1 %v4480_v16 }
 0xb9a   :  { %1910 = vmatpush1.msra.mxu1 %v4483_v17 }
 0xb9b   :  { %1911 = vmatprep.subr.mxu1 %v4495_v20 }
 0xb9c   :  { %1912 = vmatpush1.msra.mxu1 %v4498_v50 }
 0xb9d   :  { %1913 = vmatprep.subr.mxu1 %v4506_v51 }
 0xb9e   :  { %1914 = vmatpush1.msra.mxu1 %v4511_v52 }
 0xb9f   :  { %3773 = vmatprep.subr.msk.mxu1 %vm142_vm1, %v4493_v19 }
 0xbed   :  { %v1610_v46 = vpop.permute.xlu0 %1609 }
 0xc4b   :  { %v1495_v29 = vpop.f32.mrf.mxu1 }
 0xc4c   :  { %v1576_v30 = vadd.f32 %v1575_v28, %v1495_v29 }
 0xc4d   :  { %v1497_v34 = vpop.f32.mrf.mxu1 }
 0xc4e   :  { %v1592_v31 = vadd.f32 %v1585_v27, %v1576_v30  ;;  %v1578_v36 = vadd.f32 %v1577_v35, %v1497_v34 }
 0xc4f   :  { %v1802_v62 = vpop.f32.mrf.mxu1 }
 0xc50   :  { %v3755_v33 = vmul.f32 -1.442695, %v1592_v31  ;;  %v1593_v37 = vadd.f32 %v1589_v1, %v1578_v36 }
 0xc51   :  { %v1804_v10 = vpop.f32.mrf.mxu1 }
 0xc52   :  { %3904 = vpow2.f32 %v3755_v33  ;;  %v3756_v43 = vmul.f32 -1.442695, %v1593_v37 }
 0xc53   :  { %3906 = vtanh.f32 %v1593_v37 }
 0xc5f   :  { %v3905_v38 = vpop.eup %3904 }
 0xc60   :  { %v1597_v39 = vadd.f32 1.0, %v3905_v38  ;;  %v3907_v40 = vpop.eup %3906 }
 0xc62   :  { %3908 = vrcp.f32 %v1597_v39  ;;  %v3764_v39 = vld [vmem:[%s4820_s0 + $0x10] sm:$0x3] }
 0xc63   :  { %3910 = vpow2.f32 %v3756_v43 }
 0xc6f   :  { %v3909_v41 = vpop.eup %3908 }
 0xc70   :  { %v1613_v42 = vmul.f32 %v3909_v41, %v3907_v40  ;;  %v3911_v45 = vpop.eup %3910  ;;  %v1612_v3 = vmul.f32 %v3909_v41, %v1610_v46 }
 0xc71   :  { %v1604_v47 = vadd.f32 1.0, %v3911_v45 }
 0xc72   :  { %1615 = vrot.lane.b32.xlu1 %v1613_v42, %s4094_s28 }
 0xc73   :  { %3912 = vrcp.f32 %v1604_v47 }
 0xc80   :  { %v3913_v53 = vpop.eup %3912 }
 0xce4   :  { %v1616_v5 = vpop.permute.xlu1 %1615 }
 0xce5   :  { %v1618_v7 = vadd.f32 %v1616_v5, %v1612_v3  ;;  %v2034_v3 = vld [vmem:[%s4823_s3] sm:$0x3] }
 0xce6   :  { %v2039_v5 = vrot.slane %v2034_v3, %v4230_v24 }
 0xce7   :  { %3914 = vtanh.f32 %v1618_v7  ;;  %1622 = vrot.lane.b32.xlu1 %v1618_v7, %s4094_s28 }
 0xcf4   :  { %v3915_v54 = vpop.eup %3914 }
 0xcf5   :  { %v1620_v55 = vmul.f32 %v3915_v54, %v3913_v53 }
 0xcf7   :  { %1627 = vrot.lane.b32.xlu0 %v1620_v55, %s4094_s28 }
 0xd59   :  { %v1623_v56 = vpop.permute.xlu1 %1622 }
 0xd5a   :  { %1625 = vst.msk [vmem:[#allocation3] sm:$0x3] %vm39_vm0, %v1623_v56 }
 0xd61   :  { %v1834_v57 = vld [vmem:[#allocation3] sm:$0x3] }
 0xd62   :  { %1836 = vrot.lane.b32.xlu0 %v1834_v57, %s4094_s28 }
 0xd69   :  { %v1628_v58 = vpop.permute.xlu0 %1627 }
 0xd6a   :  { %1630 = vst.msk [vmem:[#allocation2] sm:$0x3] %vm39_vm0, %v1628_v58  ;;  %1632 = vst.msk [vmem:[#allocation7 + $0xc] sm:$0x3] %vm39_vm0, %v1628_v58 }
 0xd71   :  { %v1636_v59 = vld [vmem:[#allocation2] sm:$0x3] }
 0xd72   :  { %3758 = vmatmul.mubr.msk.f32.vlgmr.msra.gmra.mxu0 %vm61_vm3, %v1636_v59  ;;  %v2043_v59 = vrot.slane %v2034_v3, %v4236_v32 }
 0xd73   :  { %3767 = vmatpush1.msk.msra.mxu0 %vm142_vm1, %v4488_v18  ;;  %2027 = vmatprep.mubr.f32.mxu0 %v4093_v0 }
 0xd74   :  { %2126 = vmatprep.subr.mxu0 %v4451_v44 }
 0xd76   :  { %3768 = vmatmul.mubr.msk.f32.vlgmr.msra.gmra.mxu0 %vm138_vm2, %v3764_v39 }
 0xd77   :  { %2127 = vmatpush1.msra.mxu0 %v4454_v48  ;;  %2174 = vmatprep.mubr.f32.mxu0 %v4093_v0 }
 0xd78   :  { %2128 = vmatprep.subr.mxu0 %v4456_v49 }
 0xd79   :  { %2129 = vmatpush1.msra.mxu0 %v4458_v2 }
 0xd7a   :  { %2130 = vmatprep.subr.mxu0 %v4461_v4 }
 0xd7b   :  { %2131 = vmatpush1.msra.mxu0 %v4464_v6 }
 0xd7c   :  { %2132 = vmatprep.subr.mxu0 %v4467_v9 }
 0xd7d   :  { %2133 = vmatpush1.msra.mxu0 %v4470_v11 }
 0xd7e   :  { %2134 = vmatprep.subr.mxu0 %v4476_v13 }
 0xd7f   :  { %2135 = vmatpush1.msra.mxu0 %v4478_v15 }
 0xd80   :  { %2136 = vmatprep.subr.mxu0 %v4480_v16 }
 0xd81   :  { %2137 = vmatpush1.msra.mxu0 %v4483_v17 }
 0xd82   :  { %2138 = vmatprep.subr.mxu0 %v4495_v20 }
 0xd83   :  { %2139 = vmatpush1.msra.mxu0 %v4498_v50 }
 0xd84   :  { %2140 = vmatprep.subr.mxu0 %v4506_v51 }
 0xd85   :  { %2141 = vmatpush1.msra.mxu0 %v4511_v52 }
 0xd86   :  { %3780 = vmatprep.subr.msk.mxu0 %vm142_vm1, %v4493_v19 }
 0xdd4   :  { %v1837_v35 = vpop.permute.xlu0 %1836 }
 0xe32   :  { %v1722_v63 = vpop.f32.mrf.mxu0 }
 0xe33   :  { %v1803_v12 = vadd.f32 %v1802_v62, %v1722_v63 }
 0xe34   :  { %v1724_v22 = vpop.f32.mrf.mxu0 }
 0xe35   :  { %v1819_v14 = vadd.f32 %v1812_v61, %v1803_v12  ;;  %v1805_v23 = vadd.f32 %v1804_v10, %v1724_v22 }
 0xe36   :  { %v2029_v7 = vpop.f32.mrf.mxu0 }
 0xe37   :  { %v3762_v21 = vmul.f32 -1.442695, %v1819_v14  ;;  %v1820_v26 = vadd.f32 %v1816_v25, %v1805_v23 }
 0xe38   :  { %v2031_v57 = vpop.f32.mrf.mxu0 }
 0xe39   :  { %3916 = vpow2.f32 %v3762_v21  ;;  %v3763_v33 = vmul.f32 -1.442695, %v1820_v26 }
 0xe3a   :  { %3918 = vtanh.f32 %v1820_v26 }
 0xe46   :  { %v3917_v27 = vpop.eup %3916 }
 0xe47   :  { %v1824_v28 = vadd.f32 1.0, %v3917_v27  ;;  %v3919_v29 = vpop.eup %3918 }
 0xe49   :  { %3920 = vrcp.f32 %v1824_v28  ;;  %v3771_v28 = vld [vmem:[%s4820_s0 + $0x12] sm:$0x3] }
 0xe4a   :  { %3922 = vpow2.f32 %v3763_v33 }
 0xe56   :  { %v3921_v30 = vpop.eup %3920 }
 0xe57   :  { %v1840_v31 = vmul.f32 %v3921_v30, %v3919_v29  ;;  %v3923_v34 = vpop.eup %3922  ;;  %v1839_v1 = vmul.f32 %v3921_v30, %v1837_v35 }
 0xe58   :  { %v1831_v36 = vadd.f32 1.0, %v3923_v34 }
 0xe59   :  { %1842 = vrot.lane.b32.xlu1 %v1840_v31, %s4094_s28 }
 0xe5a   :  { %3924 = vrcp.f32 %v1831_v36 }
 0xe67   :  { %v3925_v40 = vpop.eup %3924 }
 0xecb   :  { %v1843_v37 = vpop.permute.xlu1 %1842 }
 0xecc   :  { %v1845_v38 = vadd.f32 %v1843_v37, %v1839_v1  ;;  %v2261_v1 = vld [vmem:[%s4823_s3] sm:$0x3] }
 0xecd   :  { %v2266_v37 = vrot.slane %v2261_v1, %v4230_v24 }
 0xece   :  { %3926 = vtanh.f32 %v1845_v38  ;;  %1849 = vrot.lane.b32.xlu1 %v1845_v38, %s4094_s28 }
 0xedb   :  { %v3927_v41 = vpop.eup %3926 }
 0xedc   :  { %v1847_v42 = vmul.f32 %v3927_v41, %v3925_v40 }
 0xede   :  { %1854 = vrot.lane.b32.xlu0 %v1847_v42, %s4094_s28 }
 0xf40   :  { %v1850_v43 = vpop.permute.xlu1 %1849 }
 0xf41   :  { %1852 = vst.msk [vmem:[#allocation3] sm:$0x3] %vm39_vm0, %v1850_v43 }
 0xf48   :  { %v2061_v45 = vld [vmem:[#allocation3] sm:$0x3] }
 0xf49   :  { %2063 = vrot.lane.b32.xlu0 %v2061_v45, %s4094_s28 }
 0xf50   :  { %v1855_v46 = vpop.permute.xlu0 %1854 }
 0xf51   :  { %1857 = vst.msk [vmem:[#allocation2] sm:$0x3] %vm39_vm0, %v1855_v46  ;;  %1859 = vst.msk [vmem:[#allocation7 + $0xe] sm:$0x3] %vm39_vm0, %v1855_v46 }
 0xf58   :  { %v1863_v47 = vld [vmem:[#allocation2] sm:$0x3] }
 0xf59   :  { %3765 = vmatmul.mubr.msk.f32.vlgmr.msra.gmra.mxu1 %vm61_vm3, %v1863_v47  ;;  %v2270_v47 = vrot.slane %v2261_v1, %v4236_v32 }
 0xf5a   :  { %3774 = vmatpush1.msk.msra.mxu1 %vm142_vm1, %v4488_v18  ;;  %2254 = vmatprep.mubr.f32.mxu1 %v4093_v0 }
 0xf5b   :  { %2353 = vmatprep.subr.mxu1 %v4451_v44 }
 0xf5d   :  { %3775 = vmatmul.mubr.msk.f32.vlgmr.msra.gmra.mxu1 %vm138_vm2, %v3771_v28 }
 0xf5e   :  { %2354 = vmatpush1.msra.mxu1 %v4454_v48  ;;  %2401 = vmatprep.mubr.f32.mxu1 %v4093_v0 }
 0xf5f   :  { %2355 = vmatprep.subr.mxu1 %v4456_v49 }
 0xf60   :  { %2356 = vmatpush1.msra.mxu1 %v4458_v2 }
 0xf61   :  { %2357 = vmatprep.subr.mxu1 %v4461_v4 }
 0xf62   :  { %2358 = vmatpush1.msra.mxu1 %v4464_v6 }
 0xf63   :  { %2359 = vmatprep.subr.mxu1 %v4467_v9 }
 0xf64   :  { %2360 = vmatpush1.msra.mxu1 %v4470_v11 }
 0xf65   :  { %2361 = vmatprep.subr.mxu1 %v4476_v13 }
 0xf66   :  { %2362 = vmatpush1.msra.mxu1 %v4478_v15 }
 0xf67   :  { %2363 = vmatprep.subr.mxu1 %v4480_v16 }
 0xf68   :  { %2364 = vmatpush1.msra.mxu1 %v4483_v17 }
 0xf69   :  { %2365 = vmatprep.subr.mxu1 %v4495_v20 }
 0xf6a   :  { %2366 = vmatpush1.msra.mxu1 %v4498_v50 }
 0xf6b   :  { %2367 = vmatprep.subr.mxu1 %v4506_v51 }
 0xf6c   :  { %2368 = vmatpush1.msra.mxu1 %v4511_v52 }
 0xf6d   :  { %3787 = vmatprep.subr.msk.mxu1 %vm142_vm1, %v4493_v19 }
 0xfbb   :  { %v2064_v10 = vpop.permute.xlu0 %2063 }
0x1019   :  { %v1949_v8 = vpop.f32.mrf.mxu1 }
0x101a   :  { %v2030_v53 = vadd.f32 %v2029_v7, %v1949_v8 }
0x101b   :  { %v1951_v56 = vpop.f32.mrf.mxu1 }
0x101c   :  { %v2046_v54 = vadd.f32 %v2039_v5, %v2030_v53  ;;  %v2032_v58 = vadd.f32 %v2031_v57, %v1951_v56 }
0x101d   :  { %v2256_v38 = vpop.f32.mrf.mxu1 }
0x101e   :  { %v3769_v55 = vmul.f32 -1.442695, %v2046_v54  ;;  %v2047_v60 = vadd.f32 %v2043_v59, %v2032_v58 }
0x101f   :  { %v2258_v45 = vpop.f32.mrf.mxu1 }
0x1020   :  { %3928 = vpow2.f32 %v3769_v55  ;;  %v3770_v21 = vmul.f32 -1.442695, %v2047_v60 }
0x1021   :  { %3930 = vtanh.f32 %v2047_v60 }
0x102d   :  { %v3929_v61 = vpop.eup %3928 }
0x102e   :  { %v2051_v62 = vadd.f32 1.0, %v3929_v61  ;;  %v3931_v63 = vpop.eup %3930 }
0x1030   :  { %3932 = vrcp.f32 %v2051_v62  ;;  %v3778_v62 = vld [vmem:[%s4820_s0 + $0x14] sm:$0x3] }
0x1031   :  { %3934 = vpow2.f32 %v3770_v21 }
0x103d   :  { %v3933_v12 = vpop.eup %3932 }
0x103e   :  { %v2067_v14 = vmul.f32 %v3933_v12, %v3931_v63  ;;  %v3935_v22 = vpop.eup %3934  ;;  %v2066_v25 = vmul.f32 %v3933_v12, %v2064_v10 }
0x103f   :  { %v2058_v23 = vadd.f32 1.0, %v3935_v22 }
0x1040   :  { %2069 = vrot.lane.b32.xlu1 %v2067_v14, %s4094_s28 }
0x1041   :  { %3936 = vrcp.f32 %v2058_v23 }
0x104e   :  { %v3937_v29 = vpop.eup %3936 }
0x10b2   :  { %v2070_v26 = vpop.permute.xlu1 %2069 }
0x10b3   :  { %v2072_v27 = vadd.f32 %v2070_v26, %v2066_v25  ;;  %v2488_v25 = vld [vmem:[%s4823_s3] sm:$0x3] }
0x10b4   :  { %v2493_v26 = vrot.slane %v2488_v25, %v4230_v24 }
0x10b5   :  { %3938 = vtanh.f32 %v2072_v27  ;;  %2076 = vrot.lane.b32.xlu1 %v2072_v27, %s4094_s28 }
0x10c2   :  { %v3939_v30 = vpop.eup %3938 }
0x10c3   :  { %v2074_v31 = vmul.f32 %v3939_v30, %v3937_v29 }
0x10c5   :  { %2081 = vrot.lane.b32.xlu0 %v2074_v31, %s4094_s28 }
0x1127   :  { %v2077_v33 = vpop.permute.xlu1 %2076 }
0x1128   :  { %2079 = vst.msk [vmem:[#allocation3] sm:$0x3] %vm39_vm0, %v2077_v33 }
0x112f   :  { %v2288_v34 = vld [vmem:[#allocation3] sm:$0x3] }
0x1130   :  { %2290 = vrot.lane.b32.xlu0 %v2288_v34, %s4094_s28 }
0x1137   :  { %v2082_v35 = vpop.permute.xlu0 %2081 }
0x1138   :  { %2084 = vst.msk [vmem:[#allocation2] sm:$0x3] %vm39_vm0, %v2082_v35  ;;  %2086 = vst.msk [vmem:[#allocation7 + $0x10] sm:$0x3] %vm39_vm0, %v2082_v35 }
0x113f   :  { %v2090_v36 = vld [vmem:[#allocation2] sm:$0x3] }
0x1140   :  { %3772 = vmatmul.mubr.msk.f32.vlgmr.msra.gmra.mxu0 %vm61_vm3, %v2090_v36  ;;  %v2497_v36 = vrot.slane %v2488_v25, %v4236_v32 }
0x1141   :  { %3781 = vmatpush1.msk.msra.mxu0 %vm142_vm1, %v4488_v18  ;;  %2481 = vmatprep.mubr.f32.mxu0 %v4093_v0 }
0x1142   :  { %2580 = vmatprep.subr.mxu0 %v4451_v44 }
0x1144   :  { %3782 = vmatmul.mubr.msk.f32.vlgmr.msra.gmra.mxu0 %vm138_vm2, %v3778_v62 }
0x1145   :  { %2581 = vmatpush1.msra.mxu0 %v4454_v48  ;;  %2628 = vmatprep.mubr.f32.mxu0 %v4093_v0 }
0x1146   :  { %2582 = vmatprep.subr.mxu0 %v4456_v49 }
0x1147   :  { %2583 = vmatpush1.msra.mxu0 %v4458_v2 }
0x1148   :  { %2584 = vmatprep.subr.mxu0 %v4461_v4 }
0x1149   :  { %2585 = vmatpush1.msra.mxu0 %v4464_v6 }
0x114a   :  { %2586 = vmatprep.subr.mxu0 %v4467_v9 }
0x114b   :  { %2587 = vmatpush1.msra.mxu0 %v4470_v11 }
0x114c   :  { %2588 = vmatprep.subr.mxu0 %v4476_v13 }
0x114d   :  { %2589 = vmatpush1.msra.mxu0 %v4478_v15 }
0x114e   :  { %2590 = vmatprep.subr.mxu0 %v4480_v16 }
0x114f   :  { %2591 = vmatpush1.msra.mxu0 %v4483_v17 }
0x1150   :  { %2592 = vmatprep.subr.mxu0 %v4495_v20 }
0x1151   :  { %2593 = vmatpush1.msra.mxu0 %v4498_v50 }
0x1152   :  { %2594 = vmatprep.subr.mxu0 %v4506_v51 }
0x1153   :  { %2595 = vmatpush1.msra.mxu0 %v4511_v52 }
0x1154   :  { %3794 = vmatprep.subr.msk.mxu0 %vm142_vm1, %v4493_v19 }
0x11a2   :  { %v2291_v57 = vpop.permute.xlu0 %2290 }
0x1200   :  { %v2176_v39 = vpop.f32.mrf.mxu0 }
0x1201   :  { %v2257_v40 = vadd.f32 %v2256_v38, %v2176_v39 }
0x1202   :  { %v2178_v43 = vpop.f32.mrf.mxu0 }
0x1203   :  { %v2273_v41 = vadd.f32 %v2266_v37, %v2257_v40  ;;  %v2259_v46 = vadd.f32 %v2258_v45, %v2178_v43 }
0x1204   :  { %v2483_v27 = vpop.f32.mrf.mxu0 }
0x1205   :  { %v3776_v42 = vmul.f32 -1.442695, %v2273_v41  ;;  %v2274_v3 = vadd.f32 %v2270_v47, %v2259_v46 }
0x1206   :  { %v2485_v34 = vpop.f32.mrf.mxu0 }
0x1207   :  { %3940 = vpow2.f32 %v3776_v42  ;;  %v3777_v55 = vmul.f32 -1.442695, %v2274_v3 }
0x1208   :  { %3942 = vtanh.f32 %v2274_v3 }
0x1214   :  { %v3941_v5 = vpop.eup %3940 }
0x1215   :  { %v2278_v7 = vadd.f32 1.0, %v3941_v5  ;;  %v3943_v8 = vpop.eup %3942 }
0x1217   :  { %3944 = vrcp.f32 %v2278_v7  ;;  %v3785_v7 = vld [vmem:[%s4820_s0 + $0x16] sm:$0x3] }
0x1218   :  { %3946 = vpow2.f32 %v3777_v55 }
0x1224   :  { %v3945_v53 = vpop.eup %3944 }
0x1225   :  { %v2294_v54 = vmul.f32 %v3945_v53, %v3943_v8  ;;  %v3947_v56 = vpop.eup %3946  ;;  %v2293_v59 = vmul.f32 %v3945_v53, %v2291_v57 }
0x1226   :  { %v2285_v58 = vadd.f32 1.0, %v3947_v56 }
0x1227   :  { %2296 = vrot.lane.b32.xlu1 %v2294_v54, %s4094_s28 }
0x1228   :  { %3948 = vrcp.f32 %v2285_v58 }
0x1235   :  { %v3949_v63 = vpop.eup %3948 }
0x1299   :  { %v2297_v60 = vpop.permute.xlu1 %2296 }
0x129a   :  { %v2299_v61 = vadd.f32 %v2297_v60, %v2293_v59 }
0x129c   :  { %3950 = vtanh.f32 %v2299_v61  ;;  %2303 = vrot.lane.b32.xlu1 %v2299_v61, %s4094_s28 }
0x12a9   :  { %v3951_v12 = vpop.eup %3950 }
0x12aa   :  { %v2301_v14 = vmul.f32 %v3951_v12, %v3949_v63 }
0x12ac   :  { %2308 = vrot.lane.b32.xlu0 %v2301_v14, %s4094_s28 }
0x130e   :  { %v2304_v21 = vpop.permute.xlu1 %2303 }
0x130f   :  { %2306 = vst.msk [vmem:[#allocation3] sm:$0x3] %vm39_vm0, %v2304_v21 }
0x1316   :  { %v2515_v22 = vld [vmem:[#allocation3] sm:$0x3] }
0x1317   :  { %2517 = vrot.lane.b32.xlu0 %v2515_v22, %s4094_s28 }
0x131e   :  { %v2309_v10 = vpop.permute.xlu0 %2308 }
0x131f   :  { %2313 = vst.msk [vmem:[#allocation7 + $0x12] sm:$0x3] %vm39_vm0, %v2309_v10  ;;  %2311 = vst.msk [vmem:[#allocation2] sm:$0x3] %vm39_vm0, %v2309_v10 }
0x1326   :  { %v2317_v23 = vld [vmem:[#allocation2] sm:$0x3] }
0x1327   :  { %3779 = vmatmul.mubr.msk.f32.vlgmr.msra.gmra.mxu1 %vm61_vm3, %v2317_v23 }
0x1328   :  { %3788 = vmatpush1.msk.msra.mxu1 %vm142_vm1, %v4488_v18  ;;  %2708 = vmatprep.mubr.f32.mxu1 %v4093_v0 }
0x1329   :  { %2807 = vmatprep.subr.mxu1 %v4451_v44 }
0x132b   :  { %3789 = vmatmul.mubr.msk.f32.vlgmr.msra.gmra.mxu1 %vm138_vm2, %v3785_v7 }
0x132c   :  { %2808 = vmatpush1.msra.mxu1 %v4454_v48  ;;  %2855 = vmatprep.mubr.f32.mxu1 %v4093_v0 }
0x132d   :  { %2809 = vmatprep.subr.mxu1 %v4456_v49 }
0x132e   :  { %2810 = vmatpush1.msra.mxu1 %v4458_v2 }
0x132f   :  { %2811 = vmatprep.subr.mxu1 %v4461_v4 }
0x1330   :  { %2812 = vmatpush1.msra.mxu1 %v4464_v6 }
0x1331   :  { %2813 = vmatprep.subr.mxu1 %v4467_v9 }
0x1332   :  { %2814 = vmatpush1.msra.mxu1 %v4470_v11 }
0x1333   :  { %2815 = vmatprep.subr.mxu1 %v4476_v13 }
0x1334   :  { %2816 = vmatpush1.msra.mxu1 %v4478_v15 }
0x1335   :  { %2817 = vmatprep.subr.mxu1 %v4480_v16 }
0x1336   :  { %2818 = vmatpush1.msra.mxu1 %v4483_v17 }
0x1337   :  { %2819 = vmatprep.subr.mxu1 %v4495_v20 }
0x1338   :  { %2820 = vmatpush1.msra.mxu1 %v4498_v50 }
0x1339   :  { %2821 = vmatprep.subr.mxu1 %v4506_v51 }
0x133a   :  { %2822 = vmatpush1.msra.mxu1 %v4511_v52 }
0x133b   :  { %3801 = vmatprep.subr.msk.mxu1 %vm142_vm1, %v4493_v19  ;;  %v2715_v19 = vld [vmem:[%s4823_s3] sm:$0x3] }
0x133c   :  { %v2720_v59 = vrot.slane %v2715_v19, %v4230_v24  ;;  %v2724_v10 = vrot.slane %v2715_v19, %v4236_v32 }
0x1389   :  { %v2518_v45 = vpop.permute.xlu0 %2517 }
0x13e7   :  { %v2403_v28 = vpop.f32.mrf.mxu1 }
0x13e8   :  { %v2484_v29 = vadd.f32 %v2483_v27, %v2403_v28 }
0x13e9   :  { %v2405_v33 = vpop.f32.mrf.mxu1 }
0x13ea   :  { %v2500_v30 = vadd.f32 %v2493_v26, %v2484_v29  ;;  %v2486_v35 = vadd.f32 %v2485_v34, %v2405_v33 }
0x13eb   :  { %v2710_v60 = vpop.f32.mrf.mxu1 }
0x13ec   :  { %v3783_v31 = vmul.f32 -1.442695, %v2500_v30  ;;  %v2501_v1 = vadd.f32 %v2497_v36, %v2486_v35 }
0x13ed   :  { %v2712_v21 = vpop.f32.mrf.mxu1 }
0x13ee   :  { %3952 = vpow2.f32 %v3783_v31  ;;  %v3784_v42 = vmul.f32 -1.442695, %v2501_v1 }
0x13ef   :  { %3954 = vtanh.f32 %v2501_v1  ;;  %v3792_v1 = vld [vmem:[%s4820_s0 + $0x18] sm:$0x3] }
0x13fb   :  { %v3953_v37 = vpop.eup %3952 }
0x13fc   :  { %v2505_v38 = vadd.f32 1.0, %v3953_v37  ;;  %v3955_v39 = vpop.eup %3954 }
0x13fe   :  { %3956 = vrcp.f32 %v2505_v38 }
0x13ff   :  { %3958 = vpow2.f32 %v3784_v42 }
0x140b   :  { %v3957_v40 = vpop.eup %3956 }
0x140c   :  { %v2521_v41 = vmul.f32 %v3957_v40, %v3955_v39  ;;  %v3959_v43 = vpop.eup %3958  ;;  %v2520_v47 = vmul.f32 %v3957_v40, %v2518_v45 }
0x140d   :  { %v2512_v46 = vadd.f32 1.0, %v3959_v43 }
0x140e   :  { %2523 = vrot.lane.b32.xlu1 %v2521_v41, %s4094_s28 }
0x140f   :  { %3960 = vrcp.f32 %v2512_v46 }
0x141c   :  { %v3961_v8 = vpop.eup %3960 }
0x1480   :  { %v2524_v3 = vpop.permute.xlu1 %2523 }
0x1481   :  { %v2526_v5 = vadd.f32 %v2524_v3, %v2520_v47 }
0x1483   :  { %3962 = vtanh.f32 %v2526_v5  ;;  %2530 = vrot.lane.b32.xlu1 %v2526_v5, %s4094_s28 }
0x1490   :  { %v3963_v53 = vpop.eup %3962 }
0x1491   :  { %v2528_v54 = vmul.f32 %v3963_v53, %v3961_v8 }
0x1493   :  { %2535 = vrot.lane.b32.xlu0 %v2528_v54, %s4094_s28  ;;  %v3799_v54 = vld [vmem:[%s4820_s0 + $0x1a] sm:$0x3] }
0x14f5   :  { %v2531_v55 = vpop.permute.xlu1 %2530 }
0x14f6   :  { %2533 = vst.msk [vmem:[#allocation3] sm:$0x3] %vm39_vm0, %v2531_v55 }
0x14fd   :  { %v2742_v56 = vld [vmem:[#allocation3] sm:$0x3] }
0x14fe   :  { %2744 = vrot.lane.b32.xlu0 %v2742_v56, %s4094_s28 }
0x1505   :  { %v2536_v57 = vpop.permute.xlu0 %2535 }
0x1506   :  { %2540 = vst.msk [vmem:[#allocation7 + $0x14] sm:$0x3] %vm39_vm0, %v2536_v57  ;;  %2538 = vst.msk [vmem:[#allocation2] sm:$0x3] %vm39_vm0, %v2536_v57 }
0x150d   :  { %v2544_v58 = vld [vmem:[#allocation2] sm:$0x3] }
0x150e   :  { %3786 = vmatmul.mubr.msk.f32.vlgmr.msra.gmra.mxu0 %vm61_vm3, %v2544_v58 }
0x150f   :  { %3795 = vmatpush1.msk.msra.mxu0 %vm142_vm1, %v4488_v18  ;;  %2935 = vmatprep.mubr.f32.mxu0 %v4093_v0 }
0x1510   :  { %3034 = vmatprep.subr.mxu0 %v4451_v44 }
0x1512   :  { %3796 = vmatmul.mubr.msk.f32.vlgmr.msra.gmra.mxu0 %vm138_vm2, %v3792_v1 }
0x1513   :  { %3035 = vmatpush1.msra.mxu0 %v4454_v48  ;;  %3082 = vmatprep.mubr.f32.mxu0 %v4093_v0 }
0x1514   :  { %3036 = vmatprep.subr.mxu0 %v4456_v49 }
0x1515   :  { %3037 = vmatpush1.msra.mxu0 %v4458_v2 }
0x1516   :  { %3038 = vmatprep.subr.mxu0 %v4461_v4 }
0x1517   :  { %3039 = vmatpush1.msra.mxu0 %v4464_v6 }
0x1518   :  { %3040 = vmatprep.subr.mxu0 %v4467_v9  ;;  %v2942_v9 = vld [vmem:[%s4823_s3] sm:$0x3] }
0x1519   :  { %3041 = vmatpush1.msra.mxu0 %v4470_v11  ;;  %v2947_v11 = vrot.slane %v2942_v9, %v4230_v24  ;;  %v2951_v39 = vrot.slane %v2942_v9, %v4236_v32 }
0x151a   :  { %3042 = vmatprep.subr.mxu0 %v4476_v13 }
0x151b   :  { %3043 = vmatpush1.msra.mxu0 %v4478_v15 }
0x151c   :  { %3044 = vmatprep.subr.mxu0 %v4480_v16 }
0x151d   :  { %3045 = vmatpush1.msra.mxu0 %v4483_v17 }
0x151e   :  { %3046 = vmatprep.subr.mxu0 %v4495_v20 }
0x151f   :  { %3047 = vmatpush1.msra.mxu0 %v4498_v50 }
0x1520   :  { %3048 = vmatprep.subr.mxu0 %v4506_v51 }
0x1521   :  { %3049 = vmatpush1.msra.mxu0 %v4511_v52 }
0x1570   :  { %v2745_v31 = vpop.permute.xlu0 %2744 }
0x15ce   :  { %v2630_v61 = vpop.f32.mrf.mxu0 }
0x15cf   :  { %v2711_v62 = vadd.f32 %v2710_v60, %v2630_v61  ;;  %v3169_v61 = vld [vmem:[%s4823_s3] sm:$0x3] }
0x15d0   :  { %v2632_v14 = vpop.f32.mrf.mxu0 }
0x15d1   :  { %v2727_v63 = vadd.f32 %v2720_v59, %v2711_v62  ;;  %v2713_v22 = vadd.f32 %v2712_v21, %v2632_v14  ;;  %v3174_v62 = vrot.slane %v3169_v61, %v4230_v24 }
0x15d2   :  { %v2937_v13 = vpop.f32.mrf.mxu0 }
0x15d3   :  { %v3790_v12 = vmul.f32 -1.442695, %v2727_v63  ;;  %v2728_v23 = vadd.f32 %v2724_v10, %v2713_v22 }
0x15d4   :  { %v2939_v51 = vpop.f32.mrf.mxu0 }
0x15d5   :  { %3964 = vpow2.f32 %v3790_v12  ;;  %v3791_v29 = vmul.f32 -1.442695, %v2728_v23 }
0x15d6   :  { %3966 = vtanh.f32 %v2728_v23 }
0x15e2   :  { %v3965_v25 = vpop.eup %3964 }
0x15e3   :  { %v2732_v44 = vadd.f32 1.0, %v3965_v25  ;;  %v3967_v26 = vpop.eup %3966 }
0x15e5   :  { %3968 = vrcp.f32 %v2732_v44  ;;  %v3178_v44 = vrot.slane %v3169_v61, %v4236_v32 }
0x15e6   :  { %3970 = vpow2.f32 %v3791_v29 }
0x15f2   :  { %v3969_v27 = vpop.eup %3968 }
0x15f3   :  { %v2748_v28 = vmul.f32 %v3969_v27, %v3967_v26  ;;  %v3971_v30 = vpop.eup %3970  ;;  %v2747_v34 = vmul.f32 %v3969_v27, %v2745_v31 }
0x15f4   :  { %v2739_v33 = vadd.f32 1.0, %v3971_v30 }
0x15f5   :  { %2750 = vrot.lane.b32.xlu1 %v2748_v28, %s4094_s28 }
0x15f6   :  { %3972 = vrcp.f32 %v2739_v33 }
0x1603   :  { %v3973_v37 = vpop.eup %3972 }
0x1667   :  { %v2751_v35 = vpop.permute.xlu1 %2750 }
0x1668   :  { %v2753_v36 = vadd.f32 %v2751_v35, %v2747_v34  ;;  %v3241_v34 = vld [vmem:[#allocation4 + $0x78] sm:$0xff] }
0x166a   :  { %3974 = vtanh.f32 %v2753_v36  ;;  %2757 = vrot.lane.b32.xlu1 %v2753_v36, %s4094_s28 }
0x1677   :  { %v3975_v38 = vpop.eup %3974 }
0x1678   :  { %v2755_v48 = vmul.f32 %v3975_v38, %v3973_v37  ;;  %v3240_v37 = vld [vmem:[#allocation4 + $0x70] sm:$0xff]  ;;  %v3239_v38 = vld [vmem:[#allocation4 + $0x68] sm:$0xff] }
0x167a   :  { %2762 = vrot.lane.b32.xlu0 %v2755_v48, %s4094_s28  ;;  %v3238_v48 = vld [vmem:[#allocation4 + $0x60] sm:$0xff] }
0x16dc   :  { %v2758_v49 = vpop.permute.xlu1 %2757 }
0x16dd   :  { %2760 = vst.msk [vmem:[#allocation3] sm:$0x3] %vm39_vm0, %v2758_v49 }
0x16e4   :  { %v2969_v2 = vld [vmem:[#allocation3] sm:$0x3] }
0x16e5   :  { %2971 = vrot.lane.b32.xlu0 %v2969_v2, %s4094_s28  ;;  %v3237_v2 = vld [vmem:[#allocation4 + $0x58] sm:$0xff] }
0x16ec   :  { %v2763_v4 = vpop.permute.xlu0 %2762 }
0x16ed   :  { %2767 = vst.msk [vmem:[#allocation7 + $0x16] sm:$0x3] %vm39_vm0, %v2763_v4  ;;  %2765 = vst.msk [vmem:[#allocation2] sm:$0x3] %vm39_vm0, %v2763_v4 }
0x16f4   :  { %v2771_v6 = vld [vmem:[#allocation2] sm:$0x3] }
0x16f5   :  { %3793 = vmatmul.mubr.msk.f32.vlgmr.msra.gmra.mxu1 %vm61_vm3, %v2771_v6  ;;  %v3236_v6 = vld [vmem:[#allocation4 + $0x50] sm:$0xff] }
0x16f6   :  { %3802 = vmatpush1.msk.msra.mxu1 %vm142_vm1, %v4488_v18  ;;  %3162 = vmatprep.mubr.f32.mxu1 %v4093_v0 }
0x16f7   :  { %3261 = vmatprep.subr.mxu1 %v3241_v34 }
0x16f9   :  { %3803 = vmatmul.mubr.msk.f32.vlgmr.msra.gmra.mxu1 %vm138_vm2, %v3799_v54 }
0x16fa   :  { %3309 = vmatprep.mubr.f32.mxu1 %v4093_v0  ;;  %3262 = vmatpush1.msra.mxu1 %v3240_v37 }
0x16fb   :  { %3263 = vmatprep.subr.mxu1 %v3239_v38 }
0x16fc   :  { %3264 = vmatpush1.msra.mxu1 %v3238_v48 }
0x16fd   :  { %3265 = vmatprep.subr.mxu1 %v3237_v2 }
0x16fe   :  { %3266 = vmatpush1.msra.mxu1 %v3236_v6 }
0x1757   :  { %v2972_v3 = vpop.permute.xlu0 %2971 }
0x17b5   :  { %v2857_v15 = vpop.f32.mrf.mxu1 }
0x17b6   :  { %v2938_v16 = vadd.f32 %v2937_v13, %v2857_v15  ;;  %v3234_v13 = vld [vmem:[#allocation4 + $0x40] sm:$0xff]  ;;  %v3233_v15 = vld [vmem:[#allocation4 + $0x38] sm:$0xff] }
0x17b7   :  { %v2859_v50 = vpop.f32.mrf.mxu1 }
0x17b8   :  { %v2954_v17 = vadd.f32 %v2947_v11, %v2938_v16  ;;  %v2940_v52 = vadd.f32 %v2939_v51, %v2859_v50  ;;  %v3235_v11 = vld [vmem:[#allocation4 + $0x48] sm:$0xff]  ;;  %v3232_v16 = vld [vmem:[#allocation4 + $0x30] sm:$0xff]  ;;  %v3224_v50 = vld [vmem:[%s4821_s1] sm:$0xff] }
0x17b9   :  { %v3164_v63 = vpop.f32.mrf.mxu1  ;;  %3267 = vmatprep.subr.mxu1 %v3235_v11  ;;  %v3317_v51 = vcombine.high %v3224_v50, %v3224_v50 }
0x17ba   :  { %v3797_v20 = vmul.f32 -1.442695, %v2954_v17  ;;  %v2955_v18 = vadd.f32 %v2951_v39, %v2940_v52  ;;  %3268 = vmatpush1.msra.mxu1 %v3234_v13  ;;  %v3231_v17 = vld [vmem:[#allocation4 + $0x28] sm:$0xff]  ;;  %v3229_v52 = vld [vmem:[#allocation4 + $0x18] sm:$0xff]  ;;  %v3228_v39 = vld [vmem:[#allocation4 + $0x10] sm:$0xff] }
0x17bb   :  { %v3166_v23 = vpop.f32.mrf.mxu1  ;;  %3269 = vmatprep.subr.mxu1 %v3233_v15  ;;  %3808 = vmatprep.subr.msk.mxu0 %vm142_vm1, %v3317_v51 }
0x17bc   :  { %3976 = vpow2.f32 %v3797_v20  ;;  %v3798_v46 = vmul.f32 -1.442695, %v2955_v18  ;;  %v3230_v20 = vld [vmem:[#allocation4 + $0x20] sm:$0xff]  ;;  %3270 = vmatpush1.msra.mxu1 %v3232_v16 }
0x17bd   :  { %3978 = vtanh.f32 %v2955_v18  ;;  %3271 = vmatprep.subr.mxu1 %v3231_v17  ;;  %v3806_v18 = vld [vmem:[%s4820_s0 + $0x1c] sm:$0x3] }
0x17be   :  { %3272 = vmatpush1.msra.mxu1 %v3230_v20 }
0x17bf   :  { %3273 = vmatprep.subr.mxu1 %v3229_v52 }
0x17c0   :  { %3274 = vmatpush1.msra.mxu1 %v3228_v39 }
0x17c9   :  { %v3977_v40 = vpop.eup %3976 }
0x17ca   :  { %v2959_v41 = vadd.f32 1.0, %v3977_v40  ;;  %v3979_v42 = vpop.eup %3978  ;;  %v3227_v40 = vld [vmem:[#allocation4 + $0x8] sm:$0xff] }
0x17cb   :  { %3275 = vmatprep.subr.mxu1 %v3227_v40 }
0x17cc   :  { %3980 = vrcp.f32 %v2959_v41  ;;  %v3226_v41 = vld [vmem:[#allocation4] sm:$0xff] }
0x17cd   :  { %3982 = vpow2.f32 %v3798_v46  ;;  %3276 = vmatpush1.msra.mxu1 %v3226_v41 }
0x17ce   :  { %3815 = vmatprep.subr.msk.mxu1 %vm142_vm1, %v3317_v51 }
0x17d9   :  { %v3981_v43 = vpop.eup %3980 }
0x17da   :  { %v2975_v45 = vmul.f32 %v3981_v43, %v3979_v42  ;;  %v3983_v47 = vpop.eup %3982  ;;  %v2974_v7 = vmul.f32 %v3981_v43, %v2972_v3 }
0x17db   :  { %v2966_v5 = vadd.f32 1.0, %v3983_v47 }
0x17dc   :  { %2977 = vrot.lane.b32.xlu1 %v2975_v45, %s4094_s28 }
0x17dd   :  { %3984 = vrcp.f32 %v2966_v5 }
0x17ea   :  { %v3985_v55 = vpop.eup %3984 }
0x184e   :  { %v2978_v8 = vpop.permute.xlu1 %2977 }
0x184f   :  { %v2980_v53 = vadd.f32 %v2978_v8, %v2974_v7  ;;  %v3396_v7 = vld [vmem:[%s4823_s3] sm:$0x3] }
0x1850   :  { %v3401_v8 = vrot.slane %v3396_v7, %v4230_v24 }
0x1851   :  { %3986 = vtanh.f32 %v2980_v53  ;;  %2984 = vrot.lane.b32.xlu1 %v2980_v53, %s4094_s28 }
0x185e   :  { %v3987_v56 = vpop.eup %3986 }
0x185f   :  { %v2982_v57 = vmul.f32 %v3987_v56, %v3985_v55 }
0x1861   :  { %2989 = vrot.lane.b32.xlu0 %v2982_v57, %s4094_s28 }
0x18c3   :  { %v2985_v58 = vpop.permute.xlu1 %2984 }
0x18c4   :  { %2987 = vst.msk [vmem:[#allocation3] sm:$0x3] %vm39_vm0, %v2985_v58 }
0x18cb   :  { %v3196_v19 = vld [vmem:[#allocation3] sm:$0x3] }
0x18cc   :  { %3198 = vrot.lane.b32.xlu0 %v3196_v19, %s4094_s28 }
0x18d3   :  { %v2990_v59 = vpop.permute.xlu0 %2989 }
0x18d4   :  { %2994 = vst.msk [vmem:[#allocation7 + $0x18] sm:$0x3] %vm39_vm0, %v2990_v59  ;;  %2992 = vst.msk [vmem:[#allocation2] sm:$0x3] %vm39_vm0, %v2990_v59 }
0x18db   :  { %v2998_v60 = vld [vmem:[#allocation2] sm:$0x3] }
0x18dc   :  { %3800 = vmatmul.mubr.msk.f32.vlgmr.msra.gmra.mxu0 %vm61_vm3, %v2998_v60  ;;  %v3405_v60 = vrot.slane %v3396_v7, %v4236_v32 }
0x18dd   :  { %3389 = vmatprep.mubr.f32.mxu0 %v4093_v0  ;;  %3809 = vmatpush1.msk.msra.mxu0 %vm142_vm1, %v3224_v50 }
0x18de   :  { %3488 = vmatprep.subr.mxu0 %v3241_v34 }
0x18e0   :  { %3810 = vmatmul.mubr.msk.f32.vlgmr.msra.gmra.mxu0 %vm138_vm2, %v3806_v18 }
0x18e1   :  { %3489 = vmatpush1.msra.mxu0 %v3240_v37  ;;  %3536 = vmatprep.mubr.f32.mxu0 %v4093_v0 }
0x18e2   :  { %3490 = vmatprep.subr.mxu0 %v3239_v38 }
0x18e3   :  { %3491 = vmatpush1.msra.mxu0 %v3238_v48 }
0x18e4   :  { %3492 = vmatprep.subr.mxu0 %v3237_v2 }
0x18e5   :  { %3493 = vmatpush1.msra.mxu0 %v3236_v6 }
0x18e6   :  { %3494 = vmatprep.subr.mxu0 %v3235_v11 }
0x18e7   :  { %3495 = vmatpush1.msra.mxu0 %v3234_v13 }
0x18e8   :  { %3496 = vmatprep.subr.mxu0 %v3233_v15 }
0x18e9   :  { %3497 = vmatpush1.msra.mxu0 %v3232_v16 }
0x18ea   :  { %3498 = vmatprep.subr.mxu0 %v3231_v17 }
0x18eb   :  { %3499 = vmatpush1.msra.mxu0 %v3230_v20 }
0x18ec   :  { %3500 = vmatprep.subr.mxu0 %v3229_v52 }
0x18ed   :  { %3501 = vmatpush1.msra.mxu0 %v3228_v39 }
0x18ee   :  { %3502 = vmatprep.subr.mxu0 %v3227_v40 }
0x18ef   :  { %3503 = vmatpush1.msra.mxu0 %v3226_v41 }
0x193e   :  { %v3199_v36 = vpop.permute.xlu0 %3198 }
0x199c   :  { %v3084_v12 = vpop.f32.mrf.mxu0 }
0x199d   :  { %v3165_v14 = vadd.f32 %v3164_v63, %v3084_v12 }
0x199e   :  { %v3086_v10 = vpop.f32.mrf.mxu0 }
0x199f   :  { %v3181_v21 = vadd.f32 %v3174_v62, %v3165_v14  ;;  %v3167_v25 = vadd.f32 %v3166_v23, %v3086_v10 }
0x19a0   :  { %v3391_v53 = vpop.f32.mrf.mxu0 }
0x19a1   :  { %v3804_v22 = vmul.f32 -1.442695, %v3181_v21  ;;  %v3182_v26 = vadd.f32 %v3178_v44, %v3167_v25 }
0x19a2   :  { %v3393_v19 = vpop.f32.mrf.mxu0 }
0x19a3   :  { %3988 = vpow2.f32 %v3804_v22  ;;  %v3805_v33 = vmul.f32 -1.442695, %v3182_v26 }
0x19a4   :  { %3990 = vtanh.f32 %v3182_v26 }
0x19b0   :  { %v3989_v27 = vpop.eup %3988 }
0x19b1   :  { %v3186_v28 = vadd.f32 1.0, %v3989_v27  ;;  %v3991_v29 = vpop.eup %3990  ;;  %v3813_v27 = vld [vmem:[%s4820_s0 + $0x1e] sm:$0x3] }
0x19b3   :  { %3992 = vrcp.f32 %v3186_v28 }
0x19b4   :  { %3994 = vpow2.f32 %v3805_v33 }
0x19c0   :  { %v3993_v30 = vpop.eup %3992 }
0x19c1   :  { %v3202_v31 = vmul.f32 %v3993_v30, %v3991_v29  ;;  %v3995_v35 = vpop.eup %3994  ;;  %v3201_v49 = vmul.f32 %v3993_v30, %v3199_v36  ;;  %v3623_v36 = vld [vmem:[%s4823_s3] sm:$0x3]  ;;  %s4095_s3 = smov [#allocation7]  }
0x19c2   :  { %v3193_v1 = vadd.f32 1.0, %v3995_v35  ;;  %v3632_v11 = vrot.slane %v3623_v36, %v4236_v32  ;;  %s3683_s18 = sshll.u32 %s4095_s3, 4  ;;  %s3684_s18 = int_to_ptr.vmem [resolvable:$true] %s3683_s18 }
0x19c3   :  { %3204 = vrot.lane.b32.xlu1 %v3202_v31, %s4094_s28  ;;  %s4044_s19 = scalar_lea.vmem %s3684_s18, 512  ;;  %p4049_p6 = scmp.lt.s32.totalorder %s3684_s18, %s3684_s18 }
0x19c4   :  { %3996 = vrcp.f32 %v3193_v1  ;;  %v3628_v1 = vrot.slane %v3623_v36, %v4230_v24  ;;  %p4045_p5 = scmp.ne.s32.totalorder %s3684_s18, %s4044_s19  ;;  %p4050_p7 = scmp.lt.s32.totalorder %s4044_s19, %s4044_s19 }
0x19c6   :  { %p4051_p8 = por %p4050_p7, %p4049_p6 }
0x19c8   :  { %p4052_p9 = pnand %p4051_p8, %p4045_p5 }
0x19d1   :  { %v3997_v42 = vpop.eup %3996 }
0x1a35   :  { %v3205_v4 = vpop.permute.xlu1 %3204 }
0x1a36   :  { %v3207_v9 = vadd.f32 %v3205_v4, %v3201_v49 }
0x1a38   :  { %3998 = vtanh.f32 %v3207_v9  ;;  %3211 = vrot.lane.b32.xlu1 %v3207_v9, %s4094_s28 }
0x1a45   :  { %v3999_v43 = vpop.eup %3998 }
0x1a46   :  { %v3209_v45 = vmul.f32 %v3999_v43, %v3997_v42 }
0x1a48   :  { %3216 = vrot.lane.b32.xlu0 %v3209_v45, %s4094_s28 }
0x1aaa   :  { %v3212_v46 = vpop.permute.xlu1 %3211 }
0x1aab   :  { %3214 = vst.msk [vmem:[#allocation3] sm:$0x3] %vm39_vm0, %v3212_v46 }
0x1ab2   :  { %v3423_v47 = vld [vmem:[#allocation3] sm:$0x3] }
0x1ab3   :  { %3425 = vrot.lane.b32.xlu0 %v3423_v47, %s4094_s28 }
0x1aba   :  { %v3217_v3 = vpop.permute.xlu0 %3216 }
0x1abb   :  { %3221 = vst.msk [vmem:[#allocation7 + $0x1a] sm:$0x3] %vm39_vm0, %v3217_v3  ;;  %3219 = vst.msk [vmem:[#allocation2] sm:$0x3] %vm39_vm0, %v3217_v3 }
0x1ac2   :  { %v3225_v5 = vld [vmem:[#allocation2] sm:$0x3] }
0x1ac3   :  { %3807 = vmatmul.mubr.msk.f32.vlgmr.msra.gmra.mxu1 %vm61_vm3, %v3225_v5 }
0x1ac4   :  { %3816 = vmatpush1.msk.msra.mxu1 %vm142_vm1, %v3224_v50  ;;  %3616 = vmatprep.mubr.f32.mxu1 %v4093_v0 }
0x1ac7   :  { %3817 = vmatmul.mubr.msk.f32.vlgmr.msra.gmra.mxu1 %vm138_vm2, %v3813_v27 }
0x1b25   :  { %v3426_v10 = vpop.permute.xlu0 %3425 }
0x1b83   :  { %v3311_v54 = vpop.f32.mrf.mxu1 }
0x1b84   :  { %v3392_v55 = vadd.f32 %v3391_v53, %v3311_v54 }
0x1b85   :  { %v3313_v58 = vpop.f32.mrf.mxu1 }
0x1b86   :  { %v3408_v56 = vadd.f32 %v3401_v8, %v3392_v55  ;;  %v3394_v59 = vadd.f32 %v3393_v19, %v3313_v58 }
0x1b87   :  { %v3618_v37 = vpop.f32.mrf.mxu1 }
0x1b88   :  { %v3811_v57 = vmul.f32 -1.442695, %v3408_v56  ;;  %v3409_v61 = vadd.f32 %v3405_v60, %v3394_v59 }
0x1b89   :  { %v3620_v6 = vpop.f32.mrf.mxu1 }
0x1b8a   :  { %4000 = vpow2.f32 %v3811_v57  ;;  %v3812_v21 = vmul.f32 -1.442695, %v3409_v61 }
0x1b8b   :  { %4002 = vtanh.f32 %v3409_v61 }
0x1b97   :  { %v4001_v62 = vpop.eup %4000 }
0x1b98   :  { %v3413_v0 = vadd.f32 1.0, %v4001_v62  ;;  %v4003_v63 = vpop.eup %4002 }
0x1b9a   :  { %4004 = vrcp.f32 %v3413_v0 }
0x1b9b   :  { %4006 = vpow2.f32 %v3812_v21 }
0x1ba7   :  { %v4005_v12 = vpop.eup %4004 }
0x1ba8   :  { %v3429_v14 = vmul.f32 %v4005_v12, %v4003_v63  ;;  %v4007_v22 = vpop.eup %4006  ;;  %v3428_v25 = vmul.f32 %v4005_v12, %v3426_v10 }
0x1ba9   :  { %v3420_v23 = vadd.f32 1.0, %v4007_v22 }
0x1baa   :  { %3431 = vrot.lane.b32.xlu1 %v3429_v14, %s4094_s28 }
0x1bab   :  { %4008 = vrcp.f32 %v3420_v23 }
0x1bb8   :  { %v4009_v28 = vpop.eup %4008 }
0x1c1c   :  { %v3432_v44 = vpop.permute.xlu1 %3431 }
0x1c1d   :  { %v3434_v26 = vadd.f32 %v3432_v44, %v3428_v25 }
0x1c1f   :  { %4010 = vtanh.f32 %v3434_v26  ;;  %3438 = vrot.lane.b32.xlu1 %v3434_v26, %s4094_s28 }
0x1c2c   :  { %v4011_v29 = vpop.eup %4010 }
0x1c2d   :  { %v3436_v30 = vmul.f32 %v4011_v29, %v4009_v28 }
0x1c2f   :  { %3443 = vrot.lane.b32.xlu0 %v3436_v30, %s4094_s28 }
0x1c91   :  { %v3439_v31 = vpop.permute.xlu1 %3438 }
0x1c92   :  { %3441 = vst.msk [vmem:[#allocation3] sm:$0x3] %vm39_vm0, %v3439_v31 }
0x1c99   :  { %v3650_v33 = vld [vmem:[#allocation3] sm:$0x3] }
0x1c9a   :  { %3652 = vrot.lane.b32.xlu0 %v3650_v33, %s4094_s28 }
0x1ca1   :  { %v3444_v34 = vpop.permute.xlu0 %3443 }
0x1ca2   :  { %3448 = vst.msk [vmem:[#allocation7 + $0x1c] sm:$0x3] %vm39_vm0, %v3444_v34  ;;  %3446 = vst.msk [vmem:[#allocation2] sm:$0x3] %vm39_vm0, %v3444_v34 }
0x1ca9   :  { %v3452_v35 = vld [vmem:[#allocation2] sm:$0x3] }
0x1caa   :  { %3814 = vmatmul.mubr.msk.f32.vlgmr.msra.gmra.mxu0 %vm61_vm3, %v3452_v35 }
0x1d0c   :  { %v3653_v52 = vpop.permute.xlu0 %3652 }
0x1d6a   :  { %v3538_v38 = vpop.f32.mrf.mxu0 }
0x1d6b   :  { %v3619_v48 = vadd.f32 %v3618_v37, %v3538_v38 }
0x1d6c   :  { %v3540_v4 = vpop.f32.mrf.mxu0 }
0x1d6d   :  { %v3635_v49 = vadd.f32 %v3628_v1, %v3619_v48  ;;  %v3621_v9 = vadd.f32 %v3620_v6, %v3540_v4 }
0x1d6f   :  { %v3818_v2 = vmul.f32 -1.442695, %v3635_v49  ;;  %v3636_v13 = vadd.f32 %v3632_v11, %v3621_v9 }
0x1d71   :  { %4012 = vpow2.f32 %v3818_v2  ;;  %v3819_v24 = vmul.f32 -1.442695, %v3636_v13 }
0x1d72   :  { %4014 = vtanh.f32 %v3636_v13 }
0x1d7e   :  { %v4013_v15 = vpop.eup %4012 }
0x1d7f   :  { %v3640_v16 = vadd.f32 1.0, %v4013_v15  ;;  %v4015_v17 = vpop.eup %4014 }
0x1d81   :  { %4016 = vrcp.f32 %v3640_v16 }
0x1d82   :  { %4018 = vpow2.f32 %v3819_v24 }
0x1d8e   :  { %v4017_v20 = vpop.eup %4016 }
0x1d8f   :  { %v3656_v50 = vmul.f32 %v4017_v20, %v4015_v17  ;;  %v4019_v51 = vpop.eup %4018  ;;  %v3655_v18 = vmul.f32 %v4017_v20, %v3653_v52 }
0x1d90   :  { %v3647_v39 = vadd.f32 1.0, %v4019_v51 }
0x1d91   :  { %3658 = vrot.lane.b32.xlu1 %v3656_v50, %s4094_s28 }
0x1d92   :  { %4020 = vrcp.f32 %v3647_v39 }
0x1d9f   :  { %v4021_v32 = vpop.eup %4020 }
0x1e03   :  { %v3659_v40 = vpop.permute.xlu1 %3658 }
0x1e04   :  { %v3661_v41 = vadd.f32 %v3659_v40, %v3655_v18 }
0x1e06   :  { %4022 = vtanh.f32 %v3661_v41  ;;  %3665 = vrot.lane.b32.xlu1 %v3661_v41, %s4094_s28 }
0x1e13   :  { %v4023_v42 = vpop.eup %4022 }
0x1e14   :  { %v3663_v43 = vmul.f32 %v4023_v42, %v4021_v32 }
0x1e16   :  { %3670 = vrot.lane.b32.xlu0 %v3663_v43, %s4094_s28 }
0x1e78   :  { %v3666_v45 = vpop.permute.xlu1 %3665 }
0x1e79   :  { %3668 = vst.msk [vmem:[#allocation3] sm:$0x3] %vm39_vm0, %v3666_v45 }
0x1e88   :  { %v3671_v46 = vpop.permute.xlu0 %3670 }
0x1e89   :  { %3675 = vst.msk [vmem:[#allocation7 + $0x1e] sm:$0x3] %vm39_vm0, %v3671_v46  ;;  %3673 = vst.msk [vmem:[#allocation2] sm:$0x3] %vm39_vm0, %v3671_v46 }
0x1e8a   :  { %4055 = shalt.err (!%p4052_p9)
}
0x1e8b   :  { %s4096_s20 = smov 32   ;;  %s4097_s28 = smov 2  }
0x1e8c   :  { %3689 = dma.vmem_to_hbm [thread:$0]  %s3684_s18, 512, %s4824_s4, [#allocation6], %s4096_s20, %s4096_s20, %s4097_s28  }
0x1e8d   :  { %s4098_s23 = smov [#allocation8]  }
0x1e8e   :  { %s3696_s24 = sshll.u32 %s4098_s23, 4  ;;  %s3697_s24 = int_to_ptr.vmem [resolvable:$true] %s3696_s24 }
0x1e8f   :  { %s4064_s2 = scalar_lea.vmem %s3697_s24, 32  ;;  %p4069_p11 = scmp.lt.s32.totalorder %s3697_s24, %s3697_s24 }
0x1e90   :  { %v3676_v47 = vld [vmem:[#allocation2] sm:$0x3]  ;;  %p4065_p10 = scmp.ne.s32.totalorder %s3697_s24, %s4064_s2  ;;  %p4070_p12 = scmp.lt.s32.totalorder %s4064_s2, %s4064_s2 }
0x1e91   :  { %3677 = vst.msk [vmem:[#allocation8] sm:$0x3] %vm39_vm0, %v3676_v47 }
0x1e92   :  { %p4071_p13 = por %p4070_p12, %p4069_p11 }
0x1e94   :  { %p4072_p0 = pnand %p4071_p13, %p4065_p10 }
0x1e96   :  { %4075 = shalt.err (!%p4072_p0)
}
0x1e97   :  { %3699 = dma.vmem_to_hbm [thread:$0]  %s3697_s24, 32, %s4825_s5, [#allocation9]  }
0x1e98   :  { %4086 = dma.done.wait [#allocation6], 512  }
0x1e99   :  { %4087 = vsyncadd [#allocation6], 4294966784 }
0x1e9a   :  { %4088 = dma.done.wait [#allocation9], 32  }
0x1e9b   :  { %4089 = vsyncadd [#allocation9], 4294967264 }
0x1e9c   :  { %3706 = vsyncpa [#allocation5], 1 }
0x1e9d   :  { %3707 = vsyncpa [#allocation6], 1 }
0x1e9e   :  { %3708 = vsyncpa [#allocation9], 1 }

</bundles_post_ra>
